<compile_context>
chip_gen: v7x
topology: tpu7x:2x2x1
jax: 0.10.0
libtpu: 0.0.40
codegen_flags: <defaults>
</compile_context>

<pallas_src>
import functools
import math

import jax
import jax.numpy as jnp
import numpy as np
from jax import lax
from jax.experimental import pallas as pl
from jax.experimental.pallas import tpu as pltpu

CHANNELS = [256, 128, 64, 1]
KERNEL_SIZE = 5
STRIDE = 2
PADDING = 2
STAGE = 3


def _out_len(l_in):
    # PyTorch ConvTranspose1d output length (dilation=1, output_padding=0).
    return (l_in - 1) * STRIDE - 2 * PADDING + KERNEL_SIZE


def _choose_batch_block(n, l0, lane_target=256):
    """Pick B (batch elements per grid step) so B*l0 fills the lanes.

    If the whole (padded) batch is small, use one grid step (block == full
    array, so the (8,128) BlockSpec rule is trivially satisfied).  Otherwise
    pick the smallest B with B*l0 a multiple of 128 and >= lane_target.
    """
    if n * l0 <= 512:
        return n
    step = 128 // math.gcd(l0, 128)          # minimal B with (B*l0) % 128 == 0
    b = step * max(1, -(-lane_target // (step * l0)))
    return b if b < n else n


def _make_scatter(b_blk, l_in, l_out_nat, l_out_cols):
    """Stacked batch-block-diagonal 0/1 scatter constants, shape
    (K, b_blk*l_in, b_blk*l_out_cols), bf16 (exact).

    A[k, b*l_in + j, b*l_out_cols + t] = 1  iff  t == 2*j + k - 2  and
    t < min(l_out_nat, l_out_cols): upsample-by-stride + tap shift + trim,
    with the pad-to-original_size tail left at zero.
    """
    valid = min(l_out_nat, l_out_cols)
    j = np.arange(l_in)[:, None]
    t = np.arange(l_out_cols)[None, :]
    eye = np.eye(b_blk, dtype=np.float32)
    mats = []
    for k in range(KERNEL_SIZE):
        a = ((t == STRIDE * j + (k - PADDING)) & (t < valid)).astype(np.float32)
        mats.append(np.kron(eye, a))          # batch-block-diagonal
    return jnp.asarray(np.stack(mats), jnp.bfloat16)


def _deconv_layer(h, w_ref, a_ref, bias):
    """One ConvTranspose1d, channels-on-sublanes / (batch*time)-on-lanes.

    h:      (C_in, B*L_in) bf16.
    w_ref:  (K*C_out, C_in) bf16 ref, row k*C_out+co holds torch_w[:, co, k].
    a_ref:  (K, B*L_in, B*L_out) bf16 0/1 scatter ref (precomputed).
    bias:   f32, broadcastable to (C_out, B*L_out).
    Returns (C_out, B*L_out) f32.
    """
    k_cout = w_ref.shape[0]
    c_out = k_cout // KERNEL_SIZE
    b_lout = a_ref.shape[2]

    # Single tap-fused channel contraction on the un-upsampled input
    # (polyphase FLOP count, one MXU push/pop instead of five).
    taps = jnp.dot(w_ref[...], h, preferred_element_type=jnp.float32)
    taps = taps.astype(jnp.bfloat16)          # bf16 scatter operand (review)

    acc = jnp.zeros((c_out, b_lout), jnp.float32)
    for k in range(KERNEL_SIZE):              # static unroll over the 5 taps
        tap_k = taps[k * c_out:(k + 1) * c_out, :]
        acc = acc + jnp.dot(tap_k, a_ref[k], preferred_element_type=jnp.float32)
    return acc + bias


def _decoder_kernel(x_ref, w1_ref, b1_ref, a1_ref, w2_ref, b2_ref, a2_ref,
                    w3_ref, brow3_ref, a3_ref, o_ref):
    h = _deconv_layer(x_ref[...], w1_ref, a1_ref, b1_ref[...])
    h = _deconv_layer(h.astype(jnp.bfloat16), w2_ref, a2_ref, b2_ref[...])
    # Layer 3: bias row already carries the trim / zero-pad to original_size.
    h = _deconv_layer(h.astype(jnp.bfloat16), w3_ref, a3_ref, brow3_ref[...])
    o_ref[0] = h.astype(o_ref.dtype)          # lane-dense (1, B*original_size)


@functools.partial(jax.jit, static_argnums=2)
def decoder_forward(x_ncl, params, original_size):
    """Mirrors Decoder.forward.  x_ncl: (N, C0, L0) NCW layout, f32."""
    N, c0, l0 = x_ncl.shape
    assert c0 == CHANNELS[0], c0
    c1, c2, c3 = CHANNELS[1], CHANNELS[2], CHANNELS[3]
    l1 = _out_len(l0)
    l2 = _out_len(l1)
    l3 = _out_len(l2)

    B = _choose_batch_block(N, l0)
    G = pl.cdiv(N, B)
    n_pad = G * B

    # bf16 activations, channels on sublanes / (batch*time) on lanes.
    x = x_ncl.astype(jnp.bfloat16)
    if n_pad > N:
        x = jnp.pad(x, ((0, n_pad - N), (0, 0), (0, 0)))
    x_flat = jnp.transpose(x, (1, 0, 2)).reshape(c0, n_pad * l0)

    # Tap-fused weight stacks: wst[k*C_out + co, ci] = torch_w[ci, co, k].
    wst = [jnp.transpose(w, (2, 1, 0)).reshape(KERNEL_SIZE * w.shape[1], w.shape[0])
           .astype(jnp.bfloat16) for (w, _) in params]
    w1s, w2s, w3s = wst
    b1 = params[0][1].reshape(c1, 1).astype(jnp.float32)
    b2 = params[1][1].reshape(c2, 1).astype(jnp.float32)
    # Layer-3 bias baked into a per-lane row (zero on the pad tail).
    mask3 = np.tile((np.arange(original_size) < min(l3, original_size))
                    .astype(np.float32), B)
    brow3 = (params[2][1].reshape(1, 1).astype(jnp.float32)
             * jnp.asarray(mask3)[None, :])

    # Precomputed 0/1 scatter constants (bf16, exact).
    a1 = _make_scatter(B, l0, l1, l1)
    a2 = _make_scatter(B, l1, l2, l2)
    a3 = _make_scatter(B, l2, l3, original_size)

    def _layer_cost(ci, co, li, lo):
        chan = 2 * KERNEL_SIZE * co * ci * (n_pad * li)
        scat = 2 * KERNEL_SIZE * co * (B * li) * (B * lo) * G
        return chan + scat

    flops = (_layer_cost(c0, c1, l0, l1) + _layer_cost(c1, c2, l1, l2)
             + _layer_cost(c2, c3, l2, original_size))
    bytes_accessed = (x_flat.size * 2 + sum(w.size * 2 for w in wst)
                      + b1.size * 4 + b2.size * 4 + brow3.size * 4
                      + (a1.size + a2.size + a3.size) * 2
                      + n_pad * original_size * 4)

    out = pl.pallas_call(
        _decoder_kernel,
        out_shape=jax.ShapeDtypeStruct((G, 1, B * original_size), jnp.float32),
        grid=(G,),
        in_specs=[
            pl.BlockSpec((c0, B * l0), lambda g: (0, g)),
            pl.BlockSpec(w1s.shape, lambda g: (0, 0)),
            pl.BlockSpec(b1.shape, lambda g: (0, 0)),
            pl.BlockSpec(a1.shape, lambda g: (0, 0, 0)),
            pl.BlockSpec(w2s.shape, lambda g: (0, 0)),
            pl.BlockSpec(b2.shape, lambda g: (0, 0)),
            pl.BlockSpec(a2.shape, lambda g: (0, 0, 0)),
            pl.BlockSpec(w3s.shape, lambda g: (0, 0)),
            pl.BlockSpec(brow3.shape, lambda g: (0, 0)),
            pl.BlockSpec(a3.shape, lambda g: (0, 0, 0)),
        ],
        out_specs=pl.BlockSpec((1, 1, B * original_size), lambda g: (g, 0, 0)),
        compiler_params=pltpu.CompilerParams(
            dimension_semantics=("parallel",)),   # v7x: grid steps across TCs
        cost_estimate=pl.CostEstimate(flops=flops, transcendentals=0,
                                      bytes_accessed=bytes_accessed),
    )(x_flat, w1s, b1, a1, w2s, b2, a2, w3s, brow3, a3)

    # Un-interleave the B lane-packed elements and drop batch padding.
    return out.reshape(n_pad, 1, original_size)[:N]


def init_params(key):
    """Deterministic init of the 3 ConvTranspose1d layers.
    PyTorch weight shape: (C_in, C_out, K); bias: (C_out,)."""
    params = []
    for i in range(STAGE):
        c_in, c_out = CHANNELS[i], CHANNELS[i + 1]
        key, kw, kb = jax.random.split(key, 3)
        bound = 1.0 / jnp.sqrt(c_in * KERNEL_SIZE)
        w = jax.random.uniform(kw, (c_in, c_out, KERNEL_SIZE),
                               jnp.float32, -bound, bound)
        b = jax.random.uniform(kb, (c_out,), jnp.float32, -bound, bound)
        params.append((w, b))
    return params


def _reference_forward(x_ncl, params, original_size):
    """Pure-JAX f32 reference (lax.conv_general_dilated) for verification."""
    x = x_ncl
    for (w, b) in params:
        K = w.shape[2]
        rhs = jnp.transpose(w[:, :, ::-1], (1, 0, 2))  # (C_out, C_in, K)
        x = lax.conv_general_dilated(
            x, rhs,
            window_strides=(1,),
            padding=[(K - 1 - PADDING, K - 1 - PADDING)],
            lhs_dilation=(STRIDE,),
            dimension_numbers=("NCH", "OIH", "NCH"),
        ) + b[None, :, None]
    L = x.shape[2]
    if L > original_size:
        x = x[:, :, :original_size]
    elif L < original_size:
        x = jnp.pad(x, ((0, 0), (0, 0), (0, original_size - L)))
    return x


if __name__ == "__main__":
    key = jax.random.PRNGKey(0)
    key, kx = jax.random.split(key)

    N, C0, L_in = 8, CHANNELS[0], 8          # small sequence length
    original_size = 64                       # 8 -> 15 -> 29 -> 57, pad to 64
    x = jax.random.normal(kx, (N, C0, L_in), jnp.float32)
    params = init_params(key)

    out = jax.block_until_ready(decoder_forward(x, params, original_size))
    ref = jax.block_until_ready(_reference_forward(x, params, original_size))

    assert out.shape == (N, CHANNELS[-1], original_size), out.shape
    # MXU inputs are bf16 (f32 accumulation), so compare against the f32
    # reference with a correspondingly loose tolerance.
    assert jnp.allclose(out, ref, atol=2e-2, rtol=2e-2), \
        float(jnp.max(jnp.abs(out - ref)))

    print("KERNEL_OK")
</pallas_src>

<mosaic_0001>
module attributes {stable_mosaic.version = 11 : i64} {
  func.func @_decoder_kernel(%arg0: i32, %arg1: memref<256x64xbf16, #tpu.memory_space<vmem>>, %arg2: memref<640x256xbf16, #tpu.memory_space<vmem>>, %arg3: memref<128x1xf32, #tpu.memory_space<vmem>>, %arg4: memref<5x64x120xbf16, #tpu.memory_space<vmem>>, %arg5: memref<320x128xbf16, #tpu.memory_space<vmem>>, %arg6: memref<64x1xf32, #tpu.memory_space<vmem>>, %arg7: memref<5x120x232xbf16, #tpu.memory_space<vmem>>, %arg8: memref<5x64xbf16, #tpu.memory_space<vmem>>, %arg9: memref<1x512xf32, #tpu.memory_space<vmem>>, %arg10: memref<5x232x512xbf16, #tpu.memory_space<vmem>>, %arg11: memref<1x1x512xf32, #tpu.memory_space<vmem>>) attributes {dimension_semantics = [#tpu.dimension_semantics<parallel>], iteration_bounds = array<i64: 1>, scalar_prefetch = 0 : i64, scratch_operands = 0 : i64, tpu.core_type = #tpu.core_type<tc>, window_params = [{transform_indices = @transform_0, window_bounds = array<i64: 256, 64>}, {pipeline_mode = #tpu.pipeline_mode<synchronous>, transform_indices = @transform_1, window_bounds = array<i64: 640, 256>}, {pipeline_mode = #tpu.pipeline_mode<synchronous>, transform_indices = @transform_2, window_bounds = array<i64: 128, 1>}, {pipeline_mode = #tpu.pipeline_mode<synchronous>, transform_indices = @transform_3, window_bounds = array<i64: 5, 64, 120>}, {pipeline_mode = #tpu.pipeline_mode<synchronous>, transform_indices = @transform_4, window_bounds = array<i64: 320, 128>}, {pipeline_mode = #tpu.pipeline_mode<synchronous>, transform_indices = @transform_5, window_bounds = array<i64: 64, 1>}, {pipeline_mode = #tpu.pipeline_mode<synchronous>, transform_indices = @transform_6, window_bounds = array<i64: 5, 120, 232>}, {pipeline_mode = #tpu.pipeline_mode<synchronous>, transform_indices = @transform_7, window_bounds = array<i64: 5, 64>}, {pipeline_mode = #tpu.pipeline_mode<synchronous>, transform_indices = @transform_8, window_bounds = array<i64: 1, 512>}, {pipeline_mode = #tpu.pipeline_mode<synchronous>, transform_indices = @transform_9, window_bounds = array<i64: 5, 232, 512>}, {transform_indices = @transform_10, window_bounds = array<i64: 1, 1, 512>}]} {
    %c0 = arith.constant 0 : index
    %c0_0 = arith.constant 0 : index
    %0 = vector.load %arg1[%c0, %c0_0] : memref<256x64xbf16, #tpu.memory_space<vmem>>, vector<256x64xbf16>
    %c0_1 = arith.constant 0 : index
    %c0_2 = arith.constant 0 : index
    %1 = vector.load %arg3[%c0_1, %c0_2] : memref<128x1xf32, #tpu.memory_space<vmem>>, vector<128x1xf32>
    %c0_3 = arith.constant 0 : index
    %c0_4 = arith.constant 0 : index
    %2 = vector.load %arg2[%c0_3, %c0_4] : memref<640x256xbf16, #tpu.memory_space<vmem>>, vector<640x256xbf16>
    %cst = arith.constant dense<0.000000e+00> : vector<640x64xf32>
    %3 = tpu.matmul %2, %0, %cst {dimension_numbers = #tpu.dot_dimension_numbers<[1], [0], [0], [1], [0, 0, 1, 1], [], []>} : vector<640x256xbf16>, vector<256x64xbf16>, vector<640x64xf32> -> vector<640x64xf32>
    %4 = arith.truncf %3 : vector<640x64xf32> to vector<640x64xbf16>
    %cst_5 = arith.constant 0.000000e+00 : f32
    %5 = vector.broadcast %cst_5 : f32 to vector<128x120xf32>
    %6 = vector.extract_strided_slice %4 {offsets = [0, 0], sizes = [128, 64], strides = [1, 1]} : vector<640x64xbf16> to vector<128x64xbf16>
    %c0_6 = arith.constant 0 : index
    %c0_7 = arith.constant 0 : index
    %c0_8 = arith.constant 0 : index
    %7 = vector.load %arg4[%c0_6, %c0_7, %c0_8] : memref<5x64x120xbf16, #tpu.memory_space<vmem>>, vector<1x64x120xbf16>
    %8 = vector.shape_cast %7 : vector<1x64x120xbf16> to vector<64x120xbf16>
    %cst_9 = arith.constant dense<0.000000e+00> : vector<128x120xf32>
    %9 = tpu.matmul %6, %8, %cst_9 {dimension_numbers = #tpu.dot_dimension_numbers<[1], [0], [0], [1], [0, 0, 1, 1], [], []>} : vector<128x64xbf16>, vector<64x120xbf16>, vector<128x120xf32> -> vector<128x120xf32>
    %10 = arith.addf %5, %9 : vector<128x120xf32>
    %11 = vector.extract_strided_slice %4 {offsets = [128, 0], sizes = [128, 64], strides = [1, 1]} : vector<640x64xbf16> to vector<128x64xbf16>
    %c1 = arith.constant 1 : index
    %c0_10 = arith.constant 0 : index
    %c0_11 = arith.constant 0 : index
    %12 = vector.load %arg4[%c1, %c0_10, %c0_11] : memref<5x64x120xbf16, #tpu.memory_space<vmem>>, vector<1x64x120xbf16>
    %13 = vector.shape_cast %12 : vector<1x64x120xbf16> to vector<64x120xbf16>
    %cst_12 = arith.constant dense<0.000000e+00> : vector<128x120xf32>
    %14 = tpu.matmul %11, %13, %cst_12 {dimension_numbers = #tpu.dot_dimension_numbers<[1], [0], [0], [1], [0, 0, 1, 1], [], []>} : vector<128x64xbf16>, vector<64x120xbf16>, vector<128x120xf32> -> vector<128x120xf32>
    %15 = arith.addf %10, %14 : vector<128x120xf32>
    %16 = vector.extract_strided_slice %4 {offsets = [256, 0], sizes = [128, 64], strides = [1, 1]} : vector<640x64xbf16> to vector<128x64xbf16>
    %c2 = arith.constant 2 : index
    %c0_13 = arith.constant 0 : index
    %c0_14 = arith.constant 0 : index
    %17 = vector.load %arg4[%c2, %c0_13, %c0_14] : memref<5x64x120xbf16, #tpu.memory_space<vmem>>, vector<1x64x120xbf16>
    %18 = vector.shape_cast %17 : vector<1x64x120xbf16> to vector<64x120xbf16>
    %cst_15 = arith.constant dense<0.000000e+00> : vector<128x120xf32>
    %19 = tpu.matmul %16, %18, %cst_15 {dimension_numbers = #tpu.dot_dimension_numbers<[1], [0], [0], [1], [0, 0, 1, 1], [], []>} : vector<128x64xbf16>, vector<64x120xbf16>, vector<128x120xf32> -> vector<128x120xf32>
    %20 = arith.addf %15, %19 : vector<128x120xf32>
    %21 = vector.extract_strided_slice %4 {offsets = [384, 0], sizes = [128, 64], strides = [1, 1]} : vector<640x64xbf16> to vector<128x64xbf16>
    %c3 = arith.constant 3 : index
    %c0_16 = arith.constant 0 : index
    %c0_17 = arith.constant 0 : index
    %22 = vector.load %arg4[%c3, %c0_16, %c0_17] : memref<5x64x120xbf16, #tpu.memory_space<vmem>>, vector<1x64x120xbf16>
    %23 = vector.shape_cast %22 : vector<1x64x120xbf16> to vector<64x120xbf16>
    %cst_18 = arith.constant dense<0.000000e+00> : vector<128x120xf32>
    %24 = tpu.matmul %21, %23, %cst_18 {dimension_numbers = #tpu.dot_dimension_numbers<[1], [0], [0], [1], [0, 0, 1, 1], [], []>} : vector<128x64xbf16>, vector<64x120xbf16>, vector<128x120xf32> -> vector<128x120xf32>
    %25 = arith.addf %20, %24 : vector<128x120xf32>
    %26 = vector.extract_strided_slice %4 {offsets = [512, 0], sizes = [128, 64], strides = [1, 1]} : vector<640x64xbf16> to vector<128x64xbf16>
    %c4 = arith.constant 4 : index
    %c0_19 = arith.constant 0 : index
    %c0_20 = arith.constant 0 : index
    %27 = vector.load %arg4[%c4, %c0_19, %c0_20] : memref<5x64x120xbf16, #tpu.memory_space<vmem>>, vector<1x64x120xbf16>
    %28 = vector.shape_cast %27 : vector<1x64x120xbf16> to vector<64x120xbf16>
    %cst_21 = arith.constant dense<0.000000e+00> : vector<128x120xf32>
    %29 = tpu.matmul %26, %28, %cst_21 {dimension_numbers = #tpu.dot_dimension_numbers<[1], [0], [0], [1], [0, 0, 1, 1], [], []>} : vector<128x64xbf16>, vector<64x120xbf16>, vector<128x120xf32> -> vector<128x120xf32>
    %30 = arith.addf %25, %29 : vector<128x120xf32>
    %31 = vector.broadcast %1 : vector<128x1xf32> to vector<128x120xf32>
    %32 = arith.addf %30, %31 : vector<128x120xf32>
    %33 = arith.truncf %32 : vector<128x120xf32> to vector<128x120xbf16>
    %c0_22 = arith.constant 0 : index
    %c0_23 = arith.constant 0 : index
    %34 = vector.load %arg6[%c0_22, %c0_23] : memref<64x1xf32, #tpu.memory_space<vmem>>, vector<64x1xf32>
    %c0_24 = arith.constant 0 : index
    %c0_25 = arith.constant 0 : index
    %35 = vector.load %arg5[%c0_24, %c0_25] : memref<320x128xbf16, #tpu.memory_space<vmem>>, vector<320x128xbf16>
    %cst_26 = arith.constant dense<0.000000e+00> : vector<320x120xf32>
    %36 = tpu.matmul %35, %33, %cst_26 {dimension_numbers = #tpu.dot_dimension_numbers<[1], [0], [0], [1], [0, 0, 1, 1], [], []>} : vector<320x128xbf16>, vector<128x120xbf16>, vector<320x120xf32> -> vector<320x120xf32>
    %37 = arith.truncf %36 : vector<320x120xf32> to vector<320x120xbf16>
    %cst_27 = arith.constant 0.000000e+00 : f32
    %38 = vector.broadcast %cst_27 : f32 to vector<64x232xf32>
    %39 = vector.extract_strided_slice %37 {offsets = [0, 0], sizes = [64, 120], strides = [1, 1]} : vector<320x120xbf16> to vector<64x120xbf16>
    %c0_28 = arith.constant 0 : index
    %c0_29 = arith.constant 0 : index
    %c0_30 = arith.constant 0 : index
    %40 = vector.load %arg7[%c0_28, %c0_29, %c0_30] : memref<5x120x232xbf16, #tpu.memory_space<vmem>>, vector<1x120x232xbf16>
    %41 = vector.shape_cast %40 : vector<1x120x232xbf16> to vector<120x232xbf16>
    %cst_31 = arith.constant dense<0.000000e+00> : vector<64x232xf32>
    %42 = tpu.matmul %39, %41, %cst_31 {dimension_numbers = #tpu.dot_dimension_numbers<[1], [0], [0], [1], [0, 0, 1, 1], [], []>} : vector<64x120xbf16>, vector<120x232xbf16>, vector<64x232xf32> -> vector<64x232xf32>
    %43 = arith.addf %38, %42 : vector<64x232xf32>
    %44 = vector.extract_strided_slice %37 {offsets = [64, 0], sizes = [64, 120], strides = [1, 1]} : vector<320x120xbf16> to vector<64x120xbf16>
    %c1_32 = arith.constant 1 : index
    %c0_33 = arith.constant 0 : index
    %c0_34 = arith.constant 0 : index
    %45 = vector.load %arg7[%c1_32, %c0_33, %c0_34] : memref<5x120x232xbf16, #tpu.memory_space<vmem>>, vector<1x120x232xbf16>
    %46 = vector.shape_cast %45 : vector<1x120x232xbf16> to vector<120x232xbf16>
    %cst_35 = arith.constant dense<0.000000e+00> : vector<64x232xf32>
    %47 = tpu.matmul %44, %46, %cst_35 {dimension_numbers = #tpu.dot_dimension_numbers<[1], [0], [0], [1], [0, 0, 1, 1], [], []>} : vector<64x120xbf16>, vector<120x232xbf16>, vector<64x232xf32> -> vector<64x232xf32>
    %48 = arith.addf %43, %47 : vector<64x232xf32>
    %49 = vector.extract_strided_slice %37 {offsets = [128, 0], sizes = [64, 120], strides = [1, 1]} : vector<320x120xbf16> to vector<64x120xbf16>
    %c2_36 = arith.constant 2 : index
    %c0_37 = arith.constant 0 : index
    %c0_38 = arith.constant 0 : index
    %50 = vector.load %arg7[%c2_36, %c0_37, %c0_38] : memref<5x120x232xbf16, #tpu.memory_space<vmem>>, vector<1x120x232xbf16>
    %51 = vector.shape_cast %50 : vector<1x120x232xbf16> to vector<120x232xbf16>
    %cst_39 = arith.constant dense<0.000000e+00> : vector<64x232xf32>
    %52 = tpu.matmul %49, %51, %cst_39 {dimension_numbers = #tpu.dot_dimension_numbers<[1], [0], [0], [1], [0, 0, 1, 1], [], []>} : vector<64x120xbf16>, vector<120x232xbf16>, vector<64x232xf32> -> vector<64x232xf32>
    %53 = arith.addf %48, %52 : vector<64x232xf32>
    %54 = vector.extract_strided_slice %37 {offsets = [192, 0], sizes = [64, 120], strides = [1, 1]} : vector<320x120xbf16> to vector<64x120xbf16>
    %c3_40 = arith.constant 3 : index
    %c0_41 = arith.constant 0 : index
    %c0_42 = arith.constant 0 : index
    %55 = vector.load %arg7[%c3_40, %c0_41, %c0_42] : memref<5x120x232xbf16, #tpu.memory_space<vmem>>, vector<1x120x232xbf16>
    %56 = vector.shape_cast %55 : vector<1x120x232xbf16> to vector<120x232xbf16>
    %cst_43 = arith.constant dense<0.000000e+00> : vector<64x232xf32>
    %57 = tpu.matmul %54, %56, %cst_43 {dimension_numbers = #tpu.dot_dimension_numbers<[1], [0], [0], [1], [0, 0, 1, 1], [], []>} : vector<64x120xbf16>, vector<120x232xbf16>, vector<64x232xf32> -> vector<64x232xf32>
    %58 = arith.addf %53, %57 : vector<64x232xf32>
    %59 = vector.extract_strided_slice %37 {offsets = [256, 0], sizes = [64, 120], strides = [1, 1]} : vector<320x120xbf16> to vector<64x120xbf16>
    %c4_44 = arith.constant 4 : index
    %c0_45 = arith.constant 0 : index
    %c0_46 = arith.constant 0 : index
    %60 = vector.load %arg7[%c4_44, %c0_45, %c0_46] : memref<5x120x232xbf16, #tpu.memory_space<vmem>>, vector<1x120x232xbf16>
    %61 = vector.shape_cast %60 : vector<1x120x232xbf16> to vector<120x232xbf16>
    %cst_47 = arith.constant dense<0.000000e+00> : vector<64x232xf32>
    %62 = tpu.matmul %59, %61, %cst_47 {dimension_numbers = #tpu.dot_dimension_numbers<[1], [0], [0], [1], [0, 0, 1, 1], [], []>} : vector<64x120xbf16>, vector<120x232xbf16>, vector<64x232xf32> -> vector<64x232xf32>
    %63 = arith.addf %58, %62 : vector<64x232xf32>
    %64 = vector.broadcast %34 : vector<64x1xf32> to vector<64x232xf32>
    %65 = arith.addf %63, %64 : vector<64x232xf32>
    %66 = arith.truncf %65 : vector<64x232xf32> to vector<64x232xbf16>
    %c0_48 = arith.constant 0 : index
    %c0_49 = arith.constant 0 : index
    %67 = vector.load %arg9[%c0_48, %c0_49] : memref<1x512xf32, #tpu.memory_space<vmem>>, vector<1x512xf32>
    %c0_50 = arith.constant 0 : index
    %c0_51 = arith.constant 0 : index
    %68 = vector.load %arg8[%c0_50, %c0_51] : memref<5x64xbf16, #tpu.memory_space<vmem>>, vector<5x64xbf16>
    %cst_52 = arith.constant dense<0.000000e+00> : vector<5x232xf32>
    %69 = tpu.matmul %68, %66, %cst_52 {dimension_numbers = #tpu.dot_dimension_numbers<[1], [0], [0], [1], [0, 0, 1, 1], [], []>} : vector<5x64xbf16>, vector<64x232xbf16>, vector<5x232xf32> -> vector<5x232xf32>
    %70 = arith.truncf %69 : vector<5x232xf32> to vector<5x232xbf16>
    %cst_53 = arith.constant 0.000000e+00 : f32
    %71 = vector.broadcast %cst_53 : f32 to vector<1x512xf32>
    %72 = vector.extract_strided_slice %70 {offsets = [0, 0], sizes = [1, 232], strides = [1, 1]} : vector<5x232xbf16> to vector<1x232xbf16>
    %c0_54 = arith.constant 0 : index
    %c0_55 = arith.constant 0 : index
    %c0_56 = arith.constant 0 : index
    %73 = vector.load %arg10[%c0_54, %c0_55, %c0_56] : memref<5x232x512xbf16, #tpu.memory_space<vmem>>, vector<1x232x512xbf16>
    %74 = vector.shape_cast %73 : vector<1x232x512xbf16> to vector<232x512xbf16>
    %cst_57 = arith.constant dense<0.000000e+00> : vector<1x512xf32>
    %75 = tpu.matmul %72, %74, %cst_57 {dimension_numbers = #tpu.dot_dimension_numbers<[1], [0], [0], [1], [0, 0, 1, 1], [], []>} : vector<1x232xbf16>, vector<232x512xbf16>, vector<1x512xf32> -> vector<1x512xf32>
    %76 = arith.addf %71, %75 : vector<1x512xf32>
    %77 = vector.extract_strided_slice %70 {offsets = [1, 0], sizes = [1, 232], strides = [1, 1]} : vector<5x232xbf16> to vector<1x232xbf16>
    %c1_58 = arith.constant 1 : index
    %c0_59 = arith.constant 0 : index
    %c0_60 = arith.constant 0 : index
    %78 = vector.load %arg10[%c1_58, %c0_59, %c0_60] : memref<5x232x512xbf16, #tpu.memory_space<vmem>>, vector<1x232x512xbf16>
    %79 = vector.shape_cast %78 : vector<1x232x512xbf16> to vector<232x512xbf16>
    %cst_61 = arith.constant dense<0.000000e+00> : vector<1x512xf32>
    %80 = tpu.matmul %77, %79, %cst_61 {dimension_numbers = #tpu.dot_dimension_numbers<[1], [0], [0], [1], [0, 0, 1, 1], [], []>} : vector<1x232xbf16>, vector<232x512xbf16>, vector<1x512xf32> -> vector<1x512xf32>
    %81 = arith.addf %76, %80 : vector<1x512xf32>
    %82 = vector.extract_strided_slice %70 {offsets = [2, 0], sizes = [1, 232], strides = [1, 1]} : vector<5x232xbf16> to vector<1x232xbf16>
    %c2_62 = arith.constant 2 : index
    %c0_63 = arith.constant 0 : index
    %c0_64 = arith.constant 0 : index
    %83 = vector.load %arg10[%c2_62, %c0_63, %c0_64] : memref<5x232x512xbf16, #tpu.memory_space<vmem>>, vector<1x232x512xbf16>
    %84 = vector.shape_cast %83 : vector<1x232x512xbf16> to vector<232x512xbf16>
    %cst_65 = arith.constant dense<0.000000e+00> : vector<1x512xf32>
    %85 = tpu.matmul %82, %84, %cst_65 {dimension_numbers = #tpu.dot_dimension_numbers<[1], [0], [0], [1], [0, 0, 1, 1], [], []>} : vector<1x232xbf16>, vector<232x512xbf16>, vector<1x512xf32> -> vector<1x512xf32>
    %86 = arith.addf %81, %85 : vector<1x512xf32>
    %87 = vector.extract_strided_slice %70 {offsets = [3, 0], sizes = [1, 232], strides = [1, 1]} : vector<5x232xbf16> to vector<1x232xbf16>
    %c3_66 = arith.constant 3 : index
    %c0_67 = arith.constant 0 : index
    %c0_68 = arith.constant 0 : index
    %88 = vector.load %arg10[%c3_66, %c0_67, %c0_68] : memref<5x232x512xbf16, #tpu.memory_space<vmem>>, vector<1x232x512xbf16>
    %89 = vector.shape_cast %88 : vector<1x232x512xbf16> to vector<232x512xbf16>
    %cst_69 = arith.constant dense<0.000000e+00> : vector<1x512xf32>
    %90 = tpu.matmul %87, %89, %cst_69 {dimension_numbers = #tpu.dot_dimension_numbers<[1], [0], [0], [1], [0, 0, 1, 1], [], []>} : vector<1x232xbf16>, vector<232x512xbf16>, vector<1x512xf32> -> vector<1x512xf32>
    %91 = arith.addf %86, %90 : vector<1x512xf32>
    %92 = vector.extract_strided_slice %70 {offsets = [4, 0], sizes = [1, 232], strides = [1, 1]} : vector<5x232xbf16> to vector<1x232xbf16>
    %c4_70 = arith.constant 4 : index
    %c0_71 = arith.constant 0 : index
    %c0_72 = arith.constant 0 : index
    %93 = vector.load %arg10[%c4_70, %c0_71, %c0_72] : memref<5x232x512xbf16, #tpu.memory_space<vmem>>, vector<1x232x512xbf16>
    %94 = vector.shape_cast %93 : vector<1x232x512xbf16> to vector<232x512xbf16>
    %cst_73 = arith.constant dense<0.000000e+00> : vector<1x512xf32>
    %95 = tpu.matmul %92, %94, %cst_73 {dimension_numbers = #tpu.dot_dimension_numbers<[1], [0], [0], [1], [0, 0, 1, 1], [], []>} : vector<1x232xbf16>, vector<232x512xbf16>, vector<1x512xf32> -> vector<1x512xf32>
    %96 = arith.addf %91, %95 : vector<1x512xf32>
    %97 = arith.addf %96, %67 : vector<1x512xf32>
    %c0_74 = arith.constant 0 : index
    %c0_75 = arith.constant 0 : index
    %c0_76 = arith.constant 0 : index
    %98 = vector.load %arg11[%c0_74, %c0_75, %c0_76] : memref<1x1x512xf32, #tpu.memory_space<vmem>>, vector<1x1x512xf32>
    %99 = vector.shape_cast %98 : vector<1x1x512xf32> to vector<1x512xf32>
    %100 = vector.shape_cast %97 : vector<1x512xf32> to vector<1x1x512xf32>
    tpu.vector_store %arg11[%c0_74, %c0_75, %c0_76], %100 {strides = array<i32>} : memref<1x1x512xf32, #tpu.memory_space<vmem>>, vector<1x1x512xf32>,
    return
  }
  func.func @transform_0(%arg0: i32) -> (i32, i32) {
    %c0_i32 = arith.constant 0 : i32
    %c0_i32_0 = arith.constant 0 : i32
    return %c0_i32, %arg0 : i32, i32
  }
  func.func @transform_1(%arg0: i32) -> (i32, i32) {
    %c0_i32 = arith.constant 0 : i32
    %c0_i32_0 = arith.constant 0 : i32
    %c0_i32_1 = arith.constant 0 : i32
    return %c0_i32, %c0_i32_0 : i32, i32
  }
  func.func @transform_2(%arg0: i32) -> (i32, i32) {
    %c0_i32 = arith.constant 0 : i32
    %c0_i32_0 = arith.constant 0 : i32
    %c0_i32_1 = arith.constant 0 : i32
    return %c0_i32, %c0_i32_0 : i32, i32
  }
  func.func @transform_3(%arg0: i32) -> (i32, i32, i32) {
    %c0_i32 = arith.constant 0 : i32
    %c0_i32_0 = arith.constant 0 : i32
    %c0_i32_1 = arith.constant 0 : i32
    %c0_i32_2 = arith.constant 0 : i32
    return %c0_i32, %c0_i32_0, %c0_i32_1 : i32, i32, i32
  }
  func.func @transform_4(%arg0: i32) -> (i32, i32) {
    %c0_i32 = arith.constant 0 : i32
    %c0_i32_0 = arith.constant 0 : i32
    %c0_i32_1 = arith.constant 0 : i32
    return %c0_i32, %c0_i32_0 : i32, i32
  }
  func.func @transform_5(%arg0: i32) -> (i32, i32) {
    %c0_i32 = arith.constant 0 : i32
    %c0_i32_0 = arith.constant 0 : i32
    %c0_i32_1 = arith.constant 0 : i32
    return %c0_i32, %c0_i32_0 : i32, i32
  }
  func.func @transform_6(%arg0: i32) -> (i32, i32, i32) {
    %c0_i32 = arith.constant 0 : i32
    %c0_i32_0 = arith.constant 0 : i32
    %c0_i32_1 = arith.constant 0 : i32
    %c0_i32_2 = arith.constant 0 : i32
    return %c0_i32, %c0_i32_0, %c0_i32_1 : i32, i32, i32
  }
  func.func @transform_7(%arg0: i32) -> (i32, i32) {
    %c0_i32 = arith.constant 0 : i32
    %c0_i32_0 = arith.constant 0 : i32
    %c0_i32_1 = arith.constant 0 : i32
    return %c0_i32, %c0_i32_0 : i32, i32
  }
  func.func @transform_8(%arg0: i32) -> (i32, i32) {
    %c0_i32 = arith.constant 0 : i32
    %c0_i32_0 = arith.constant 0 : i32
    %c0_i32_1 = arith.constant 0 : i32
    return %c0_i32, %c0_i32_0 : i32, i32
  }
  func.func @transform_9(%arg0: i32) -> (i32, i32, i32) {
    %c0_i32 = arith.constant 0 : i32
    %c0_i32_0 = arith.constant 0 : i32
    %c0_i32_1 = arith.constant 0 : i32
    %c0_i32_2 = arith.constant 0 : i32
    return %c0_i32, %c0_i32_0, %c0_i32_1 : i32, i32, i32
  }
  func.func @transform_10(%arg0: i32) -> (i32, i32, i32) {
    %c0_i32 = arith.constant 0 : i32
    %c0_i32_0 = arith.constant 0 : i32
    %c0_i32_1 = arith.constant 0 : i32
    return %arg0, %c0_i32, %c0_i32_0 : i32, i32, i32
  }
}

</mosaic_0001>

<bundles_post_ra>
// kernel: decoder_forward.1
= control target key start
LH: loop header
LB: loop body
LE: loop exit
PB: predicated region body
PF: predicated region fallthrough
CT: control target
= control target key end

     0   :  { %v7802_v0 = vmov 0   ;;  %vm1094_vm0 = vcmask 523264   ;;  %vm2475_vm1 = vcmask 1043456   ;;  %vm2462_vm2 = vcmask 982016   ;;  %s9839_s0 = inlined_call_operand.vmem [shape: bf16[256,64], index: 0, kind: input, shape index: {}]   ;;  %s9840_s1 = inlined_call_operand.vmem [shape: bf16[640,256], index: 1, kind: input, shape index: {}]   ;;  %s9841_s3 = inlined_call_operand.vmem [shape: bf16[5,64,120], index: 3, kind: input, shape index: {}]   ;;  %s9842_s2 = inlined_call_operand.vmem [shape: f32[128,1], index: 2, kind: input, shape index: {}]   ;;  %s9843_s5 = inlined_call_operand.vmem [shape: f32[64,1], index: 5, kind: input, shape index: {}]   ;;  %s9844_s4 = inlined_call_operand.vmem [shape: bf16[320,128], index: 4, kind: input, shape index: {}]   ;;  %s9845_s6 = inlined_call_operand.vmem [shape: bf16[5,120,232], index: 6, kind: input, shape index: {}]   ;;  %s9846_s9 = inlined_call_operand.vmem [shape: bf16[5,232,512], index: 9, kind: input, shape index: {}]   ;;  %s9847_s7 = inlined_call_operand.vmem [shape: bf16[5,64], index: 7, kind: input, shape index: {}]   ;;  %s9848_s8 = inlined_call_operand.vmem [shape: f32[1,512], index: 8, kind: input, shape index: {}]   ;;  %s9849_s10 = inlined_call_operand.vmem [shape: f32[1,1,512], index: 10, kind: output, shape index: {}]  }
   0x1   :  { %660 = vmatprep.subr.bf16.mxu0 %v7802_v0  ;;  %v7071_v1 = vld [vmem:[%s9839_s0] sm:$0xff]   ;;  %7069 = vset.pattern.permute.xlu0 %v7802_v0  ;;  %v7072_v2 = vld [vmem:[%s9839_s0 + $0x8] sm:$0xff]   ;;  %v7073_v3 = vld [vmem:[%s9839_s0 + $0x10] sm:$0xff]   ;;  %vm3841_vm3 = vcmask 850944  }
   0x2   :  { %7070 = vset.pattern.permute.xlu1 %v7802_v0  ;;  %661 = vmatpush1.bf16.msra.mxu0 %v7071_v1  ;;  %v7074_v4 = vld [vmem:[%s9839_s0 + $0x18] sm:$0xff]   ;;  %v7075_v5 = vld [vmem:[%s9839_s0 + $0x20] sm:$0xff]   ;;  %v7076_v7 = vld [vmem:[%s9839_s0 + $0x28] sm:$0xff]  }
   0x3   :  { %662 = vmatprep.subr.bf16.mxu0 %v7802_v0  ;;  %v7089_v6 = vld [vmem:[%s9840_s1 + $0x4] ss:$8 sps:$4 sm:$0xff]   ;;  %v7077_v8 = vld [vmem:[%s9839_s0 + $0x30] sm:$0xff]   ;;  %v7078_v9 = vld [vmem:[%s9839_s0 + $0x38] sm:$0xff]  }
   0x4   :  { %692 = vmatprep.mubr.bf16.mxu0 %v7089_v6  ;;  %v7079_v10 = vld [vmem:[%s9839_s0 + $0x40] sm:$0xff]   ;;  %v7080_v11 = vld [vmem:[%s9839_s0 + $0x48] sm:$0xff]   ;;  %v7081_v12 = vld [vmem:[%s9839_s0 + $0x50] sm:$0xff]  }
   0x5   :  { %v7082_v13 = vld [vmem:[%s9839_s0 + $0x58] sm:$0xff]   ;;  %v7083_v14 = vld [vmem:[%s9839_s0 + $0x60] sm:$0xff]   ;;  %v7084_v15 = vld [vmem:[%s9839_s0 + $0x68] sm:$0xff]  }
   0x6   :  { %663 = vmatpush1.bf16.msra.mxu0 %v7072_v2  ;;  %v7085_v16 = vld [vmem:[%s9839_s0 + $0x70] sm:$0xff]   ;;  %v7086_v17 = vld [vmem:[%s9839_s0 + $0x78] sm:$0xff]   ;;  %v7087_v18 = vld [vmem:[%s9840_s1] ss:$8 sps:$4 sm:$0xff]  }
   0x7   :  { %664 = vmatprep.subr.bf16.mxu0 %v7802_v0  ;;  %v7090_v19 = vld [vmem:[%s9840_s1 + $0x14] ss:$8 sps:$4 sm:$0xff]   ;;  %v7092_v20 = vld [vmem:[%s9840_s1 + $0x10] ss:$8 sps:$4 sm:$0xff]   ;;  %v7093_v21 = vld [vmem:[%s9840_s1 + $0x24] ss:$8 sps:$4 sm:$0xff]  }
   0x8   :  { %v7095_v22 = vld [vmem:[%s9840_s1 + $0x20] ss:$8 sps:$4 sm:$0xff]   ;;  %v7096_v23 = vld [vmem:[%s9840_s1 + $0x34] ss:$8 sps:$4 sm:$0xff]   ;;  %v7098_v24 = vld [vmem:[%s9840_s1 + $0x30] ss:$8 sps:$4 sm:$0xff]  }
   0x9   :  { %v7099_v25 = vld [vmem:[%s9840_s1 + $0x44] ss:$8 sps:$4 sm:$0xff]   ;;  %v7101_v26 = vld [vmem:[%s9840_s1 + $0x40] ss:$8 sps:$4 sm:$0xff]   ;;  %v7102_v27 = vld [vmem:[%s9840_s1 + $0x54] ss:$8 sps:$4 sm:$0xff]  }
   0xa   :  { %665 = vmatpush1.bf16.msra.mxu0 %v7073_v3  ;;  %v7104_v28 = vld [vmem:[%s9840_s1 + $0x50] ss:$8 sps:$4 sm:$0xff]   ;;  %v7105_v29 = vld [vmem:[%s9840_s1 + $0x64] ss:$8 sps:$4 sm:$0xff]   ;;  %v7107_v30 = vld [vmem:[%s9840_s1 + $0x60] ss:$8 sps:$4 sm:$0xff]  }
   0xb   :  { %666 = vmatprep.subr.bf16.mxu0 %v7802_v0  ;;  %v7108_v31 = vld [vmem:[%s9840_s1 + $0x74] ss:$8 sps:$4 sm:$0xff]   ;;  %v7110_v32 = vld [vmem:[%s9840_s1 + $0x70] ss:$8 sps:$4 sm:$0xff]   ;;  %v7111_v33 = vld [vmem:[%s9840_s1 + $0x84] ss:$8 sps:$4 sm:$0xff]  }
   0xc   :  { %v7113_v34 = vld [vmem:[%s9840_s1 + $0x80] ss:$8 sps:$4 sm:$0xff]   ;;  %v7114_v35 = vld [vmem:[%s9840_s1 + $0x94] ss:$8 sps:$4 sm:$0xff]   ;;  %v7116_v36 = vld [vmem:[%s9840_s1 + $0x90] ss:$8 sps:$4 sm:$0xff]  }
   0xd   :  { %v7117_v37 = vld [vmem:[%s9840_s1 + $0xa4] ss:$8 sps:$4 sm:$0xff]   ;;  %v7119_v38 = vld [vmem:[%s9840_s1 + $0xa0] ss:$8 sps:$4 sm:$0xff]   ;;  %v7120_v39 = vld [vmem:[%s9840_s1 + $0xb4] ss:$8 sps:$4 sm:$0xff]  }
   0xe   :  { %667 = vmatpush1.bf16.msra.mxu0 %v7074_v4  ;;  %v7122_v40 = vld [vmem:[%s9840_s1 + $0xb0] ss:$8 sps:$4 sm:$0xff]   ;;  %v7123_v41 = vld [vmem:[%s9840_s1 + $0xc4] ss:$8 sps:$4 sm:$0xff]   ;;  %v7125_v42 = vld [vmem:[%s9840_s1 + $0xc0] ss:$8 sps:$4 sm:$0xff]  }
   0xf   :  { %668 = vmatprep.subr.bf16.mxu0 %v7802_v0  ;;  %v7126_v43 = vld [vmem:[%s9840_s1 + $0xd4] ss:$8 sps:$4 sm:$0xff]   ;;  %v7128_v44 = vld [vmem:[%s9840_s1 + $0xd0] ss:$8 sps:$4 sm:$0xff]   ;;  %v7129_v45 = vld [vmem:[%s9840_s1 + $0xe4] ss:$8 sps:$4 sm:$0xff]  }
  0x10   :  { %v7131_v46 = vld [vmem:[%s9840_s1 + $0xe0] ss:$8 sps:$4 sm:$0xff]   ;;  %v7132_v47 = vld [vmem:[%s9840_s1 + $0xf4] ss:$8 sps:$4 sm:$0xff]   ;;  %v7134_v48 = vld [vmem:[%s9840_s1 + $0xf0] ss:$8 sps:$4 sm:$0xff]  }
  0x11   :  { %v7135_v49 = vld [vmem:[%s9840_s1 + $0x104] ss:$8 sps:$4 sm:$0xff]   ;;  %v7137_v50 = vld [vmem:[%s9840_s1 + $0x100] ss:$8 sps:$4 sm:$0xff]   ;;  %v7138_v51 = vld [vmem:[%s9840_s1 + $0x114] ss:$8 sps:$4 sm:$0xff]  }
  0x12   :  { %669 = vmatpush1.bf16.msra.mxu0 %v7075_v5  ;;  %v7140_v52 = vld [vmem:[%s9840_s1 + $0x110] ss:$8 sps:$4 sm:$0xff]   ;;  %v7141_v53 = vld [vmem:[%s9840_s1 + $0x124] ss:$8 sps:$4 sm:$0xff]   ;;  %v7143_v54 = vld [vmem:[%s9840_s1 + $0x120] ss:$8 sps:$4 sm:$0xff]  }
  0x13   :  { %670 = vmatprep.subr.bf16.mxu0 %v7802_v0  ;;  %v7144_v55 = vld [vmem:[%s9840_s1 + $0x134] ss:$8 sps:$4 sm:$0xff]   ;;  %v7192_v56 = vld [vmem:[%s9841_s3 + $0x20] sm:$0xff]   ;;  %v7146_v57 = vld [vmem:[%s9840_s1 + $0x130] ss:$8 sps:$4 sm:$0xff]  }
  0x14   :  { %6763 = vmatprep.subr.bf16.mxu1 %v7192_v56  ;;  %v7193_v58 = vld [vmem:[%s9841_s3 + $0x28] sm:$0xff]   ;;  %v7197_v60 = vld [vmem:[%s9841_s3 + $0x30] sm:$0xff]   ;;  %v7198_v62 = vld [vmem:[%s9841_s3 + $0x38] sm:$0xff]  }
  0x15   :  { %6764 = vmatpush3.bf16.msra.mxu1 %v7192_v56  ;;  %v7147_v59 = vld [vmem:[%s9840_s1 + $0x144] ss:$8 sps:$4 sm:$0xff]   ;;  %v7149_v61 = vld [vmem:[%s9840_s1 + $0x140] ss:$8 sps:$4 sm:$0xff]   ;;  %v7150_v63 = vld [vmem:[%s9840_s1 + $0x154] ss:$8 sps:$4 sm:$0xff]  }
  0x16   :  { %671 = vmatpush1.bf16.msra.mxu0 %v7076_v7  ;;  %6765 = vmatprep.subr.bf16.mxu1 %v7193_v58  ;;  %v7152_v1 = vld [vmem:[%s9840_s1 + $0x150] ss:$8 sps:$4 sm:$0xff]   ;;  %v7153_v2 = vld [vmem:[%s9840_s1 + $0x164] ss:$8 sps:$4 sm:$0xff]   ;;  %v7155_v3 = vld [vmem:[%s9840_s1 + $0x160] ss:$8 sps:$4 sm:$0xff]  }
  0x17   :  { %672 = vmatprep.subr.bf16.mxu0 %v7802_v0  ;;  %v7156_v4 = vld [vmem:[%s9840_s1 + $0x174] ss:$8 sps:$4 sm:$0xff]   ;;  %v7158_v5 = vld [vmem:[%s9840_s1 + $0x170] ss:$8 sps:$4 sm:$0xff]   ;;  %v7159_v6 = vld [vmem:[%s9840_s1 + $0x184] ss:$8 sps:$4 sm:$0xff]  }
  0x18   :  { %v7161_v7 = vld [vmem:[%s9840_s1 + $0x180] ss:$8 sps:$4 sm:$0xff]  }
  0x19   :  { %6766 = vmatpush3.bf16.msra.mxu1 %v7193_v58  ;;  %v7188_v58 = vld [vmem:[%s9840_s1 + $0x210] ss:$8 sps:$4 sm:$0xff]  }
  0x1a   :  { %673 = vmatpush1.bf16.msra.mxu0 %v7077_v8  ;;  %6767 = vmatprep.subr.bf16.mxu1 %v7197_v60  ;;  %v7162_v8 = vld [vmem:[%s9840_s1 + $0x194] ss:$8 sps:$4 sm:$0xff]  }
  0x1b   :  { %674 = vmatprep.subr.bf16.mxu0 %v7802_v0 }
  0x1d   :  { %6768 = vmatpush3.bf16.msra.mxu1 %v7197_v60  ;;  %v7189_v60 = vld [vmem:[%s9840_s1 + $0x224] ss:$8 sps:$4 sm:$0xff]  }
  0x1e   :  { %675 = vmatpush1.bf16.msra.mxu0 %v7078_v9  ;;  %6769 = vmatprep.subr.bf16.mxu1 %v7198_v62  ;;  %v7164_v9 = vld [vmem:[%s9840_s1 + $0x190] ss:$8 sps:$4 sm:$0xff]  }
  0x1f   :  { %676 = vmatprep.subr.bf16.mxu0 %v7802_v0 }
  0x21   :  { %6770 = vmatpush3.bf16.msra.mxu1 %v7198_v62 }
  0x22   :  { %677 = vmatpush1.bf16.msra.mxu0 %v7079_v10  ;;  %v7165_v10 = vld [vmem:[%s9840_s1 + $0x1a4] ss:$8 sps:$4 sm:$0xff]  }
  0x23   :  { %678 = vmatprep.subr.bf16.mxu0 %v7802_v0 }
  0x26   :  { %679 = vmatpush1.bf16.msra.mxu0 %v7080_v11  ;;  %v8099_v11 = vld [vmem:[%s9841_s3] sm:$0xff]  }
  0x27   :  { %680 = vmatprep.subr.bf16.mxu0 %v7802_v0  ;;  %6787 = vmatprep.subr.bf16.mxu1 %v8099_v11 }
  0x2a   :  { %681 = vmatpush1.bf16.msra.mxu0 %v7081_v12  ;;  %v7167_v12 = vld [vmem:[%s9840_s1 + $0x1a0] ss:$8 sps:$4 sm:$0xff]  }
  0x2b   :  { %682 = vmatprep.subr.bf16.mxu0 %v7802_v0 }
  0x2e   :  { %683 = vmatpush1.bf16.msra.mxu0 %v7082_v13  ;;  %v7168_v13 = vld [vmem:[%s9840_s1 + $0x1b4] ss:$8 sps:$4 sm:$0xff]  }
  0x2f   :  { %684 = vmatprep.subr.bf16.mxu0 %v7802_v0 }
  0x32   :  { %685 = vmatpush1.bf16.msra.mxu0 %v7083_v14 }
  0x33   :  { %686 = vmatprep.subr.bf16.mxu0 %v7802_v0 }
  0x36   :  { %687 = vmatpush1.bf16.msra.mxu0 %v7084_v15 }
  0x37   :  { %688 = vmatprep.subr.bf16.mxu0 %v7802_v0 }
  0x3a   :  { %689 = vmatpush1.bf16.msra.mxu0 %v7085_v16  ;;  %v7170_v16 = vld [vmem:[%s9840_s1 + $0x1b0] ss:$8 sps:$4 sm:$0xff]  }
  0x3b   :  { %690 = vmatprep.subr.bf16.mxu0 %v7802_v0 }
  0x3e   :  { %691 = vmatpush1.bf16.msra.mxu0 %v7086_v17 }
  0x41   :  { %693 = vmatmul.mubr.bf16.vlgmr.msra.gmra.mrb[0].mxu0 %v7087_v18  ;;  %v7171_v18 = vld [vmem:[%s9840_s1 + $0x1c4] ss:$8 sps:$4 sm:$0xff]  }
  0x42   :  { %700 = vmatprep.mubr.bf16.mxu0 %v7090_v19 }
  0x49   :  { %701 = vmatmul.mubr.bf16.gmra.mrb[4].mxu0 %v7092_v20 }
  0x4a   :  { %708 = vmatprep.mubr.bf16.mxu0 %v7093_v21 }
  0x51   :  { %709 = vmatmul.mubr.bf16.gmra.mrb[8].mxu0 %v7095_v22 }
  0x52   :  { %716 = vmatprep.mubr.bf16.mxu0 %v7096_v23  ;;  %v7173_v23 = vld [vmem:[%s9840_s1 + $0x1c0] ss:$8 sps:$4 sm:$0xff]  }
  0x59   :  { %717 = vmatmul.mubr.bf16.gmra.mrb[12].mxu0 %v7098_v24 }
  0x5a   :  { %724 = vmatprep.mubr.bf16.mxu0 %v7099_v25  ;;  %v7174_v25 = vld [vmem:[%s9840_s1 + $0x1d4] ss:$8 sps:$4 sm:$0xff]  }
  0x61   :  { %725 = vmatmul.mubr.bf16.gmra.mrb[16].mxu0 %v7101_v26 }
  0x62   :  { %732 = vmatprep.mubr.bf16.mxu0 %v7102_v27 }
  0x69   :  { %733 = vmatmul.mubr.bf16.gmra.mrb[20].mxu0 %v7104_v28 }
  0x6a   :  { %740 = vmatprep.mubr.bf16.mxu0 %v7105_v29 }
  0x71   :  { %741 = vmatmul.mubr.bf16.gmra.mrb[24].mxu0 %v7107_v30  ;;  %v7176_v30 = vld [vmem:[%s9840_s1 + $0x1d0] ss:$8 sps:$4 sm:$0xff]  }
  0x72   :  { %748 = vmatprep.mubr.bf16.mxu0 %v7108_v31 }
  0x79   :  { %749 = vmatmul.mubr.bf16.gmra.mrb[28].mxu0 %v7110_v32  ;;  %v7177_v32 = vld [vmem:[%s9840_s1 + $0x1e4] ss:$8 sps:$4 sm:$0xff]  }
  0x7a   :  { %756 = vmatprep.mubr.bf16.mxu0 %v7111_v33 }
  0x81   :  { %757 = vmatmul.mubr.bf16.gmra.mrb[32].mxu0 %v7113_v34 }
  0x82   :  { %764 = vmatprep.mubr.bf16.mxu0 %v7114_v35 }
  0x89   :  { %765 = vmatmul.mubr.bf16.gmra.mrb[36].mxu0 %v7116_v36 }
  0x8a   :  { %772 = vmatprep.mubr.bf16.mxu0 %v7117_v37  ;;  %v7179_v37 = vld [vmem:[%s9840_s1 + $0x1e0] ss:$8 sps:$4 sm:$0xff]  }
  0x91   :  { %773 = vmatmul.mubr.bf16.gmra.mrb[40].mxu0 %v7119_v38 }
  0x92   :  { %780 = vmatprep.mubr.bf16.mxu0 %v7120_v39  ;;  %v7180_v39 = vld [vmem:[%s9840_s1 + $0x1f4] ss:$8 sps:$4 sm:$0xff]  }
  0x99   :  { %781 = vmatmul.mubr.bf16.gmra.mrb[44].mxu0 %v7122_v40 }
  0x9a   :  { %788 = vmatprep.mubr.bf16.mxu0 %v7123_v41 }
  0xa1   :  { %789 = vmatmul.mubr.bf16.gmra.mrb[48].mxu0 %v7125_v42 }
  0xa2   :  { %796 = vmatprep.mubr.bf16.mxu0 %v7126_v43 }
  0xa9   :  { %797 = vmatmul.mubr.bf16.gmra.mrb[52].mxu0 %v7128_v44  ;;  %v7182_v44 = vld [vmem:[%s9840_s1 + $0x1f0] ss:$8 sps:$4 sm:$0xff]  }
  0xaa   :  { %804 = vmatprep.mubr.bf16.mxu0 %v7129_v45 }
  0xb1   :  { %805 = vmatmul.mubr.bf16.gmra.mrb[56].mxu0 %v7131_v46  ;;  %v7183_v46 = vld [vmem:[%s9840_s1 + $0x204] ss:$8 sps:$4 sm:$0xff]  }
  0xb2   :  { %812 = vmatprep.mubr.bf16.mxu0 %v7132_v47 }
  0xb9   :  { %813 = vmatmul.mubr.bf16.gmra.mrb[60].mxu0 %v7134_v48 }
  0xba   :  { %820 = vmatprep.mubr.bf16.mxu0 %v7135_v49 }
  0xc1   :  { %821 = vmatmul.mubr.bf16.gmra.mrb[64].mxu0 %v7137_v50 }
  0xc2   :  { %828 = vmatprep.mubr.bf16.mxu0 %v7138_v51  ;;  %v7185_v51 = vld [vmem:[%s9840_s1 + $0x200] ss:$8 sps:$4 sm:$0xff]  }
  0xc9   :  { %829 = vmatmul.mubr.bf16.gmra.mrb[68].mxu0 %v7140_v52 }
  0xca   :  { %836 = vmatprep.mubr.bf16.mxu0 %v7141_v53  ;;  %v7186_v53 = vld [vmem:[%s9840_s1 + $0x214] ss:$8 sps:$4 sm:$0xff]  }
  0xd1   :  { %837 = vmatmul.mubr.bf16.gmra.mrb[72].mxu0 %v7143_v54 }
  0xd2   :  { %844 = vmatprep.mubr.bf16.mxu0 %v7144_v55 }
  0xd9   :  { %845 = vmatmul.mubr.bf16.gmra.mrb[76].mxu0 %v7146_v57 }
  0xda   :  { %852 = vmatprep.mubr.bf16.mxu0 %v7147_v59 }
  0xe1   :  { %853 = vmatmul.mubr.bf16.gmra.mrb[80].mxu0 %v7149_v61 }
  0xe2   :  { %860 = vmatprep.mubr.bf16.mxu0 %v7150_v63 }
  0xe9   :  { %861 = vmatmul.mubr.bf16.gmra.mrb[84].mxu0 %v7152_v1 }
  0xea   :  { %868 = vmatprep.mubr.bf16.mxu0 %v7153_v2  ;;  %v7191_v2 = vld [vmem:[%s9840_s1 + $0x220] ss:$8 sps:$4 sm:$0xff]  }
  0xf1   :  { %869 = vmatmul.mubr.bf16.gmra.mrb[88].mxu0 %v7155_v3 }
  0xf2   :  { %876 = vmatprep.mubr.bf16.mxu0 %v7156_v4  ;;  %v7194_v4 = vld [vmem:[%s9840_s1 + $0x234] ss:$8 sps:$4 sm:$0xff]  }
  0xf9   :  { %877 = vmatmul.mubr.bf16.gmra.mrb[92].mxu0 %v7158_v5 }
  0xfa   :  { %884 = vmatprep.mubr.bf16.mxu0 %v7159_v6 }
 0x101   :  { %885 = vmatmul.mubr.bf16.gmra.mrb[96].mxu0 %v7161_v7 }
 0x102   :  { %892 = vmatprep.mubr.bf16.mxu0 %v7162_v8 }
 0x109   :  { %893 = vmatmul.mubr.bf16.gmra.mrb[100].mxu0 %v7164_v9  ;;  %v7196_v9 = vld [vmem:[%s9840_s1 + $0x230] ss:$8 sps:$4 sm:$0xff]  }
 0x10a   :  { %900 = vmatprep.mubr.bf16.mxu0 %v7165_v10 }
 0x111   :  { %901 = vmatmul.mubr.bf16.gmra.mrb[104].mxu0 %v7167_v12  ;;  %v7199_v12 = vld [vmem:[%s9840_s1 + $0x244] ss:$8 sps:$4 sm:$0xff]  }
 0x112   :  { %908 = vmatprep.mubr.bf16.mxu0 %v7168_v13 }
 0x114   :  { %v8108_v14 = vpop.f32.mrb[0].mxu0 }
 0x115   :  { %v696_v15 = vpop.f32.mrb[1].mxu0 }
 0x116   :  { %v8113_v17 = vpop.f32.mrb[2].mxu0 }
 0x117   :  { %v1013_v19 = vpack.c.bf16 %v8113_v17, %v8108_v14  ;;  %v699_v20 = vpop.f32.mrb[3].mxu0  ;;  %v7217_v14 = vld [vmem:[%s9841_s3 + $0x50] sm:$0xff]  }
 0x118   :  { %v7201_v20 = vld [vmem:[%s9840_s1 + $0x240] ss:$8 sps:$4 sm:$0xff]  }
 0x119   :  { %909 = vmatmul.mubr.bf16.gmra.mrb[108].mxu0 %v7170_v16 }
 0x11a   :  { %916 = vmatprep.mubr.bf16.mxu0 %v7171_v18 }
 0x11c   :  { %v8120_v21 = vpop.f32.mrb[4].mxu0 }
 0x11d   :  { %v704_v22 = vpop.f32.mrb[5].mxu0 }
 0x11e   :  { %v8125_v24 = vpop.f32.mrb[6].mxu0 }
 0x11f   :  { %v1014_v26 = vpack.c.bf16 %v8125_v24, %v8120_v21  ;;  %v707_v27 = vpop.f32.mrb[7].mxu0  ;;  %v7218_v21 = vld [vmem:[%s9841_s3 + $0x58] sm:$0xff]   ;;  %v7219_v24 = vld [vmem:[%s9841_s3 + $0x60] sm:$0xff]  }
 0x121   :  { %917 = vmatmul.mubr.bf16.gmra.mrb[112].mxu0 %v7173_v23  ;;  %v7202_v23 = vld [vmem:[%s9840_s1 + $0x254] ss:$8 sps:$4 sm:$0xff]  }
 0x122   :  { %924 = vmatprep.mubr.bf16.mxu0 %v7174_v25 }
 0x124   :  { %v8132_v28 = vpop.f32.mrb[8].mxu0 }
 0x125   :  { %v712_v29 = vpop.f32.mrb[9].mxu0 }
 0x126   :  { %v8137_v31 = vpop.f32.mrb[10].mxu0  ;;  %v7212_v29 = vld [vmem:[%s9841_s3 + $0x8] sm:$0xff]  }
 0x127   :  { %v1015_v33 = vpack.c.bf16 %v8137_v31, %v8132_v28  ;;  %v715_v34 = vpop.f32.mrb[11].mxu0 }
 0x129   :  { %925 = vmatmul.mubr.bf16.gmra.mrb[116].mxu0 %v7176_v30  ;;  %v7213_v30 = vld [vmem:[%s9841_s3 + $0x10] sm:$0xff]  }
 0x12a   :  { %932 = vmatprep.mubr.bf16.mxu0 %v7177_v32 }
 0x12c   :  { %v8144_v35 = vpop.f32.mrb[12].mxu0 }
 0x12d   :  { %v720_v36 = vpop.f32.mrb[13].mxu0 }
 0x12e   :  { %v8149_v38 = vpop.f32.mrb[14].mxu0  ;;  %v7204_v36 = vld [vmem:[%s9840_s1 + $0x250] ss:$8 sps:$4 sm:$0xff]  }
 0x12f   :  { %v1016_v40 = vpack.c.bf16 %v8149_v38, %v8144_v35  ;;  %v723_v41 = vpop.f32.mrb[15].mxu0 }
 0x131   :  { %933 = vmatmul.mubr.bf16.gmra.mrb[120].mxu0 %v7179_v37 }
 0x132   :  { %940 = vmatprep.mubr.bf16.mxu0 %v7180_v39  ;;  %v7205_v39 = vld [vmem:[%s9840_s1 + $0x264] ss:$8 sps:$4 sm:$0xff]  }
 0x134   :  { %v8156_v42 = vpop.f32.mrb[16].mxu0 }
 0x135   :  { %v728_v43 = vpop.f32.mrb[17].mxu0 }
 0x136   :  { %v8161_v45 = vpop.f32.mrb[18].mxu0 }
 0x137   :  { %v1017_v47 = vpack.c.bf16 %v8161_v45, %v8156_v42  ;;  %v731_v48 = vpop.f32.mrb[19].mxu0 }
 0x139   :  { %941 = vmatmul.mubr.bf16.gmra.mrb[124].mxu0 %v7182_v44  ;;  %v7215_v44 = vld [vmem:[%s9841_s3 + $0x40] sm:$0xff]  }
 0x13a   :  { %948 = vmatprep.mubr.bf16.mxu0 %v7183_v46 }
 0x13c   :  { %v8168_v49 = vpop.f32.mrb[20].mxu0 }
 0x13d   :  { %v736_v50 = vpop.f32.mrb[21].mxu0 }
 0x13e   :  { %v8173_v52 = vpop.f32.mrb[22].mxu0  ;;  %v7207_v50 = vld [vmem:[%s9840_s1 + $0x260] ss:$8 sps:$4 sm:$0xff]  }
 0x13f   :  { %v1018_v54 = vpack.c.bf16 %v8173_v52, %v8168_v49  ;;  %v739_v55 = vpop.f32.mrb[23].mxu0 }
 0x141   :  { %949 = vmatmul.mubr.bf16.gmra.mrb[128].mxu0 %v7185_v51 }
 0x142   :  { %956 = vmatprep.mubr.bf16.mxu0 %v7186_v53  ;;  %v7208_v53 = vld [vmem:[%s9840_s1 + $0x274] ss:$8 sps:$4 sm:$0xff]  }
 0x144   :  { %v8180_v56 = vpop.f32.mrb[24].mxu0 }
 0x145   :  { %v744_v57 = vpop.f32.mrb[25].mxu0 }
 0x146   :  { %v8185_v59 = vpop.f32.mrb[26].mxu0 }
 0x147   :  { %v1019_v61 = vpack.c.bf16 %v8185_v59, %v8180_v56  ;;  %v747_v62 = vpop.f32.mrb[27].mxu0  ;;  %v7220_v56 = vld [vmem:[%s9841_s3 + $0x68] sm:$0xff]   ;;  %v7221_v59 = vld [vmem:[%s9841_s3 + $0x70] sm:$0xff]  }
 0x148   :  { %v7210_v62 = vld [vmem:[%s9840_s1 + $0x270] ss:$8 sps:$4 sm:$0xff]  }
 0x149   :  { %957 = vmatmul.mubr.bf16.gmra.mrb[132].mxu0 %v7188_v58 }
 0x14a   :  { %964 = vmatprep.mubr.bf16.mxu0 %v7189_v60 }
 0x14c   :  { %v8192_v63 = vpop.f32.mrb[28].mxu0 }
 0x14d   :  { %v752_v1 = vpop.f32.mrb[29].mxu0 }
 0x14e   :  { %v8197_v3 = vpop.f32.mrb[30].mxu0 }
 0x14f   :  { %v1020_v5 = vpack.c.bf16 %v8197_v3, %v8192_v63  ;;  %v755_v6 = vpop.f32.mrb[31].mxu0 }
 0x151   :  { %965 = vmatmul.mubr.bf16.gmra.mrb[136].mxu0 %v7191_v2 }
 0x152   :  { %972 = vmatprep.mubr.bf16.mxu0 %v7194_v4 }
 0x154   :  { %v758_v7 = vpop.f32.mrb[32].mxu0 }
 0x155   :  { %v760_v8 = vpop.f32.mrb[33].mxu0 }
 0x156   :  { %v761_v10 = vpop.f32.mrb[34].mxu0 }
 0x157   :  { %v1021_v13 = vpack.c.bf16 %v761_v10, %v758_v7  ;;  %v763_v15 = vpop.f32.mrb[35].mxu0 }
 0x159   :  { %973 = vmatmul.mubr.bf16.gmra.mrb[140].mxu0 %v7196_v9  ;;  %6771 = vmatprep.mubr.msk.bf16.mxu1 %vm1094_vm0, %v1021_v13 }
 0x15a   :  { %980 = vmatprep.mubr.bf16.mxu0 %v7199_v12 }
 0x15c   :  { %v766_v16 = vpop.f32.mrb[36].mxu0 }
 0x15d   :  { %v768_v18 = vpop.f32.mrb[37].mxu0 }
 0x15e   :  { %v769_v22 = vpop.f32.mrb[38].mxu0 }
 0x15f   :  { %v1022_v25 = vpack.c.bf16 %v769_v22, %v766_v16  ;;  %v771_v27 = vpop.f32.mrb[39].mxu0 }
 0x161   :  { %981 = vmatmul.mubr.bf16.gmra.mrb[144].mxu0 %v7201_v20  ;;  %6772 = vmatmul.mubr.msk.bf16.vlgmr.msra.gmra.mrb[0].mxu1 %vm1094_vm0, %v1022_v25 }
 0x162   :  { %988 = vmatprep.mubr.bf16.mxu0 %v7202_v23  ;;  %6788 = vmatpush3.bf16.msra.mxu1 %v8099_v11  ;;  %v7214_v11 = vld [vmem:[%s9841_s3 + $0x18] sm:$0xff]  }
 0x163   :  { %6789 = vmatprep.subr.bf16.mxu1 %v7212_v29 }
 0x164   :  { %v774_v32 = vpop.f32.mrb[40].mxu0 }
 0x165   :  { %v776_v34 = vpop.f32.mrb[41].mxu0 }
 0x166   :  { %v777_v37 = vpop.f32.mrb[42].mxu0  ;;  %6790 = vmatpush3.bf16.msra.mxu1 %v7212_v29 }
 0x167   :  { %v1023_v41 = vpack.c.bf16 %v777_v37, %v774_v32  ;;  %v779_v43 = vpop.f32.mrb[43].mxu0  ;;  %6791 = vmatprep.subr.bf16.mxu1 %v7213_v30  ;;  %v7216_v37 = vld [vmem:[%s9841_s3 + $0x48] sm:$0xff]  }
 0x169   :  { %989 = vmatmul.mubr.bf16.gmra.mrb[148].mxu0 %v7204_v36  ;;  %6775 = vmatprep.mubr.msk.bf16.mxu1 %vm1094_vm0, %v1023_v41 }
 0x16a   :  { %996 = vmatprep.mubr.bf16.mxu0 %v7205_v39  ;;  %6792 = vmatpush3.bf16.msra.mxu1 %v7213_v30 }
 0x16b   :  { %6793 = vmatprep.subr.bf16.mxu1 %v7214_v11 }
 0x16c   :  { %v782_v46 = vpop.f32.mrb[44].mxu0 }
 0x16d   :  { %v784_v48 = vpop.f32.mrb[45].mxu0 }
 0x16e   :  { %v785_v51 = vpop.f32.mrb[46].mxu0  ;;  %6794 = vmatpush3.bf16.msra.mxu1 %v7214_v11  ;;  %v7222_v48 = vld [vmem:[%s9841_s3 + $0x78] sm:$0xff]  }
 0x16f   :  { %v1024_v55 = vpack.c.bf16 %v785_v51, %v782_v46  ;;  %v787_v57 = vpop.f32.mrb[47].mxu0  ;;  %6811 = vmatprep.subr.bf16.mxu1 %v7215_v44 }
 0x171   :  { %997 = vmatmul.mubr.bf16.gmra.mrb[152].mxu0 %v7207_v50  ;;  %6776 = vmatmul.mubr.msk.bf16.gmra.mrb[4].mxu1 %vm1094_vm0, %v1024_v55  ;;  %v7223_v50 = vld [vmem:[%s9841_s3 + $0x80] sm:$0xff]  }
 0x172   :  { %1004 = vmatprep.mubr.bf16.mxu0 %v7208_v53 }
 0x174   :  { %v790_v58 = vpop.f32.mrb[48].mxu0 }
 0x175   :  { %v792_v60 = vpop.f32.mrb[49].mxu0 }
 0x176   :  { %v793_v1 = vpop.f32.mrb[50].mxu0 }
 0x177   :  { %v1025_v2 = vpack.c.bf16 %v793_v1, %v790_v58  ;;  %v795_v4 = vpop.f32.mrb[51].mxu0 }
 0x179   :  { %1005 = vmatmul.mubr.bf16.gmra.mrb[156].mxu0 %v7210_v62  ;;  %6779 = vmatprep.mubr.msk.bf16.mxu1 %vm1094_vm0, %v1025_v2 }
 0x17a   :  { %3416 = vmatprep.mubr.bf16.mxu0 %v7802_v0 }
 0x17c   :  { %v798_v6 = vpop.f32.mrb[52].mxu0 }
 0x17d   :  { %v800_v7 = vpop.f32.mrb[53].mxu0 }
 0x17e   :  { %v801_v8 = vpop.f32.mrb[54].mxu0  ;;  %v70_v7 = vld [vmem:[%s9842_s2 + $0x10] sm:$0xff] }
 0x17f   :  { %v1026_v9 = vpack.c.bf16 %v801_v8, %v798_v6  ;;  %v803_v10 = vpop.f32.mrb[55].mxu0  ;;  %v68_v6 = vld [vmem:[%s9842_s2] sm:$0xff]  ;;  %1883 = vperm.xlu1 %7070, %v70_v7  }
 0x180   :  { %1873 = vperm.xlu0 %7069, %v68_v6   ;;  %v71_v10 = vld [vmem:[%s9842_s2 + $0x18] sm:$0xff] }
 0x181   :  { %6780 = vmatmul.mubr.msk.bf16.gmra.mrb[8].mxu1 %vm1094_vm0, %v1026_v9  ;;  %v69_v9 = vld [vmem:[%s9842_s2 + $0x8] sm:$0xff] }
 0x183   :  { %1888 = vperm.xlu1 %7070, %v71_v10  }
 0x184   :  { %v806_v12 = vpop.f32.mrb[56].mxu0  ;;  %1878 = vperm.xlu0 %7069, %v69_v9  }
 0x185   :  { %v808_v13 = vpop.f32.mrb[57].mxu0 }
 0x186   :  { %v809_v15 = vpop.f32.mrb[58].mxu0 }
 0x187   :  { %v1027_v16 = vpack.c.bf16 %v809_v15, %v806_v12  ;;  %v811_v18 = vpop.f32.mrb[59].mxu0 }
 0x188   :  { %v72_v18 = vld [vmem:[%s9842_s2 + $0x20] sm:$0xff] }
 0x189   :  { %6783 = vmatprep.mubr.msk.bf16.mxu1 %vm1094_vm0, %v1027_v16  ;;  %1893 = vperm.xlu0 %7069, %v72_v18  }
 0x18c   :  { %v814_v20 = vpop.f32.mrb[60].mxu0 }
 0x18d   :  { %v816_v22 = vpop.f32.mrb[61].mxu0 }
 0x18e   :  { %v817_v23 = vpop.f32.mrb[62].mxu0 }
 0x18f   :  { %v1028_v25 = vpack.c.bf16 %v817_v23, %v814_v20  ;;  %v819_v27 = vpop.f32.mrb[63].mxu0  ;;  %v73_v20 = vld [vmem:[%s9842_s2 + $0x28] sm:$0xff]  ;;  %v74_v23 = vld [vmem:[%s9842_s2 + $0x30] sm:$0xff] }
 0x190   :  { %1898 = vperm.xlu1 %7070, %v73_v20   ;;  %1903 = vperm.xlu0 %7069, %v74_v23  }
 0x191   :  { %6784 = vmatmul.mubr.msk.bf16.gmra.mrb[12].mxu1 %vm1094_vm0, %v1028_v25  ;;  %v75_v25 = vld [vmem:[%s9842_s2 + $0x38] sm:$0xff] }
 0x192   :  { %6795 = vmatprep.mubr.msk.bf16.mxu1 %vm1094_vm0, %v1013_v19 }
 0x194   :  { %v822_v29 = vpop.f32.mrb[64].mxu0  ;;  %1908 = vperm.xlu1 %7070, %v75_v25  }
 0x195   :  { %v824_v30 = vpop.f32.mrb[65].mxu0 }
 0x196   :  { %v825_v32 = vpop.f32.mrb[66].mxu0 }
 0x197   :  { %v1029_v34 = vpack.c.bf16 %v825_v32, %v822_v29  ;;  %v827_v36 = vpop.f32.mrb[67].mxu0 }
 0x198   :  { %v76_v36 = vld [vmem:[%s9842_s2 + $0x40] sm:$0xff] }
 0x199   :  { %6796 = vmatmul.mubr.msk.bf16.vlgmr.msra.gmra.mrb[0].mxu1 %vm1094_vm0, %v1014_v26  ;;  %1913 = vperm.xlu0 %7069, %v76_v36  }
 0x19a   :  { %6799 = vmatprep.mubr.msk.bf16.mxu1 %vm1094_vm0, %v1015_v33  ;;  %6812 = vmatpush3.bf16.msra.mxu1 %v7215_v44 }
 0x19b   :  { %6813 = vmatprep.subr.bf16.mxu1 %v7216_v37 }
 0x19c   :  { %v830_v17 = vpop.f32.mrb[68].mxu0 }
 0x19d   :  { %v832_v19 = vpop.f32.mrb[69].mxu0 }
 0x19e   :  { %v833_v39 = vpop.f32.mrb[70].mxu0  ;;  %6814 = vmatpush3.bf16.msra.mxu1 %v7216_v37  ;;  %v77_v37 = vld [vmem:[%s9842_s2 + $0x48] sm:$0xff]  ;;  %v78_v19 = vld [vmem:[%s9842_s2 + $0x50] sm:$0xff] }
 0x19f   :  { %v1030_v41 = vpack.c.bf16 %v833_v39, %v830_v17  ;;  %v835_v43 = vpop.f32.mrb[71].mxu0  ;;  %6815 = vmatprep.subr.bf16.mxu1 %v7217_v14  ;;  %1918 = vperm.xlu1 %7070, %v77_v37  }
 0x1a0   :  { %1923 = vperm.xlu0 %7069, %v78_v19  }
 0x1a1   :  { %6800 = vmatmul.mubr.msk.bf16.gmra.mrb[4].mxu1 %vm1094_vm0, %v1016_v40 }
 0x1a2   :  { %6803 = vmatprep.mubr.msk.bf16.mxu1 %vm1094_vm0, %v1017_v47  ;;  %6816 = vmatpush3.bf16.msra.mxu1 %v7217_v14  ;;  %v7225_v14 = vld [vmem:[%s9841_s3 + $0x90] sm:$0xff]  }
 0x1a3   :  { %6817 = vmatprep.subr.bf16.mxu1 %v7218_v21 }
 0x1a4   :  { %v838_v26 = vpop.f32.mrb[72].mxu0 }
 0x1a5   :  { %v840_v28 = vpop.f32.mrb[73].mxu0 }
 0x1a6   :  { %v841_v31 = vpop.f32.mrb[74].mxu0  ;;  %6818 = vmatpush3.bf16.msra.mxu1 %v7218_v21  ;;  %v80_v28 = vld [vmem:[%s9842_s2 + $0x60] sm:$0xff] }
 0x1a7   :  { %v1031_v33 = vpack.c.bf16 %v841_v31, %v838_v26  ;;  %v843_v11 = vpop.f32.mrb[75].mxu0  ;;  %6835 = vmatprep.subr.bf16.mxu1 %v7219_v24  ;;  %v7226_v26 = vld [vmem:[%s9841_s3 + $0x98] sm:$0xff]   ;;  %v81_v31 = vld [vmem:[%s9842_s2 + $0x68] sm:$0xff]  ;;  %1933 = vperm.xlu0 %7069, %v80_v28  }
 0x1a8   :  { %v82_v11 = vld [vmem:[%s9842_s2 + $0x70] sm:$0xff] }
 0x1a9   :  { %6804 = vmatmul.mubr.msk.bf16.gmra.mrb[8].mxu1 %vm1094_vm0, %v1018_v54 }
 0x1aa   :  { %6807 = vmatprep.mubr.msk.bf16.mxu1 %vm1094_vm0, %v1019_v61 }
 0x1ab   :  { %1943 = vperm.xlu0 %7069, %v82_v11  }
 0x1ac   :  { %v846_v35 = vpop.f32.mrb[76].mxu0 }
 0x1ad   :  { %v848_v38 = vpop.f32.mrb[77].mxu0 }
 0x1ae   :  { %v849_v40 = vpop.f32.mrb[78].mxu0  ;;  %v83_v38 = vld [vmem:[%s9842_s2 + $0x78] sm:$0xff] }
 0x1af   :  { %v1032_v42 = vpack.c.bf16 %v849_v40, %v846_v35  ;;  %v851_v45 = vpop.f32.mrb[79].mxu0 }
 0x1b1   :  { %6808 = vmatmul.mubr.msk.bf16.gmra.mrb[12].mxu1 %vm1094_vm0, %v1020_v5 }
 0x1b2   :  { %6819 = vmatprep.mubr.msk.bf16.mxu1 %vm1094_vm0, %v1029_v34  ;;  %v7224_v34 = vld [vmem:[%s9841_s3 + $0x88] sm:$0xff]  }
 0x1b4   :  { %v854_v47 = vpop.f32.mrb[80].mxu0 }
 0x1b5   :  { %v856_v49 = vpop.f32.mrb[81].mxu0 }
 0x1b6   :  { %v857_v52 = vpop.f32.mrb[82].mxu0  ;;  %v1976_v49 = vld [vmem:[%s9843_s5 + $0x8] sm:$0xff] }
 0x1b7   :  { %v1033_v54 = vpack.c.bf16 %v857_v52, %v854_v47  ;;  %v859_v44 = vpop.f32.mrb[83].mxu0  ;;  %v1975_v47 = vld [vmem:[%s9843_s5] sm:$0xff] }
 0x1b8   :  { %3317 = vperm.xlu0 %7069, %v1975_v47  }
 0x1b9   :  { %6820 = vmatmul.mubr.msk.bf16.vlgmr.msra.gmra.mrb[0].mxu1 %vm1094_vm0, %v1030_v41  ;;  %v79_v41 = vld [vmem:[%s9842_s2 + $0x58] sm:$0xff] }
 0x1ba   :  { %6823 = vmatprep.mubr.msk.bf16.mxu1 %vm1094_vm0, %v1031_v33  ;;  %6836 = vmatpush3.bf16.msra.mxu1 %v7219_v24 }
 0x1bb   :  { %6837 = vmatprep.subr.bf16.mxu1 %v7220_v56  ;;  %1928 = vperm.xlu1 %7070, %v79_v41  }
 0x1bc   :  { %v862_v61 = vpop.f32.mrb[84].mxu0 }
 0x1bd   :  { %v864_v63 = vpop.f32.mrb[85].mxu0 }
 0x1be   :  { %v865_v3 = vpop.f32.mrb[86].mxu0  ;;  %6838 = vmatpush3.bf16.msra.mxu1 %v7220_v56  ;;  %v1978_v56 = vld [vmem:[%s9843_s5 + $0x18] sm:$0xff] }
 0x1bf   :  { %v1034_v5 = vpack.c.bf16 %v865_v3, %v862_v61  ;;  %v867_v46 = vpop.f32.mrb[87].mxu0  ;;  %6839 = vmatprep.subr.bf16.mxu1 %v7221_v59  ;;  %1938 = vperm.xlu1 %7070, %v81_v31   ;;  %v1979_v3 = vld [vmem:[%s9843_s5 + $0x20] sm:$0xff] }
 0x1c1   :  { %6824 = vmatmul.mubr.msk.bf16.gmra.mrb[4].mxu1 %vm1094_vm0, %v1032_v42 }
 0x1c2   :  { %6827 = vmatprep.mubr.msk.bf16.mxu1 %vm1094_vm0, %v1033_v54  ;;  %6840 = vmatpush3.bf16.msra.mxu1 %v7221_v59  ;;  %v1977_v54 = vld [vmem:[%s9843_s5 + $0x10] sm:$0xff] }
 0x1c3   :  { %6841 = vmatprep.subr.bf16.mxu1 %v7222_v48  ;;  %1948 = vperm.xlu1 %7070, %v83_v38  }
 0x1c4   :  { %v870_v51 = vpop.f32.mrb[88].mxu0  ;;  %3327 = vperm.xlu0 %7069, %v1977_v54  }
 0x1c5   :  { %v872_v53 = vpop.f32.mrb[89].mxu0 }
 0x1c6   :  { %v873_v55 = vpop.f32.mrb[90].mxu0  ;;  %6842 = vmatpush3.bf16.msra.mxu1 %v7222_v48  ;;  %v1981_v48 = vld [vmem:[%s9843_s5 + $0x30] sm:$0xff] }
 0x1c7   :  { %v1035_v57 = vpack.c.bf16 %v873_v55, %v870_v51  ;;  %v875_v58 = vpop.f32.mrb[91].mxu0  ;;  %6859 = vmatprep.subr.bf16.mxu1 %v7223_v50  ;;  %3322 = vperm.xlu1 %7070, %v1976_v49   ;;  %v1982_v51 = vld [vmem:[%s9843_s5 + $0x38] sm:$0xff] }
 0x1c8   :  { %3337 = vperm.xlu0 %7069, %v1979_v3  }
 0x1c9   :  { %6828 = vmatmul.mubr.msk.bf16.gmra.mrb[8].mxu1 %vm1094_vm0, %v1034_v5  ;;  %v1980_v5 = vld [vmem:[%s9843_s5 + $0x28] sm:$0xff] }
 0x1ca   :  { %6831 = vmatprep.mubr.msk.bf16.mxu1 %vm1094_vm0, %v1035_v57 }
 0x1cb   :  { %3332 = vperm.xlu1 %7070, %v1978_v56   ;;  %v7227_v56 = vld [vmem:[%s9844_s4] sm:$0xff]  }
 0x1cc   :  { %v878_v60 = vpop.f32.mrb[92].mxu0  ;;  %3347 = vperm.xlu0 %7069, %v1981_v48  }
 0x1cd   :  { %v880_v62 = vpop.f32.mrb[93].mxu0 }
 0x1ce   :  { %v881_v1 = vpop.f32.mrb[94].mxu0 }
 0x1cf   :  { %v1036_v2 = vpack.c.bf16 %v881_v1, %v878_v60  ;;  %v883_v4 = vpop.f32.mrb[95].mxu0  ;;  %3342 = vperm.xlu1 %7070, %v1980_v5  }
 0x1d1   :  { %6832 = vmatmul.mubr.msk.bf16.gmra.mrb[12].mxu1 %vm1094_vm0, %v1036_v2 }
 0x1d3   :  { %3352 = vperm.xlu1 %7070, %v1982_v51  }
 0x1d4   :  { %v886_v8 = vpop.f32.mrb[96].mxu0 }
 0x1d5   :  { %v888_v12 = vpop.f32.mrb[97].mxu0 }
 0x1d6   :  { %v889_v13 = vpop.f32.mrb[98].mxu0 }
 0x1d7   :  { %v1037_v15 = vpack.c.bf16 %v889_v13, %v886_v8  ;;  %v891_v16 = vpop.f32.mrb[99].mxu0 }
 0x1d9   :  { %6843 = vmatprep.mubr.msk.bf16.mxu1 %vm1094_vm0, %v1037_v15 }
 0x1dc   :  { %v894_v22 = vpop.f32.mrb[100].mxu0 }
 0x1dd   :  { %v896_v27 = vpop.f32.mrb[101].mxu0 }
 0x1de   :  { %v897_v29 = vpop.f32.mrb[102].mxu0 }
 0x1df   :  { %v1038_v30 = vpack.c.bf16 %v897_v29, %v894_v22  ;;  %v899_v32 = vpop.f32.mrb[103].mxu0 }
 0x1e1   :  { %6844 = vmatmul.mubr.msk.bf16.vlgmr.msra.gmra.mrb[0].mxu1 %vm1094_vm0, %v1038_v30 }
 0x1e2   :  { %6860 = vmatpush3.bf16.msra.mxu1 %v7223_v50 }
 0x1e3   :  { %6861 = vmatprep.subr.bf16.mxu1 %v7224_v34 }
 0x1e4   :  { %v902_v17 = vpop.f32.mrb[104].mxu0 }
 0x1e5   :  { %v904_v39 = vpop.f32.mrb[105].mxu0 }
 0x1e6   :  { %v905_v43 = vpop.f32.mrb[106].mxu0  ;;  %6862 = vmatpush3.bf16.msra.mxu1 %v7224_v34 }
 0x1e7   :  { %v1039_v21 = vpack.c.bf16 %v905_v43, %v902_v17  ;;  %v907_v24 = vpop.f32.mrb[107].mxu0  ;;  %6863 = vmatprep.subr.bf16.mxu1 %v7225_v14 }
 0x1e9   :  { %6847 = vmatprep.mubr.msk.bf16.mxu1 %vm1094_vm0, %v1039_v21 }
 0x1ea   :  { %6864 = vmatpush3.bf16.msra.mxu1 %v7225_v14 }
 0x1eb   :  { %6865 = vmatprep.subr.bf16.mxu1 %v7226_v26 }
 0x1ec   :  { %v910_v33 = vpop.f32.mrb[108].mxu0 }
 0x1ed   :  { %v912_v35 = vpop.f32.mrb[109].mxu0 }
 0x1ee   :  { %v913_v40 = vpop.f32.mrb[110].mxu0  ;;  %6866 = vmatpush3.bf16.msra.mxu1 %v7226_v26 }
 0x1ef   :  { %v1040_v42 = vpack.c.bf16 %v913_v40, %v910_v33  ;;  %v915_v45 = vpop.f32.mrb[111].mxu0 }
 0x1f1   :  { %6848 = vmatmul.mubr.msk.bf16.gmra.mrb[4].mxu1 %vm1094_vm0, %v1040_v42 }
 0x1f4   :  { %v918_v52 = vpop.f32.mrb[112].mxu0 }
 0x1f5   :  { %v920_v44 = vpop.f32.mrb[113].mxu0 }
 0x1f6   :  { %v921_v59 = vpop.f32.mrb[114].mxu0 }
 0x1f7   :  { %v1041_v61 = vpack.c.bf16 %v921_v59, %v918_v52  ;;  %v923_v63 = vpop.f32.mrb[115].mxu0 }
 0x1f9   :  { %6851 = vmatprep.mubr.msk.bf16.mxu1 %vm1094_vm0, %v1041_v61 }
 0x1fc   :  { %v926_v46 = vpop.f32.mrb[116].mxu0 }
 0x1fd   :  { %v928_v50 = vpop.f32.mrb[117].mxu0 }
 0x1fe   :  { %v929_v53 = vpop.f32.mrb[118].mxu0  ;;  %v1884_v59 = vpop.permute.xlu1 %1883 }
 0x1ff   :  { %v1042_v55 = vpack.c.bf16 %v929_v53, %v926_v46  ;;  %v931_v57 = vpop.f32.mrb[119].mxu0  ;;  %v1874_v61 = vpop.permute.xlu0 %1873 }
 0x201   :  { %6852 = vmatmul.mubr.msk.bf16.gmra.mrb[8].mxu1 %vm1094_vm0, %v1042_v55 }
 0x202   :  { %v1889_v5 = vpop.permute.xlu1 %1888 }
 0x203   :  { %v1879_v48 = vpop.permute.xlu0 %1878 }
 0x204   :  { %v934_v58 = vpop.f32.mrb[120].mxu0 }
 0x205   :  { %v936_v60 = vpop.f32.mrb[121].mxu0 }
 0x206   :  { %v937_v62 = vpop.f32.mrb[122].mxu0 }
 0x207   :  { %v1043_v1 = vpack.c.bf16 %v937_v62, %v934_v58  ;;  %v939_v2 = vpop.f32.mrb[123].mxu0 }
 0x208   :  { %v1894_v62 = vpop.permute.xlu0 %1893 }
 0x209   :  { %6855 = vmatprep.mubr.msk.bf16.mxu1 %vm1094_vm0, %v1043_v1 }
 0x20c   :  { %v942_v4 = vpop.f32.mrb[124].mxu0 }
 0x20d   :  { %v944_v6 = vpop.f32.mrb[125].mxu0 }
 0x20e   :  { %v945_v7 = vpop.f32.mrb[126].mxu0 }
 0x20f   :  { %v1044_v8 = vpack.c.bf16 %v945_v7, %v942_v4  ;;  %v947_v9 = vpop.f32.mrb[127].mxu0  ;;  %v1899_v1 = vpop.permute.xlu1 %1898 }
 0x210   :  { %v1904_v4 = vpop.permute.xlu0 %1903 }
 0x211   :  { %6856 = vmatmul.mubr.msk.bf16.gmra.mrb[12].mxu1 %vm1094_vm0, %v1044_v8 }
 0x213   :  { %v1909_v7 = vpop.permute.xlu1 %1908 }
 0x214   :  { %v950_v10 = vpop.f32.mrb[128].mxu0 }
 0x215   :  { %v952_v12 = vpop.f32.mrb[129].mxu0 }
 0x216   :  { %v953_v13 = vpop.f32.mrb[130].mxu0 }
 0x217   :  { %v1045_v15 = vpack.c.bf16 %v953_v13, %v950_v10  ;;  %v955_v16 = vpop.f32.mrb[131].mxu0 }
 0x219   :  { %6867 = vmatprep.mubr.msk.bf16.mxu1 %vm1094_vm0, %v1045_v15 }
 0x21c   :  { %v958_v18 = vpop.f32.mrb[132].mxu0 }
 0x21d   :  { %v960_v20 = vpop.f32.mrb[133].mxu0 }
 0x21e   :  { %v961_v22 = vpop.f32.mrb[134].mxu0  ;;  %v1914_v20 = vpop.permute.xlu0 %1913 }
 0x21f   :  { %v1046_v23 = vpack.c.bf16 %v961_v22, %v958_v18  ;;  %v963_v25 = vpop.f32.mrb[135].mxu0  ;;  %v1919_v22 = vpop.permute.xlu1 %1918 }
 0x221   :  { %6868 = vmatmul.mubr.msk.bf16.vlgmr.msra.gmra.mrb[0].mxu1 %vm1094_vm0, %v1046_v23 }
 0x222   :  { %v1924_v25 = vpop.permute.xlu0 %1923 }
 0x224   :  { %v966_v27 = vpop.f32.mrb[136].mxu0 }
 0x225   :  { %v968_v29 = vpop.f32.mrb[137].mxu0 }
 0x226   :  { %v969_v30 = vpop.f32.mrb[138].mxu0 }
 0x227   :  { %v1047_v32 = vpack.c.bf16 %v969_v30, %v966_v27  ;;  %v971_v34 = vpop.f32.mrb[139].mxu0 }
 0x229   :  { %6871 = vmatprep.mubr.msk.bf16.mxu1 %vm1094_vm0, %v1047_v32 }
 0x22c   :  { %v974_v36 = vpop.f32.mrb[140].mxu0 }
 0x22d   :  { %v976_v37 = vpop.f32.mrb[141].mxu0 }
 0x22e   :  { %v977_v14 = vpop.f32.mrb[142].mxu0 }
 0x22f   :  { %v1048_v17 = vpack.c.bf16 %v977_v14, %v974_v36  ;;  %v979_v19 = vpop.f32.mrb[143].mxu0 }
 0x231   :  { %6872 = vmatmul.mubr.msk.bf16.gmra.mrb[4].mxu1 %vm1094_vm0, %v1048_v17 }
 0x234   :  { %v982_v39 = vpop.f32.mrb[144].mxu0 }
 0x235   :  { %v984_v41 = vpop.f32.mrb[145].mxu0 }
 0x236   :  { %v985_v43 = vpop.f32.mrb[146].mxu0 }
 0x237   :  { %v1049_v21 = vpack.c.bf16 %v985_v43, %v982_v39  ;;  %v987_v24 = vpop.f32.mrb[147].mxu0  ;;  %v1934_v39 = vpop.permute.xlu0 %1933 }
 0x239   :  { %6875 = vmatprep.mubr.msk.bf16.mxu1 %vm1094_vm0, %v1049_v21 }
 0x23a   :  { %v1929_v29 = vpop.permute.xlu1 %1928 }
 0x23b   :  { %v1944_v21 = vpop.permute.xlu0 %1943 }
 0x23c   :  { %v990_v26 = vpop.f32.mrb[148].mxu0 }
 0x23d   :  { %v992_v28 = vpop.f32.mrb[149].mxu0 }
 0x23e   :  { %v993_v31 = vpop.f32.mrb[150].mxu0  ;;  %v1939_v41 = vpop.permute.xlu1 %1938 }
 0x23f   :  { %v1050_v33 = vpack.c.bf16 %v993_v31, %v990_v26  ;;  %v995_v11 = vpop.f32.mrb[151].mxu0 }
 0x241   :  { %6876 = vmatmul.mubr.msk.bf16.gmra.mrb[8].mxu1 %vm1094_vm0, %v1050_v33 }
 0x242   :  { %v1949_v26 = vpop.permute.xlu1 %1948 }
 0x244   :  { %v998_v35 = vpop.f32.mrb[152].mxu0 }
 0x245   :  { %v1000_v38 = vpop.f32.mrb[153].mxu0 }
 0x246   :  { %v1001_v40 = vpop.f32.mrb[154].mxu0 }
 0x247   :  { %v1051_v42 = vpack.c.bf16 %v1001_v40, %v998_v35  ;;  %v1003_v45 = vpop.f32.mrb[155].mxu0 }
 0x248   :  { %v7249_v45 = vld [vmem:[%s9845_s6 + $0x7c] ss:$8 sps:$4 sm:$0xff]  }
 0x249   :  { %6879 = vmatprep.mubr.msk.bf16.mxu1 %vm1094_vm0, %v1051_v42 }
 0x24c   :  { %v1006_v47 = vpop.f32.mrb[156].mxu0 }
 0x24d   :  { %v1008_v49 = vpop.f32.mrb[157].mxu0 }
 0x24e   :  { %v1009_v52 = vpop.f32.mrb[158].mxu0  ;;  %v7229_v49 = vld [vmem:[%s9844_s4 + $0x10] sm:$0xff]  }
 0x24f   :  { %v1052_v54 = vpack.c.bf16 %v1009_v52, %v1006_v47  ;;  %v1011_v44 = vpop.f32.mrb[159].mxu0  ;;  %v7228_v47 = vld [vmem:[%s9844_s4 + $0x8] sm:$0xff]   ;;  %v7247_v52 = vld [vmem:[%s9845_s6 + $0x78] ss:$8 sps:$4 sm:$0xff]  }
 0x250   :  { %v7250_v44 = vld [vmem:[%s9845_s6 + $0x88] ss:$8 sps:$4 sm:$0xff]  }
 0x251   :  { %6880 = vmatmul.mubr.msk.bf16.gmra.mrb[12].mxu1 %vm1094_vm0, %v1052_v54  ;;  %v7252_v54 = vld [vmem:[%s9845_s6 + $0x8c] ss:$8 sps:$4 sm:$0xff]  }
 0x252   :  { %6899 = vmatprep.mubr.bf16.mxu1 %v7227_v56  ;;  %v7255_v56 = vld [vmem:[%s9845_s6 + $0x9c] ss:$8 sps:$4 sm:$0xff]  }
 0x2f4   :  { %v6869_v63 = vpop.f32.mrb[0].mxu1 }
 0x2f5   :  { %v1792_v3 = vpop.f32.mrb[1].mxu1  ;;  %v1953_v50 = vadd.f32 %v6869_v63, %v1884_v59  ;;  %v7230_v59 = vld [vmem:[%s9844_s4 + $0x18] sm:$0xff]  }
 0x2f6   :  { %v6870_v46 = vpop.f32.mrb[2].mxu1  ;;  %v1951_v55 = vadd.f32 %v1874_v61, %v1792_v3  ;;  %v7231_v61 = vld [vmem:[%s9844_s4 + $0x20] sm:$0xff]   ;;  %v7232_v3 = vld [vmem:[%s9844_s4 + $0x28] sm:$0xff]  }
 0x2f7   :  { %v1954_v51 = vadd.f32 %v6870_v46, %v1889_v5  ;;  %v1795_v53 = vpop.f32.mrb[3].mxu1  ;;  %v7253_v63 = vld [vmem:[%s9845_s6 + $0x98] ss:$8 sps:$4 sm:$0xff]   ;;  %v7233_v5 = vld [vmem:[%s9844_s4 + $0x30] sm:$0xff]  }
 0x2f8   :  { %v1952_v57 = vadd.f32 %v1879_v48, %v1795_v53  ;;  %v7234_v46 = vld [vmem:[%s9844_s4 + $0x38] sm:$0xff]   ;;  %v7235_v48 = vld [vmem:[%s9844_s4 + $0x40] sm:$0xff]  }
 0x2f9   :  { %v1968_v58 = vpack.c.bf16 %v1954_v51, %v1953_v50  ;;  %v7236_v50 = vld [vmem:[%s9844_s4 + $0x48] sm:$0xff]   ;;  %v7237_v51 = vld [vmem:[%s9844_s4 + $0x50] sm:$0xff]   ;;  %v7238_v53 = vld [vmem:[%s9844_s4 + $0x58] sm:$0xff]  }
 0x2fa   :  { %v1967_v60 = vpack.c.bf16 %v1952_v57, %v1951_v55  ;;  %v7239_v55 = vld [vmem:[%s9844_s4 + $0x60] sm:$0xff]   ;;  %v7240_v57 = vld [vmem:[%s9844_s4 + $0x68] sm:$0xff]  }
 0x2fc   :  { %6883 = vmatprep.subr.bf16.mxu1 %v1967_v60 }
 0x2fd   :  { %6884 = vmatpush3.bf16.msra.mxu1 %v1967_v60  ;;  %v7242_v60 = vld [vmem:[%s9844_s4 + $0x78] sm:$0xff]  }
 0x2fe   :  { %6885 = vmatprep.subr.bf16.mxu1 %v1968_v58 }
 0x301   :  { %6886 = vmatpush3.bf16.msra.mxu1 %v1968_v58  ;;  %v7241_v58 = vld [vmem:[%s9844_s4 + $0x70] sm:$0xff]  }
 0x304   :  { %v6873_v2 = vpop.f32.mrb[4].mxu1 }
 0x305   :  { %v1808_v6 = vpop.f32.mrb[5].mxu1  ;;  %v1957_v9 = vadd.f32 %v6873_v2, %v1904_v4  ;;  %v7245_v2 = vld [vmem:[%s9844_s4 + $0x90] sm:$0xff]   ;;  %v7246_v4 = vld [vmem:[%s9844_s4 + $0x98] sm:$0xff]  }
 0x306   :  { %v6874_v8 = vpop.f32.mrb[6].mxu1  ;;  %v1955_v13 = vadd.f32 %v1894_v62, %v1808_v6  ;;  %v7243_v62 = vld [vmem:[%s9844_s4 + $0x80] sm:$0xff]   ;;  %v7258_v6 = vld [vmem:[%s9845_s6 + $0xac] ss:$8 sps:$4 sm:$0xff]  }
 0x307   :  { %v1958_v10 = vadd.f32 %v6874_v8, %v1909_v7  ;;  %v1811_v12 = vpop.f32.mrb[7].mxu1  ;;  %v7256_v7 = vld [vmem:[%s9845_s6 + $0xa8] ss:$8 sps:$4 sm:$0xff]   ;;  %v7259_v8 = vld [vmem:[%s9845_s6 + $0xb8] ss:$8 sps:$4 sm:$0xff]  }
 0x308   :  { %v1956_v15 = vadd.f32 %v1899_v1, %v1811_v12  ;;  %v7244_v1 = vld [vmem:[%s9844_s4 + $0x88] sm:$0xff]  }
 0x309   :  { %v1970_v16 = vpack.c.bf16 %v1958_v10, %v1957_v9  ;;  %v7261_v9 = vld [vmem:[%s9845_s6 + $0xbc] ss:$8 sps:$4 sm:$0xff]   ;;  %v7264_v10 = vld [vmem:[%s9845_s6 + $0xcc] ss:$8 sps:$4 sm:$0xff]   ;;  %v7262_v12 = vld [vmem:[%s9845_s6 + $0xc8] ss:$8 sps:$4 sm:$0xff]  }
 0x30a   :  { %v1969_v18 = vpack.c.bf16 %v1956_v15, %v1955_v13  ;;  %v7265_v13 = vld [vmem:[%s9845_s6 + $0xd8] ss:$8 sps:$4 sm:$0xff]   ;;  %v7267_v15 = vld [vmem:[%s9845_s6 + $0xdc] ss:$8 sps:$4 sm:$0xff]  }
 0x30c   :  { %6887 = vmatprep.subr.bf16.mxu1 %v1969_v18 }
 0x30d   :  { %6888 = vmatpush3.bf16.msra.mxu1 %v1969_v18 }
 0x30e   :  { %6889 = vmatprep.subr.bf16.mxu1 %v1970_v16 }
 0x311   :  { %6890 = vmatpush3.bf16.msra.mxu1 %v1970_v16  ;;  %v5971_v16 = vld [vmem:[%s9845_s6 + $0xe8] sm:$0xff] }
 0x312   :  { %v5987_v18 = vcombine.high %v5971_v16, %v5971_v16 }
 0x314   :  { %v6877_v23 = vpop.f32.mrb[8].mxu1 }
 0x315   :  { %v1824_v27 = vpop.f32.mrb[9].mxu1  ;;  %v1961_v32 = vadd.f32 %v6877_v23, %v1924_v25  ;;  %v7272_v23 = vld [vmem:[%s9845_s6 + $0x4] ss:$8 sps:$4 sm:$0xff]  }
 0x316   :  { %v6878_v30 = vpop.f32.mrb[10].mxu1  ;;  %v1959_v37 = vadd.f32 %v1914_v20, %v1824_v27  ;;  %v5986_v20 = vcombine.low %v5971_v16, %v5971_v16 }
 0x317   :  { %v1962_v34 = vadd.f32 %v6878_v30, %v1929_v29  ;;  %v1827_v36 = vpop.f32.mrb[11].mxu1 }
 0x318   :  { %v1960_v14 = vadd.f32 %v1919_v22, %v1827_v36  ;;  %v2477_v22 = vsel %vm2475_vm1, %v5986_v20, 0  ;;  %v7298_v20 = vld [vmem:[%s9845_s6 + $0x104] ss:$8 sps:$4 sm:$0xff]  }
 0x319   :  { %v1972_v17 = vpack.c.bf16 %v1962_v34, %v1961_v32 }
 0x31a   :  { %v1971_v19 = vpack.c.bf16 %v1960_v14, %v1959_v37 }
 0x31c   :  { %6891 = vmatprep.subr.bf16.mxu1 %v1971_v19 }
 0x31d   :  { %6892 = vmatpush3.bf16.msra.mxu1 %v1971_v19 }
 0x31e   :  { %6893 = vmatprep.subr.bf16.mxu1 %v1972_v17 }
 0x321   :  { %6894 = vmatpush3.bf16.msra.mxu1 %v1972_v17 }
 0x324   :  { %v6881_v43 = vpop.f32.mrb[12].mxu1 }
 0x325   :  { %v1840_v24 = vpop.f32.mrb[13].mxu1  ;;  %v1965_v31 = vadd.f32 %v6881_v43, %v1944_v21 }
 0x326   :  { %v6882_v28 = vpop.f32.mrb[14].mxu1  ;;  %v1963_v35 = vadd.f32 %v1934_v39, %v1840_v24 }
 0x327   :  { %v1966_v33 = vadd.f32 %v6882_v28, %v1949_v26  ;;  %v1843_v11 = vpop.f32.mrb[15].mxu1  ;;  %v7270_v28 = vld [vmem:[%s9845_s6] ss:$8 sps:$4 sm:$0xff]  }
 0x328   :  { %v1964_v38 = vadd.f32 %v1939_v41, %v1843_v11  ;;  %v7273_v11 = vld [vmem:[%s9845_s6 + $0x10] ss:$8 sps:$4 sm:$0xff]  }
 0x329   :  { %v1974_v40 = vpack.c.bf16 %v1966_v33, %v1965_v31  ;;  %v7275_v33 = vld [vmem:[%s9845_s6 + $0x14] ss:$8 sps:$4 sm:$0xff]  }
 0x32a   :  { %v1973_v42 = vpack.c.bf16 %v1964_v38, %v1963_v35  ;;  %v7278_v38 = vld [vmem:[%s9845_s6 + $0x24] ss:$8 sps:$4 sm:$0xff]  }
 0x32c   :  { %6895 = vmatprep.subr.bf16.mxu1 %v1973_v42 }
 0x32d   :  { %6896 = vmatpush3.bf16.msra.mxu1 %v1973_v42 }
 0x32e   :  { %6897 = vmatprep.subr.bf16.mxu1 %v1974_v40 }
 0x331   :  { %6898 = vmatpush3.bf16.msra.mxu1 %v1974_v40 }
 0x332   :  { %2482 = vmatprep.subr.bf16.mxu1 %v7249_v45  ;;  %v7276_v45 = vld [vmem:[%s9845_s6 + $0x20] ss:$8 sps:$4 sm:$0xff]  }
 0x334   :  { %6900 = vmatmul.mubr.bf16.vlgmr.msra.gmra.mrb[16].mxu1 %v7228_v47 }
 0x335   :  { %6903 = vmatprep.mubr.bf16.mxu1 %v7229_v49  ;;  %2483 = vmatpush1.bf16.msra.mxu1 %v7247_v52 }
 0x336   :  { %2484 = vmatprep.subr.bf16.mxu1 %v7252_v54  ;;  %v7281_v54 = vld [vmem:[%s9845_s6 + $0x34] ss:$8 sps:$4 sm:$0xff]  }
 0x339   :  { %2485 = vmatpush1.bf16.msra.mxu1 %v7250_v44  ;;  %v7279_v44 = vld [vmem:[%s9845_s6 + $0x30] ss:$8 sps:$4 sm:$0xff]  }
 0x33a   :  { %2486 = vmatprep.subr.bf16.mxu1 %v7255_v56  ;;  %v7284_v56 = vld [vmem:[%s9845_s6 + $0x44] ss:$8 sps:$4 sm:$0xff]  }
 0x33c   :  { %6904 = vmatmul.mubr.bf16.gmra.mrb[20].mxu1 %v7230_v59 }
 0x33d   :  { %6907 = vmatprep.mubr.bf16.mxu1 %v7231_v61  ;;  %2487 = vmatpush1.bf16.msra.mxu1 %v7253_v63 }
 0x33e   :  { %2488 = vmatprep.subr.bf16.mxu1 %v7258_v6 }
 0x341   :  { %2489 = vmatpush1.bf16.msra.mxu1 %v7256_v7 }
 0x342   :  { %2490 = vmatprep.subr.bf16.mxu1 %v7261_v9  ;;  %v7295_v9 = vld [vmem:[%s9845_s6 + $0xf4] ss:$8 sps:$4 sm:$0xff]  }
 0x344   :  { %6908 = vmatmul.mubr.bf16.gmra.mrb[24].mxu1 %v7232_v3  ;;  %v7282_v3 = vld [vmem:[%s9845_s6 + $0x40] ss:$8 sps:$4 sm:$0xff]  }
 0x345   :  { %6911 = vmatprep.mubr.bf16.mxu1 %v7233_v5  ;;  %2491 = vmatpush1.bf16.msra.mxu1 %v7259_v8 }
 0x346   :  { %2492 = vmatprep.subr.bf16.mxu1 %v7264_v10 }
 0x349   :  { %2493 = vmatpush1.bf16.msra.mxu1 %v7262_v12 }
 0x34a   :  { %2494 = vmatprep.subr.bf16.mxu1 %v7267_v15  ;;  %v7293_v15 = vld [vmem:[%s9845_s6 + $0xf0] ss:$8 sps:$4 sm:$0xff]  }
 0x34c   :  { %6912 = vmatmul.mubr.bf16.gmra.mrb[28].mxu1 %v7234_v46 }
 0x34d   :  { %6915 = vmatprep.mubr.bf16.mxu1 %v7235_v48  ;;  %2495 = vmatpush1.bf16.msra.mxu1 %v7265_v13  ;;  %v7287_v48 = vld [vmem:[%s9845_s6 + $0x54] ss:$8 sps:$4 sm:$0xff]  }
 0x34e   :  { %5988 = vmatprep.subr.msk.bf16.mxu1 %vm2475_vm1, %v5987_v18 }
 0x351   :  { %2497 = vmatpush1.bf16.msra.mxu1 %v2477_v22 }
 0x352   :  { %2648 = vmatprep.subr.bf16.mxu1 %v7272_v23  ;;  %v7296_v23 = vld [vmem:[%s9845_s6 + $0x100] ss:$8 sps:$4 sm:$0xff]  }
 0x354   :  { %6916 = vmatmul.mubr.bf16.gmra.mrb[32].mxu1 %v7236_v50 }
 0x355   :  { %6919 = vmatprep.mubr.bf16.mxu1 %v7237_v51  ;;  %v7285_v51 = vld [vmem:[%s9845_s6 + $0x50] ss:$8 sps:$4 sm:$0xff]  }
 0x35c   :  { %6920 = vmatmul.mubr.bf16.gmra.mrb[36].mxu1 %v7238_v53  ;;  %v7290_v53 = vld [vmem:[%s9845_s6 + $0x64] ss:$8 sps:$4 sm:$0xff]  }
 0x35d   :  { %6923 = vmatprep.mubr.bf16.mxu1 %v7239_v55 }
 0x364   :  { %6924 = vmatmul.mubr.bf16.gmra.mrb[40].mxu1 %v7240_v57  ;;  %v2370_v57 = vld [vmem:[%s9845_s6 + $0x70] sm:$0xff] }
 0x365   :  { %6927 = vmatprep.mubr.bf16.mxu1 %v7241_v58  ;;  %v6007_v6 = vcombine.low %v2370_v57, %v2370_v57 }
 0x367   :  { %v2643_v8 = vsel %vm2475_vm1, %v6007_v6, 0  ;;  %v6064_v6 = vld [vmem:[%s9845_s6 + $0x1d8] sm:$0xff] }
 0x36c   :  { %6928 = vmatmul.mubr.bf16.gmra.mrb[44].mxu1 %v7242_v60 }
 0x36d   :  { %6931 = vmatprep.mubr.bf16.mxu1 %v7243_v62  ;;  %v7288_v62 = vld [vmem:[%s9845_s6 + $0x60] ss:$8 sps:$4 sm:$0xff]  }
 0x374   :  { %6932 = vmatmul.mubr.bf16.gmra.mrb[48].mxu1 %v7244_v1 }
 0x375   :  { %6935 = vmatprep.mubr.bf16.mxu1 %v7245_v2 }
 0x37c   :  { %6936 = vmatmul.mubr.bf16.gmra.mrb[52].mxu1 %v7246_v4  ;;  %v6008_v4 = vcombine.high %v2370_v57, %v2370_v57  ;;  %v7316_v57 = vld [vmem:[%s9845_s6 + $0x168] ss:$8 sps:$4 sm:$0xff]  }
 0x37d   :  { %2514 = vmatprep.mubr.bf16.mxu1 %v7802_v0 }
 0x407   :  { %v8525_v25 = vpop.f32.mrb[16].mxu1 }
 0x408   :  { %v8527_v27 = vpop.f32.mrb[17].mxu1 }
 0x409   :  { %v8529_v29 = vpop.f32.mrb[18].mxu1 }
 0x40a   :  { %v2337_v30 = vpack.c.bf16 %v8529_v29, %v8525_v25  ;;  %v8533_v32 = vpop.f32.mrb[19].mxu1  ;;  %v7305_v25 = vld [vmem:[%s9845_s6 + $0x130] ss:$8 sps:$4 sm:$0xff]  }
 0x40b   :  { %v2336_v34 = vpack.c.bf16 %v8533_v32, %v8527_v27  ;;  %v7299_v27 = vld [vmem:[%s9845_s6 + $0x110] ss:$8 sps:$4 sm:$0xff]  }
 0x40f   :  { %v8537_v36 = vpop.f32.mrb[20].mxu1 }
 0x410   :  { %v8539_v37 = vpop.f32.mrb[21].mxu1 }
 0x411   :  { %v8541_v14 = vpop.f32.mrb[22].mxu1 }
 0x412   :  { %v2339_v17 = vpack.c.bf16 %v8541_v14, %v8537_v36  ;;  %v8545_v19 = vpop.f32.mrb[23].mxu1  ;;  %v7321_v36 = vld [vmem:[%s9845_s6 + $0x17c] ss:$8 sps:$4 sm:$0xff]   ;;  %v7319_v14 = vld [vmem:[%s9845_s6 + $0x178] ss:$8 sps:$4 sm:$0xff]  }
 0x413   :  { %v2338_v39 = vpack.c.bf16 %v8545_v19, %v8539_v37  ;;  %v6028_v37 = vld [vmem:[%s9845_s6 + $0x160] sm:$0xff] }
 0x417   :  { %v6909_v41 = vpop.f32.mrb[24].mxu1 }
 0x418   :  { %v2209_v43 = vpop.f32.mrb[25].mxu1 }
 0x419   :  { %v6910_v21 = vpop.f32.mrb[26].mxu1 }
 0x41a   :  { %v2341_v24 = vpack.c.bf16 %v6910_v21, %v6909_v41  ;;  %v2212_v26 = vpop.f32.mrb[27].mxu1  ;;  %v7301_v41 = vld [vmem:[%s9845_s6 + $0x114] ss:$8 sps:$4 sm:$0xff]  }
 0x41b   :  { %v2340_v31 = vpack.c.bf16 %v2212_v26, %v2209_v43  ;;  %v7304_v26 = vld [vmem:[%s9845_s6 + $0x124] ss:$8 sps:$4 sm:$0xff]  }
 0x41d   :  { %5989 = vmatmul.mubr.msk.bf16.vlgmr.msra.gmra.mrb[56].mxu1 %vm2462_vm2, %v2340_v31  ;;  %v7302_v31 = vld [vmem:[%s9845_s6 + $0x120] ss:$8 sps:$4 sm:$0xff]  }
 0x41e   :  { %2649 = vmatpush1.bf16.msra.mxu1 %v7270_v28  ;;  %2524 = vmatprep.mubr.bf16.mxu1 %v7802_v0 }
 0x41f   :  { %2650 = vmatprep.subr.bf16.mxu1 %v7275_v33  ;;  %v6913_v35 = vpop.f32.mrb[28].mxu1  ;;  %v7307_v33 = vld [vmem:[%s9845_s6 + $0x134] ss:$8 sps:$4 sm:$0xff]  }
 0x420   :  { %v2225_v40 = vpop.f32.mrb[29].mxu1 }
 0x421   :  { %v6914_v42 = vpop.f32.mrb[30].mxu1 }
 0x422   :  { %2651 = vmatpush1.bf16.msra.mxu1 %v7273_v11  ;;  %v2343_v47 = vpack.c.bf16 %v6914_v42, %v6913_v35  ;;  %v2228_v49 = vpop.f32.mrb[31].mxu1 }
 0x423   :  { %2652 = vmatprep.subr.bf16.mxu1 %v7278_v38  ;;  %v2342_v52 = vpack.c.bf16 %v2228_v49, %v2225_v40  ;;  %v7310_v40 = vld [vmem:[%s9845_s6 + $0x144] ss:$8 sps:$4 sm:$0xff]  }
 0x425   :  { %5990 = vmatmul.mubr.msk.bf16.gmra.mrb[60].mxu1 %vm2462_vm2, %v2341_v24 }
 0x426   :  { %2653 = vmatpush1.bf16.msra.mxu1 %v7276_v45  ;;  %2534 = vmatprep.mubr.bf16.mxu1 %v7802_v0  ;;  %v7308_v45 = vld [vmem:[%s9845_s6 + $0x140] ss:$8 sps:$4 sm:$0xff]  }
 0x427   :  { %2654 = vmatprep.subr.bf16.mxu1 %v7281_v54  ;;  %v8577_v59 = vpop.f32.mrb[32].mxu1 }
 0x428   :  { %v8579_v61 = vpop.f32.mrb[33].mxu1 }
 0x429   :  { %v8581_v63 = vpop.f32.mrb[34].mxu1 }
 0x42a   :  { %2655 = vmatpush1.bf16.msra.mxu1 %v7279_v44  ;;  %v2345_v5 = vpack.c.bf16 %v8581_v63, %v8577_v59  ;;  %v8588_v46 = vpop.f32.mrb[35].mxu1  ;;  %v7333_v59 = vld [vmem:[%s9845_s6 + $0x1bc] ss:$8 sps:$4 sm:$0xff]   ;;  %v7331_v63 = vld [vmem:[%s9845_s6 + $0x1b8] ss:$8 sps:$4 sm:$0xff]  }
 0x42b   :  { %2656 = vmatprep.subr.bf16.mxu1 %v7284_v56  ;;  %v2344_v50 = vpack.c.bf16 %v8588_v46, %v8579_v61  ;;  %v6044_v56 = vcombine.high %v6028_v37, %v6028_v37  ;;  %v7327_v61 = vld [vmem:[%s9845_s6 + $0x19c] ss:$8 sps:$4 sm:$0xff]   ;;  %v7325_v46 = vld [vmem:[%s9845_s6 + $0x198] ss:$8 sps:$4 sm:$0xff]  }
 0x42d   :  { %5991 = vmatmul.mubr.msk.bf16.gmra.mrb[64].mxu1 %vm2462_vm2, %v2342_v52  ;;  %v7311_v52 = vld [vmem:[%s9845_s6 + $0x150] ss:$8 sps:$4 sm:$0xff]  }
 0x42e   :  { %2657 = vmatpush1.bf16.msra.mxu1 %v7282_v3  ;;  %2544 = vmatprep.mubr.bf16.mxu1 %v7802_v0  ;;  %v6043_v3 = vcombine.low %v6028_v37, %v6028_v37  ;;  %v7421_v37 = vld [vmem:[%s9846_s9 + $0x2fc] ss:$16 sps:$4 sm:$0xff]  }
 0x42f   :  { %2658 = vmatprep.subr.bf16.mxu1 %v7287_v48  ;;  %v8603_v55 = vpop.f32.mrb[36].mxu1 }
 0x430   :  { %v8608_v58 = vpop.f32.mrb[37].mxu1 }
 0x431   :  { %v8610_v60 = vpop.f32.mrb[38].mxu1 }
 0x432   :  { %2659 = vmatpush1.bf16.msra.mxu1 %v7285_v51  ;;  %v2347_v1 = vpack.c.bf16 %v8610_v60, %v8603_v55  ;;  %v8617_v2 = vpop.f32.mrb[39].mxu1  ;;  %v2825_v51 = vsel %vm2475_vm1, %v6043_v3, 0  ;;  %v7344_v55 = vld [vmem:[%s9845_s6 + $0x1f4] ss:$8 sps:$4 sm:$0xff]   ;;  %v7342_v60 = vld [vmem:[%s9845_s6 + $0x1f0] ss:$8 sps:$4 sm:$0xff]  }
 0x433   :  { %2660 = vmatprep.subr.bf16.mxu1 %v7290_v53  ;;  %v2346_v7 = vpack.c.bf16 %v8617_v2, %v8608_v58  ;;  %v7318_v53 = vld [vmem:[%s9845_s6 + $0x16c] ss:$8 sps:$4 sm:$0xff]   ;;  %v7334_v58 = vld [vmem:[%s9845_s6 + $0x1c8] ss:$8 sps:$4 sm:$0xff]   ;;  %v6080_v2 = vcombine.high %v6064_v6, %v6064_v6 }
 0x434   :  { %v7437_v3 = vld [vmem:[%s9846_s9 + $0x358] ss:$16 sps:$4 sm:$0xff]  }
 0x435   :  { %5992 = vmatmul.mubr.msk.bf16.gmra.mrb[68].mxu1 %vm2462_vm2, %v2343_v47  ;;  %v7313_v47 = vld [vmem:[%s9845_s6 + $0x154] ss:$8 sps:$4 sm:$0xff]  }
 0x436   :  { %2661 = vmatpush1.bf16.msra.mxu1 %v7288_v62  ;;  %2680 = vmatprep.mubr.bf16.mxu1 %v7802_v0  ;;  %v7322_v62 = vld [vmem:[%s9845_s6 + $0x188] ss:$8 sps:$4 sm:$0xff]  }
 0x437   :  { %6009 = vmatprep.subr.msk.bf16.mxu1 %vm2475_vm1, %v6008_v4  ;;  %v8628_v10 = vpop.f32.mrb[40].mxu1  ;;  %v7328_v4 = vld [vmem:[%s9845_s6 + $0x1a8] ss:$8 sps:$4 sm:$0xff]  }
 0x438   :  { %v8630_v12 = vpop.f32.mrb[41].mxu1 }
 0x439   :  { %v8632_v13 = vpop.f32.mrb[42].mxu1 }
 0x43a   :  { %2663 = vmatpush1.bf16.msra.mxu1 %v2643_v8  ;;  %v2349_v16 = vpack.c.bf16 %v8632_v13, %v8628_v10  ;;  %v8639_v18 = vpop.f32.mrb[43].mxu1  ;;  %v7356_v10 = vld [vmem:[%s9845_s6 + $0x234] ss:$8 sps:$4 sm:$0xff]   ;;  %v7354_v13 = vld [vmem:[%s9845_s6 + $0x230] ss:$8 sps:$4 sm:$0xff]  }
 0x43b   :  { %2830 = vmatprep.subr.bf16.mxu1 %v7295_v9  ;;  %v2348_v22 = vpack.c.bf16 %v8639_v18, %v8630_v12  ;;  %v7341_v9 = vld [vmem:[%s9845_s6 + $0x1e4] ss:$8 sps:$4 sm:$0xff]   ;;  %v7350_v12 = vld [vmem:[%s9845_s6 + $0x214] ss:$8 sps:$4 sm:$0xff]   ;;  %v7348_v18 = vld [vmem:[%s9845_s6 + $0x210] ss:$8 sps:$4 sm:$0xff]  }
 0x43d   :  { %6010 = vmatmul.mubr.msk.bf16.vlgmr.msra.gmra.mrb[56].mxu1 %vm2462_vm2, %v2336_v34 }
 0x43e   :  { %2831 = vmatpush1.bf16.msra.mxu1 %v7293_v15  ;;  %2690 = vmatprep.mubr.bf16.mxu1 %v7802_v0  ;;  %v7339_v15 = vld [vmem:[%s9845_s6 + $0x1e0] ss:$8 sps:$4 sm:$0xff]  }
 0x43f   :  { %2832 = vmatprep.subr.bf16.mxu1 %v7298_v20  ;;  %v8657_v43 = vpop.f32.mrb[44].mxu1  ;;  %v7345_v20 = vld [vmem:[%s9845_s6 + $0x200] ss:$8 sps:$4 sm:$0xff]  }
 0x440   :  { %v8659_v21 = vpop.f32.mrb[45].mxu1 }
 0x441   :  { %v8661_v24 = vpop.f32.mrb[46].mxu1 }
 0x442   :  { %2833 = vmatpush1.bf16.msra.mxu1 %v7296_v23  ;;  %v2351_v32 = vpack.c.bf16 %v8661_v24, %v8657_v43  ;;  %v8668_v34 = vpop.f32.mrb[47].mxu1  ;;  %v7351_v23 = vld [vmem:[%s9845_s6 + $0x220] ss:$8 sps:$4 sm:$0xff]   ;;  %v7367_v24 = vld [vmem:[%s9846_s9 + $0x1dc] ss:$16 sps:$4 sm:$0xff]  }
 0x443   :  { %2834 = vmatprep.subr.bf16.mxu1 %v7301_v41  ;;  %v2350_v28 = vpack.c.bf16 %v8668_v34, %v8659_v21  ;;  %v6100_v41 = vld [vmem:[%s9845_s6 + $0x250] sm:$0xff]  ;;  %v7357_v21 = vld [vmem:[%s9845_s6 + $0x240] ss:$8 sps:$4 sm:$0xff]  }
 0x444   :  { %v6115_v34 = vcombine.low %v6100_v41, %v6100_v41  ;;  %v7365_v43 = vld [vmem:[%s9846_s9 + $0x1d8] ss:$16 sps:$4 sm:$0xff]  }
 0x445   :  { %6011 = vmatmul.mubr.msk.bf16.gmra.mrb[60].mxu1 %vm2462_vm2, %v2337_v30 }
 0x446   :  { %2835 = vmatpush1.bf16.msra.mxu1 %v7299_v27  ;;  %2700 = vmatprep.mubr.bf16.mxu1 %v7802_v0  ;;  %v6116_v27 = vcombine.high %v6100_v41, %v6100_v41 }
 0x447   :  { %2836 = vmatprep.subr.bf16.mxu1 %v7304_v26  ;;  %v8686_v11 = vpop.f32.mrb[48].mxu1  ;;  %v3221_v26 = vsel %vm2475_vm1, %v6115_v34, 0 }
 0x448   :  { %v8688_v35 = vpop.f32.mrb[49].mxu1 }
 0x449   :  { %v8690_v38 = vpop.f32.mrb[50].mxu1 }
 0x44a   :  { %2837 = vmatpush1.bf16.msra.mxu1 %v7302_v31  ;;  %v2353_v29 = vpack.c.bf16 %v8690_v38, %v8686_v11  ;;  %v8697_v30 = vpop.f32.mrb[51].mxu1  ;;  %v7377_v31 = vld [vmem:[%s9846_s9 + $0x218] ss:$16 sps:$4 sm:$0xff]  }
 0x44b   :  { %2838 = vmatprep.subr.bf16.mxu1 %v7307_v33  ;;  %v2352_v42 = vpack.c.bf16 %v8697_v30, %v8688_v35  ;;  %v7385_v33 = vld [vmem:[%s9846_s9 + $0x23c] ss:$16 sps:$4 sm:$0xff]   ;;  %v7383_v11 = vld [vmem:[%s9846_s9 + $0x238] ss:$16 sps:$4 sm:$0xff]  }
 0x44c   :  { %v7391_v35 = vld [vmem:[%s9846_s9 + $0x25c] ss:$16 sps:$4 sm:$0xff]   ;;  %v7389_v38 = vld [vmem:[%s9846_s9 + $0x258] ss:$16 sps:$4 sm:$0xff]  }
 0x44d   :  { %6012 = vmatmul.mubr.msk.bf16.gmra.mrb[64].mxu1 %vm2462_vm2, %v2338_v39  ;;  %v7403_v30 = vld [vmem:[%s9846_s9 + $0x29c] ss:$16 sps:$4 sm:$0xff]  }
 0x44e   :  { %2839 = vmatpush1.bf16.msra.mxu1 %v7305_v25  ;;  %2710 = vmatprep.mubr.bf16.mxu1 %v7802_v0  ;;  %v7397_v25 = vld [vmem:[%s9846_s9 + $0x27c] ss:$16 sps:$4 sm:$0xff]  }
 0x44f   :  { %2840 = vmatprep.subr.bf16.mxu1 %v7310_v40  ;;  %v8715_v49 = vpop.f32.mrb[52].mxu1  ;;  %v7401_v40 = vld [vmem:[%s9846_s9 + $0x298] ss:$16 sps:$4 sm:$0xff]  }
 0x450   :  { %v8720_v19 = vpop.f32.mrb[53].mxu1 }
 0x451   :  { %v8722_v39 = vpop.f32.mrb[54].mxu1 }
 0x452   :  { %2841 = vmatpush1.bf16.msra.mxu1 %v7308_v45  ;;  %v2355_v54 = vpack.c.bf16 %v8722_v39, %v8715_v49  ;;  %v8729_v44 = vpop.f32.mrb[55].mxu1  ;;  %v7407_v45 = vld [vmem:[%s9846_s9 + $0x2b8] ss:$16 sps:$4 sm:$0xff]   ;;  %v7427_v39 = vld [vmem:[%s9846_s9 + $0x31c] ss:$16 sps:$4 sm:$0xff]  }
 0x453   :  { %2842 = vmatprep.subr.bf16.mxu1 %v7313_v47  ;;  %v2354_v48 = vpack.c.bf16 %v8729_v44, %v8720_v19  ;;  %v7415_v47 = vld [vmem:[%s9846_s9 + $0x2dc] ss:$16 sps:$4 sm:$0xff]   ;;  %v7413_v49 = vld [vmem:[%s9846_s9 + $0x2d8] ss:$16 sps:$4 sm:$0xff]  }
 0x454   :  { %v7419_v19 = vld [vmem:[%s9846_s9 + $0x2f8] ss:$16 sps:$4 sm:$0xff]  }
 0x455   :  { %6013 = vmatmul.mubr.msk.bf16.gmra.mrb[68].mxu1 %vm2462_vm2, %v2339_v17  ;;  %v7324_v17 = vld [vmem:[%s9845_s6 + $0x18c] ss:$8 sps:$4 sm:$0xff]   ;;  %v7431_v44 = vld [vmem:[%s9846_s9 + $0x338] ss:$16 sps:$4 sm:$0xff]  }
 0x456   :  { %2843 = vmatpush1.bf16.msra.mxu1 %v7311_v52  ;;  %2862 = vmatprep.mubr.bf16.mxu1 %v7802_v0  ;;  %v7425_v52 = vld [vmem:[%s9846_s9 + $0x318] ss:$16 sps:$4 sm:$0xff]  }
 0x457   :  { %6045 = vmatprep.subr.msk.bf16.mxu1 %vm2475_vm1, %v6044_v56  ;;  %v7439_v56 = vld [vmem:[%s9846_s9 + $0x35c] ss:$16 sps:$4 sm:$0xff]  }
 0x45a   :  { %2845 = vmatpush1.bf16.msra.mxu1 %v2825_v51  ;;  %v7443_v51 = vld [vmem:[%s9846_s9 + $0x378] ss:$16 sps:$4 sm:$0xff]  }
 0x45b   :  { %3028 = vmatprep.subr.bf16.mxu1 %v7318_v53 }
 0x45d   :  { %6046 = vmatmul.mubr.msk.bf16.vlgmr.msra.gmra.mrb[56].mxu1 %vm2462_vm2, %v2344_v50  ;;  %v7330_v50 = vld [vmem:[%s9845_s6 + $0x1ac] ss:$8 sps:$4 sm:$0xff]  }
 0x45e   :  { %3029 = vmatpush1.bf16.msra.mxu1 %v7316_v57  ;;  %2872 = vmatprep.mubr.bf16.mxu1 %v7802_v0  ;;  %v3318_v57 = vpop.permute.xlu0 %3317 }
 0x45f   :  { %3030 = vmatprep.subr.bf16.mxu1 %v7321_v36 }
 0x462   :  { %3031 = vmatpush1.bf16.msra.mxu1 %v7319_v14  ;;  %v3323_v14 = vpop.permute.xlu1 %3322 }
 0x463   :  { %3032 = vmatprep.subr.bf16.mxu1 %v7324_v17 }
 0x465   :  { %6047 = vmatmul.mubr.msk.bf16.gmra.mrb[60].mxu1 %vm2462_vm2, %v2345_v5  ;;  %v7336_v5 = vld [vmem:[%s9845_s6 + $0x1cc] ss:$8 sps:$4 sm:$0xff]  }
 0x466   :  { %3033 = vmatpush1.bf16.msra.mxu1 %v7322_v62  ;;  %2882 = vmatprep.mubr.bf16.mxu1 %v7802_v0 }
 0x467   :  { %3034 = vmatprep.subr.bf16.mxu1 %v7327_v61 }
 0x46a   :  { %3035 = vmatpush1.bf16.msra.mxu1 %v7325_v46 }
 0x46b   :  { %3036 = vmatprep.subr.bf16.mxu1 %v7330_v50 }
 0x46d   :  { %6048 = vmatmul.mubr.msk.bf16.gmra.mrb[64].mxu1 %vm2462_vm2, %v2346_v7  ;;  %v6079_v7 = vcombine.low %v6064_v6, %v6064_v6  ;;  %v3328_v6 = vpop.permute.xlu0 %3327 }
 0x46e   :  { %3037 = vmatpush1.bf16.msra.mxu1 %v7328_v4  ;;  %2892 = vmatprep.mubr.bf16.mxu1 %v7802_v0 }
 0x46f   :  { %3038 = vmatprep.subr.bf16.mxu1 %v7333_v59  ;;  %v3023_v8 = vsel %vm2475_vm1, %v6079_v7, 0 }
 0x472   :  { %3039 = vmatpush1.bf16.msra.mxu1 %v7331_v63 }
 0x473   :  { %3040 = vmatprep.subr.bf16.mxu1 %v7336_v5 }
 0x475   :  { %6049 = vmatmul.mubr.msk.bf16.gmra.mrb[68].mxu1 %vm2462_vm2, %v2347_v1  ;;  %v7347_v1 = vld [vmem:[%s9845_s6 + $0x204] ss:$8 sps:$4 sm:$0xff]  }
 0x476   :  { %3041 = vmatpush1.bf16.msra.mxu1 %v7334_v58  ;;  %3060 = vmatprep.mubr.bf16.mxu1 %v7802_v0 }
 0x477   :  { %6081 = vmatprep.subr.msk.bf16.mxu1 %vm2475_vm1, %v6080_v2  ;;  %v3333_v2 = vpop.permute.xlu1 %3332 }
 0x47a   :  { %3043 = vmatpush1.bf16.msra.mxu1 %v3023_v8 }
 0x47b   :  { %3226 = vmatprep.subr.bf16.mxu1 %v7341_v9 }
 0x47d   :  { %6082 = vmatmul.mubr.msk.bf16.vlgmr.msra.gmra.mrb[56].mxu1 %vm2462_vm2, %v2348_v22  ;;  %v7353_v22 = vld [vmem:[%s9845_s6 + $0x224] ss:$8 sps:$4 sm:$0xff]  }
 0x47e   :  { %3227 = vmatpush1.bf16.msra.mxu1 %v7339_v15  ;;  %3070 = vmatprep.mubr.bf16.mxu1 %v7802_v0 }
 0x47f   :  { %3228 = vmatprep.subr.bf16.mxu1 %v7344_v55 }
 0x482   :  { %3229 = vmatpush1.bf16.msra.mxu1 %v7342_v60 }
 0x483   :  { %3230 = vmatprep.subr.bf16.mxu1 %v7347_v1 }
 0x485   :  { %6083 = vmatmul.mubr.msk.bf16.gmra.mrb[60].mxu1 %vm2462_vm2, %v2349_v16  ;;  %v7359_v16 = vld [vmem:[%s9845_s6 + $0x244] ss:$8 sps:$4 sm:$0xff]  }
 0x486   :  { %3231 = vmatpush1.bf16.msra.mxu1 %v7345_v20  ;;  %3080 = vmatprep.mubr.bf16.mxu1 %v7802_v0 }
 0x487   :  { %3232 = vmatprep.subr.bf16.mxu1 %v7350_v12 }
 0x48a   :  { %3233 = vmatpush1.bf16.msra.mxu1 %v7348_v18  ;;  %v3338_v18 = vpop.permute.xlu0 %3337 }
 0x48b   :  { %3234 = vmatprep.subr.bf16.mxu1 %v7353_v22 }
 0x48d   :  { %6084 = vmatmul.mubr.msk.bf16.gmra.mrb[64].mxu1 %vm2462_vm2, %v2350_v28  ;;  %v7379_v28 = vld [vmem:[%s9846_s9 + $0x21c] ss:$16 sps:$4 sm:$0xff]  }
 0x48e   :  { %3235 = vmatpush1.bf16.msra.mxu1 %v7351_v23  ;;  %3090 = vmatprep.mubr.bf16.mxu1 %v7802_v0  ;;  %v3343_v23 = vpop.permute.xlu1 %3342 }
 0x48f   :  { %3236 = vmatprep.subr.bf16.mxu1 %v7356_v10 }
 0x492   :  { %3237 = vmatpush1.bf16.msra.mxu1 %v7354_v13 }
 0x493   :  { %3238 = vmatprep.subr.bf16.mxu1 %v7359_v16 }
 0x495   :  { %6085 = vmatmul.mubr.msk.bf16.gmra.mrb[68].mxu1 %vm2462_vm2, %v2351_v32  ;;  %v7371_v32 = vld [vmem:[%s9846_s9 + $0x1f8] ss:$16 sps:$4 sm:$0xff]  }
 0x496   :  { %3239 = vmatpush1.bf16.msra.mxu1 %v7357_v21  ;;  %3258 = vmatprep.mubr.bf16.mxu1 %v7802_v0 }
 0x497   :  { %6117 = vmatprep.subr.msk.bf16.mxu1 %vm2475_vm1, %v6116_v27 }
 0x49a   :  { %3241 = vmatpush1.bf16.msra.mxu1 %v3221_v26 }
 0x49b   :  { %3898 = vmatprep.subr.bf16.mxu1 %v7367_v24  ;;  %v3348_v24 = vpop.permute.xlu0 %3347 }
 0x49d   :  { %6118 = vmatmul.mubr.msk.bf16.vlgmr.msra.gmra.mrb[56].mxu1 %vm2462_vm2, %v2352_v42  ;;  %v7409_v42 = vld [vmem:[%s9846_s9 + $0x2bc] ss:$16 sps:$4 sm:$0xff]  }
 0x49e   :  { %3268 = vmatprep.mubr.bf16.mxu1 %v7802_v0  ;;  %3899 = vmatpush1.bf16.msra.mxu1 %v7365_v43 }
 0x4a5   :  { %6119 = vmatmul.mubr.msk.bf16.gmra.mrb[60].mxu1 %vm2462_vm2, %v2353_v29  ;;  %v7395_v29 = vld [vmem:[%s9846_s9 + $0x278] ss:$16 sps:$4 sm:$0xff]  }
 0x4a6   :  { %3278 = vmatprep.mubr.bf16.mxu1 %v7802_v0 }
 0x4ad   :  { %6120 = vmatmul.mubr.msk.bf16.gmra.mrb[64].mxu1 %vm2462_vm2, %v2354_v48  ;;  %v7445_v48 = vld [vmem:[%s9846_s9 + $0x37c] ss:$16 sps:$4 sm:$0xff]  }
 0x4ae   :  { %3288 = vmatprep.mubr.bf16.mxu1 %v7802_v0  ;;  %v7373_v0 = vld [vmem:[%s9846_s9 + $0x1fc] ss:$16 sps:$4 sm:$0xff]  }
 0x4af   :  { %3900 = vmatprep.subr.bf16.mxu1 %v7373_v0  ;;  %v3353_v0 = vpop.permute.xlu1 %3352 }
 0x4b0   :  { %3901 = vmatpush1.bf16.msra.mxu1 %v7371_v32 }
 0x4b1   :  { %3902 = vmatprep.subr.bf16.mxu1 %v7379_v28 }
 0x4b4   :  { %3903 = vmatpush1.bf16.msra.mxu1 %v7377_v31 }
 0x4b5   :  { %6121 = vmatmul.mubr.msk.bf16.gmra.mrb[68].mxu1 %vm2462_vm2, %v2355_v54  ;;  %3904 = vmatprep.subr.bf16.mxu1 %v7385_v33  ;;  %v7433_v54 = vld [vmem:[%s9846_s9 + $0x33c] ss:$16 sps:$4 sm:$0xff]  }
 0x4b8   :  { %3905 = vmatpush1.bf16.msra.mxu1 %v7383_v11 }
 0x4b9   :  { %3906 = vmatprep.subr.bf16.mxu1 %v7391_v35 }
 0x4bc   :  { %3907 = vmatpush1.bf16.msra.mxu1 %v7389_v38 }
 0x4bd   :  { %3908 = vmatprep.subr.bf16.mxu1 %v7397_v25 }
 0x4c0   :  { %3909 = vmatpush1.bf16.msra.mxu1 %v7395_v29 }
 0x4c1   :  { %3910 = vmatprep.subr.bf16.mxu1 %v7403_v30  ;;  %v7364_v30 = vld [vmem:[%s9846_s9 + $0x1d4] ss:$16 sps:$4 sm:$0xff]  }
 0x4c4   :  { %3911 = vmatpush1.bf16.msra.mxu1 %v7401_v40  ;;  %v3380_v40 = vld [vmem:[%s9847_s7] sm:$0x7] }
 0x4c5   :  { %3912 = vmatprep.subr.bf16.mxu1 %v7409_v42  ;;  %v7362_v42 = vld [vmem:[%s9846_s9 + $0x1d0] ss:$16 sps:$4 sm:$0xff]  }
 0x4c8   :  { %3913 = vmatpush1.bf16.msra.mxu1 %v7407_v45  ;;  %v7370_v45 = vld [vmem:[%s9846_s9 + $0x1f4] ss:$16 sps:$4 sm:$0xff]  }
 0x4c9   :  { %3914 = vmatprep.subr.bf16.mxu1 %v7415_v47  ;;  %v7368_v47 = vld [vmem:[%s9846_s9 + $0x1f0] ss:$16 sps:$4 sm:$0xff]  }
 0x4cc   :  { %3915 = vmatpush1.bf16.msra.mxu1 %v7413_v49  ;;  %v7376_v49 = vld [vmem:[%s9846_s9 + $0x214] ss:$16 sps:$4 sm:$0xff]  }
 0x4cd   :  { %3916 = vmatprep.subr.bf16.mxu1 %v7421_v37  ;;  %v7374_v37 = vld [vmem:[%s9846_s9 + $0x210] ss:$16 sps:$4 sm:$0xff]  }
 0x4d0   :  { %3917 = vmatpush1.bf16.msra.mxu1 %v7419_v19  ;;  %v7382_v19 = vld [vmem:[%s9846_s9 + $0x234] ss:$16 sps:$4 sm:$0xff]  }
 0x4d1   :  { %3918 = vmatprep.subr.bf16.mxu1 %v7427_v39  ;;  %v7380_v39 = vld [vmem:[%s9846_s9 + $0x230] ss:$16 sps:$4 sm:$0xff]  }
 0x4d4   :  { %3919 = vmatpush1.bf16.msra.mxu1 %v7425_v52  ;;  %v7388_v52 = vld [vmem:[%s9846_s9 + $0x254] ss:$16 sps:$4 sm:$0xff]  }
 0x4d5   :  { %3920 = vmatprep.subr.bf16.mxu1 %v7433_v54  ;;  %v7386_v54 = vld [vmem:[%s9846_s9 + $0x250] ss:$16 sps:$4 sm:$0xff]  }
 0x4d8   :  { %3921 = vmatpush1.bf16.msra.mxu1 %v7431_v44  ;;  %v7394_v44 = vld [vmem:[%s9846_s9 + $0x274] ss:$16 sps:$4 sm:$0xff]  }
 0x4d9   :  { %3922 = vmatprep.subr.bf16.mxu1 %v7439_v56  ;;  %v7392_v56 = vld [vmem:[%s9846_s9 + $0x270] ss:$16 sps:$4 sm:$0xff]  }
 0x4dc   :  { %3923 = vmatpush1.bf16.msra.mxu1 %v7437_v3  ;;  %v7400_v3 = vld [vmem:[%s9846_s9 + $0x294] ss:$16 sps:$4 sm:$0xff]  }
 0x4dd   :  { %3924 = vmatprep.subr.bf16.mxu1 %v7445_v48  ;;  %v7398_v48 = vld [vmem:[%s9846_s9 + $0x290] ss:$16 sps:$4 sm:$0xff]  }
 0x4e0   :  { %3925 = vmatpush1.bf16.msra.mxu1 %v7443_v51  ;;  %v7406_v51 = vld [vmem:[%s9846_s9 + $0x2b4] ss:$16 sps:$4 sm:$0xff]  }
 0x570   :  { %v3260_v53 = vpop.f32.mrb[56].mxu1 }
 0x571   :  { %v3262_v36 = vpop.f32.mrb[57].mxu1  ;;  %v3355_v62 = vadd.f32 %v3318_v57, %v3260_v53  ;;  %v7404_v53 = vld [vmem:[%s9846_s9 + $0x2b0] ss:$16 sps:$4 sm:$0xff]  }
 0x572   :  { %v3264_v17 = vpop.f32.mrb[58].mxu1  ;;  %v3356_v50 = vadd.f32 %v3318_v57, %v3262_v36  ;;  %v7412_v57 = vld [vmem:[%s9846_s9 + $0x2d4] ss:$16 sps:$4 sm:$0xff]   ;;  %v7410_v36 = vld [vmem:[%s9846_s9 + $0x2d0] ss:$16 sps:$4 sm:$0xff]  }
 0x573   :  { %v3357_v61 = vadd.f32 %v3323_v14, %v3264_v17  ;;  %v3266_v46 = vpop.f32.mrb[59].mxu1  ;;  %v7416_v17 = vld [vmem:[%s9846_s9 + $0x2f0] ss:$16 sps:$4 sm:$0xff]  }
 0x574   :  { %v3358_v4 = vadd.f32 %v3323_v14, %v3266_v46  ;;  %v7418_v14 = vld [vmem:[%s9846_s9 + $0x2f4] ss:$16 sps:$4 sm:$0xff]  }
 0x575   :  { %v3371_v59 = vpack.c.bf16 %v3357_v61, %v3355_v62  ;;  %v7424_v62 = vld [vmem:[%s9846_s9 + $0x314] ss:$16 sps:$4 sm:$0xff]   ;;  %v7422_v61 = vld [vmem:[%s9846_s9 + $0x310] ss:$16 sps:$4 sm:$0xff]  }
 0x576   :  { %v3372_v63 = vpack.c.bf16 %v3358_v4, %v3356_v50  ;;  %v7430_v46 = vld [vmem:[%s9846_s9 + $0x334] ss:$16 sps:$4 sm:$0xff]   ;;  %v7428_v50 = vld [vmem:[%s9846_s9 + $0x330] ss:$16 sps:$4 sm:$0xff]  }
 0x577   :  { %v7436_v4 = vld [vmem:[%s9846_s9 + $0x354] ss:$16 sps:$4 sm:$0xff]  }
 0x578   :  { %v3270_v5 = vpop.f32.mrb[60].mxu1  ;;  %3384 = vmatprep.subr.bf16.mxu0 %v3372_v63  ;;  %v7442_v63 = vld [vmem:[%s9846_s9 + $0x374] ss:$16 sps:$4 sm:$0xff]  }
 0x579   :  { %v3272_v58 = vpop.f32.mrb[61].mxu1  ;;  %3385 = vmatpush1.bf16.msra.mxu0 %v3371_v59  ;;  %v3359_v8 = vadd.f32 %v3328_v6, %v3270_v5  ;;  %v7434_v59 = vld [vmem:[%s9846_s9 + $0x350] ss:$16 sps:$4 sm:$0xff]  }
 0x57a   :  { %v3274_v7 = vpop.f32.mrb[62].mxu1  ;;  %v3360_v55 = vadd.f32 %v3328_v6, %v3272_v58  ;;  %v7440_v5 = vld [vmem:[%s9846_s9 + $0x370] ss:$16 sps:$4 sm:$0xff]   ;;  %v6180_v58 = vld [vmem:[%s9846_s9 + $0x398] sm:$0xff] }
 0x57b   :  { %v3361_v9 = vadd.f32 %v3333_v2, %v3274_v7  ;;  %v3276_v15 = vpop.f32.mrb[63].mxu1  ;;  %v6179_v6 = vld [vmem:[%s9846_s9 + $0x390] sm:$0xff]  ;;  %v6240_v7 = vcombine.high %v6180_v58, %v6180_v58 }
 0x57c   :  { %v3362_v60 = vadd.f32 %v3333_v2, %v3276_v15  ;;  %v6238_v2 = vcombine.high %v6179_v6, %v6179_v6 }
 0x57d   :  { %v3373_v1 = vpack.c.bf16 %v3361_v9, %v3359_v8  ;;  %v6237_v8 = vcombine.low %v6179_v6, %v6179_v6  ;;  %v6239_v9 = vcombine.low %v6180_v58, %v6180_v58  ;;  %6243 = vmatprep.subr.msk.bf16.mxu1 %vm2475_vm1, %v6240_v7  ;;  %v7524_v6 = vld [vmem:[%s9846_s9 + $0x184] ss:$16 sps:$4 sm:$0xff]   ;;  %v7527_v58 = vld [vmem:[%s9846_s9 + $0x18c] ss:$16 sps:$4 sm:$0xff]   ;;  %v7525_v7 = vld [vmem:[%s9846_s9 + $0x188] ss:$16 sps:$4 sm:$0xff]  }
 0x57e   :  { %v3374_v20 = vpack.c.bf16 %v3362_v60, %v3360_v55  ;;  %v7452_v60 = vld [vmem:[%s9846_s9 + $0x4] ss:$16 sps:$4 sm:$0xff]  }
 0x57f   :  { %v3846_v15 = vsel %vm2475_vm1, %v6237_v8, 0  ;;  %v3852_v55 = vsel %vm2475_vm1, %v6239_v9, 0  ;;  %v7530_v8 = vld [vmem:[%s9846_s9 + $0x1a4] ss:$16 sps:$4 sm:$0xff]   ;;  %v7533_v9 = vld [vmem:[%s9846_s9 + $0x1ac] ss:$16 sps:$4 sm:$0xff]  }
 0x580   :  { %v3280_v12 = vpop.f32.mrb[64].mxu1  ;;  %3386 = vmatprep.subr.bf16.mxu0 %v3374_v20  ;;  %3927 = vmatpush1.bf16.msra.mxu1 %v3852_v55  ;;  %v3484_v55 = vld [vmem:[%s9846_s9 + $0x1c8] sm:$0xff] }
 0x581   :  { %v3282_v22 = vpop.f32.mrb[65].mxu1  ;;  %3387 = vmatpush1.bf16.msra.mxu0 %v3373_v1  ;;  %v3363_v13 = vadd.f32 %v3338_v18, %v3280_v12  ;;  %v7455_v1 = vld [vmem:[%s9846_s9 + $0xc] ss:$16 sps:$4 sm:$0xff]  }
 0x582   :  { %v3284_v10 = vpop.f32.mrb[66].mxu1  ;;  %v3364_v21 = vadd.f32 %v3338_v18, %v3282_v22  ;;  %4284 = vmatprep.subr.bf16.mxu1 %v7455_v1  ;;  %v7531_v1 = vld [vmem:[%s9846_s9 + $0x1a8] ss:$16 sps:$4 sm:$0xff]  }
 0x583   :  { %v3365_v16 = vadd.f32 %v3343_v23, %v3284_v10  ;;  %v3286_v41 = vpop.f32.mrb[67].mxu1 }
 0x584   :  { %v3366_v27 = vadd.f32 %v3343_v23, %v3286_v41  ;;  %v7453_v41 = vld [vmem:[%s9846_s9 + $0x8] ss:$16 sps:$4 sm:$0xff]  }
 0x585   :  { %v3375_v34 = vpack.c.bf16 %v3365_v16, %v3363_v13  ;;  %v7450_v16 = vld [vmem:[%s9846_s9] ss:$16 sps:$4 sm:$0xff]  }
 0x586   :  { %v3376_v26 = vpack.c.bf16 %v3366_v27, %v3364_v21  ;;  %v7458_v27 = vld [vmem:[%s9846_s9 + $0x24] ss:$16 sps:$4 sm:$0xff]  }
 0x588   :  { %v3290_v43 = vpop.f32.mrb[68].mxu1  ;;  %3388 = vmatprep.subr.bf16.mxu0 %v3376_v26  ;;  %v7456_v26 = vld [vmem:[%s9846_s9 + $0x20] ss:$16 sps:$4 sm:$0xff]  }
 0x589   :  { %v3292_v32 = vpop.f32.mrb[69].mxu1  ;;  %3389 = vmatpush1.bf16.msra.mxu0 %v3375_v34  ;;  %v3367_v31 = vadd.f32 %v3348_v24, %v3290_v43  ;;  %v7461_v34 = vld [vmem:[%s9846_s9 + $0x2c] ss:$16 sps:$4 sm:$0xff]   ;;  %v7459_v43 = vld [vmem:[%s9846_s9 + $0x28] ss:$16 sps:$4 sm:$0xff]  }
 0x58a   :  { %v3294_v28 = vpop.f32.mrb[70].mxu1  ;;  %v3368_v35 = vadd.f32 %v3348_v24, %v3292_v32  ;;  %v7464_v24 = vld [vmem:[%s9846_s9 + $0x44] ss:$16 sps:$4 sm:$0xff]   ;;  %v7467_v32 = vld [vmem:[%s9846_s9 + $0x4c] ss:$16 sps:$4 sm:$0xff]  }
 0x58b   :  { %v3369_v33 = vadd.f32 %v3353_v0, %v3294_v28  ;;  %v3296_v11 = vpop.f32.mrb[71].mxu1  ;;  %v7465_v28 = vld [vmem:[%s9846_s9 + $0x48] ss:$16 sps:$4 sm:$0xff]  }
 0x58c   :  { %v3370_v38 = vadd.f32 %v3353_v0, %v3296_v11  ;;  %v7462_v0 = vld [vmem:[%s9846_s9 + $0x40] ss:$16 sps:$4 sm:$0xff]  }
 0x58d   :  { %v3377_v25 = vpack.c.bf16 %v3369_v33, %v3367_v31  ;;  %v7470_v31 = vld [vmem:[%s9846_s9 + $0x64] ss:$16 sps:$4 sm:$0xff]   ;;  %v7473_v33 = vld [vmem:[%s9846_s9 + $0x6c] ss:$16 sps:$4 sm:$0xff]   ;;  %v7468_v11 = vld [vmem:[%s9846_s9 + $0x60] ss:$16 sps:$4 sm:$0xff]  }
 0x58e   :  { %v3378_v29 = vpack.c.bf16 %v3370_v38, %v3368_v35  ;;  %v7471_v35 = vld [vmem:[%s9846_s9 + $0x68] ss:$16 sps:$4 sm:$0xff]   ;;  %v7476_v38 = vld [vmem:[%s9846_s9 + $0x84] ss:$16 sps:$4 sm:$0xff]  }
 0x590   :  { %3390 = vmatprep.subr.bf16.mxu0 %v3378_v29  ;;  %v7474_v29 = vld [vmem:[%s9846_s9 + $0x80] ss:$16 sps:$4 sm:$0xff]  }
 0x591   :  { %3391 = vmatpush1.bf16.msra.mxu0 %v3377_v25  ;;  %v7479_v25 = vld [vmem:[%s9846_s9 + $0x8c] ss:$16 sps:$4 sm:$0xff]  }
 0x592   :  { %3857 = vmatprep.subr.bf16.mxu0 %v7364_v30  ;;  %v7477_v30 = vld [vmem:[%s9846_s9 + $0x88] ss:$16 sps:$4 sm:$0xff]  }
 0x594   :  { %6122 = vmatmul.mubr.msk.bf16.vlgmr.msra.gmra.mrb[160].mxu0 %vm1094_vm0, %v3380_v40  ;;  %v7482_v40 = vld [vmem:[%s9846_s9 + $0xa4] ss:$16 sps:$4 sm:$0xff]  }
 0x595   :  { %3858 = vmatpush1.bf16.msra.mxu0 %v7362_v42  ;;  %v7485_v42 = vld [vmem:[%s9846_s9 + $0xac] ss:$16 sps:$4 sm:$0xff]  }
 0x596   :  { %3859 = vmatprep.subr.bf16.mxu0 %v7370_v45  ;;  %v7480_v45 = vld [vmem:[%s9846_s9 + $0xa0] ss:$16 sps:$4 sm:$0xff]  }
 0x599   :  { %3860 = vmatpush1.bf16.msra.mxu0 %v7368_v47  ;;  %v7483_v47 = vld [vmem:[%s9846_s9 + $0xa8] ss:$16 sps:$4 sm:$0xff]  }
 0x59a   :  { %3861 = vmatprep.subr.bf16.mxu0 %v7376_v49  ;;  %v7488_v49 = vld [vmem:[%s9846_s9 + $0xc4] ss:$16 sps:$4 sm:$0xff]  }
 0x59d   :  { %3862 = vmatpush1.bf16.msra.mxu0 %v7374_v37  ;;  %v7491_v37 = vld [vmem:[%s9846_s9 + $0xcc] ss:$16 sps:$4 sm:$0xff]  }
 0x59e   :  { %3863 = vmatprep.subr.bf16.mxu0 %v7382_v19  ;;  %v7486_v19 = vld [vmem:[%s9846_s9 + $0xc0] ss:$16 sps:$4 sm:$0xff]  }
 0x5a1   :  { %3864 = vmatpush1.bf16.msra.mxu0 %v7380_v39  ;;  %v7489_v39 = vld [vmem:[%s9846_s9 + $0xc8] ss:$16 sps:$4 sm:$0xff]  }
 0x5a2   :  { %3865 = vmatprep.subr.bf16.mxu0 %v7388_v52  ;;  %v7494_v52 = vld [vmem:[%s9846_s9 + $0xe4] ss:$16 sps:$4 sm:$0xff]  }
 0x5a5   :  { %3866 = vmatpush1.bf16.msra.mxu0 %v7386_v54  ;;  %v7497_v54 = vld [vmem:[%s9846_s9 + $0xec] ss:$16 sps:$4 sm:$0xff]  }
 0x5a6   :  { %3867 = vmatprep.subr.bf16.mxu0 %v7394_v44  ;;  %v7492_v44 = vld [vmem:[%s9846_s9 + $0xe0] ss:$16 sps:$4 sm:$0xff]  }
 0x5a9   :  { %3868 = vmatpush1.bf16.msra.mxu0 %v7392_v56  ;;  %v7495_v56 = vld [vmem:[%s9846_s9 + $0xe8] ss:$16 sps:$4 sm:$0xff]  }
 0x5aa   :  { %3869 = vmatprep.subr.bf16.mxu0 %v7400_v3  ;;  %v7500_v3 = vld [vmem:[%s9846_s9 + $0x104] ss:$16 sps:$4 sm:$0xff]  }
 0x5ad   :  { %3870 = vmatpush1.bf16.msra.mxu0 %v7398_v48  ;;  %v7503_v48 = vld [vmem:[%s9846_s9 + $0x10c] ss:$16 sps:$4 sm:$0xff]  }
 0x5ae   :  { %3871 = vmatprep.subr.bf16.mxu0 %v7406_v51  ;;  %v7498_v51 = vld [vmem:[%s9846_s9 + $0x100] ss:$16 sps:$4 sm:$0xff]  }
 0x5b1   :  { %3872 = vmatpush1.bf16.msra.mxu0 %v7404_v53  ;;  %v7501_v53 = vld [vmem:[%s9846_s9 + $0x108] ss:$16 sps:$4 sm:$0xff]  }
 0x5b2   :  { %3873 = vmatprep.subr.bf16.mxu0 %v7412_v57  ;;  %v7506_v57 = vld [vmem:[%s9846_s9 + $0x124] ss:$16 sps:$4 sm:$0xff]  }
 0x5b5   :  { %3874 = vmatpush1.bf16.msra.mxu0 %v7410_v36  ;;  %v7509_v36 = vld [vmem:[%s9846_s9 + $0x12c] ss:$16 sps:$4 sm:$0xff]  }
 0x5b6   :  { %3875 = vmatprep.subr.bf16.mxu0 %v7418_v14  ;;  %v7504_v14 = vld [vmem:[%s9846_s9 + $0x120] ss:$16 sps:$4 sm:$0xff]  }
 0x5b9   :  { %3876 = vmatpush1.bf16.msra.mxu0 %v7416_v17  ;;  %v7507_v17 = vld [vmem:[%s9846_s9 + $0x128] ss:$16 sps:$4 sm:$0xff]  }
 0x5ba   :  { %3877 = vmatprep.subr.bf16.mxu0 %v7424_v62  ;;  %v7512_v62 = vld [vmem:[%s9846_s9 + $0x144] ss:$16 sps:$4 sm:$0xff]  }
 0x5bd   :  { %3878 = vmatpush1.bf16.msra.mxu0 %v7422_v61  ;;  %v7515_v61 = vld [vmem:[%s9846_s9 + $0x14c] ss:$16 sps:$4 sm:$0xff]  }
 0x5be   :  { %3879 = vmatprep.subr.bf16.mxu0 %v7430_v46  ;;  %v7510_v46 = vld [vmem:[%s9846_s9 + $0x140] ss:$16 sps:$4 sm:$0xff]  }
 0x5c1   :  { %3880 = vmatpush1.bf16.msra.mxu0 %v7428_v50  ;;  %v7513_v50 = vld [vmem:[%s9846_s9 + $0x148] ss:$16 sps:$4 sm:$0xff]  }
 0x5c2   :  { %3881 = vmatprep.subr.bf16.mxu0 %v7436_v4  ;;  %v7518_v4 = vld [vmem:[%s9846_s9 + $0x164] ss:$16 sps:$4 sm:$0xff]  }
 0x5c5   :  { %3882 = vmatpush1.bf16.msra.mxu0 %v7434_v59  ;;  %v7521_v59 = vld [vmem:[%s9846_s9 + $0x16c] ss:$16 sps:$4 sm:$0xff]  }
 0x5c6   :  { %3883 = vmatprep.subr.bf16.mxu0 %v7442_v63  ;;  %v7516_v63 = vld [vmem:[%s9846_s9 + $0x160] ss:$16 sps:$4 sm:$0xff]  }
 0x5c9   :  { %3884 = vmatpush1.bf16.msra.mxu0 %v7440_v5  ;;  %v7519_v5 = vld [vmem:[%s9846_s9 + $0x168] ss:$16 sps:$4 sm:$0xff]  }
 0x5ca   :  { %6241 = vmatprep.subr.msk.bf16.mxu0 %vm2475_vm1, %v6238_v2  ;;  %v7522_v2 = vld [vmem:[%s9846_s9 + $0x180] ss:$16 sps:$4 sm:$0xff]  }
 0x5cd   :  { %3886 = vmatpush1.bf16.msra.mxu0 %v3846_v15  ;;  %v3483_v15 = vld [vmem:[%s9846_s9 + $0x1c0] sm:$0xff] }
 0x5ce   :  { %4243 = vmatprep.subr.bf16.mxu0 %v7452_v60  ;;  %v7528_v60 = vld [vmem:[%s9846_s9 + $0x1a0] ss:$16 sps:$4 sm:$0xff]  }
 0x667   :  { %v3418_v20 = vpop.f32.mrb[160].mxu0 }
 0x668   :  { %v9081_v12 = vpack.c.bf16 %v3418_v20, %v3418_v20  ;;  %v3420_v18 = vpop.f32.mrb[161].mxu0  ;;  %v6302_v20 = vcombine.high %v3483_v15, %v3483_v15 }
 0x669   :  { %v9083_v22 = vpack.c.bf16 %v3420_v18, %v3420_v18  ;;  %v3422_v23 = vpop.f32.mrb[162].mxu0  ;;  %v6304_v18 = vcombine.high %v3484_v55, %v3484_v55 }
 0x66a   :  { %v3423_v10 = vpop.f32.mrb[163].mxu0  ;;  %v9095_v21 = vshrl.u32 %v9081_v12, 16  ;;  %v6301_v23 = vcombine.low %v3483_v15, %v3483_v15  ;;  %v7615_v15 = vld [vmem:[%s9846_s9 + $0x52c] ss:$16 sps:$4 sm:$0xff]  }
 0x66b   :  { %v9086_v13 = vshrl.u32 %v9083_v22, 16  ;;  %v6303_v10 = vcombine.low %v3484_v55, %v3484_v55  ;;  %v7610_v55 = vld [vmem:[%s9846_s9 + $0x520] ss:$16 sps:$4 sm:$0xff]  }
 0x66d   :  { %6242 = vmatprep.mubr.msk.bf16.mxu0 %vm3841_vm3, %v9086_v13  ;;  %6244 = vmatprep.mubr.msk.bf16.mxu1 %vm3841_vm3, %v9086_v13 }
 0x66e   :  { %3890 = vmatmul.mubr.bf16.vlgmr.msra.gmra.mrb[164].mxu0 %v9095_v21  ;;  %3931 = vmatmul.mubr.bf16.vlgmr.msra.gmra.mrb[72].mxu1 %v9095_v21 }
 0x66f   :  { %4244 = vmatpush1.bf16.msra.mxu0 %v7450_v16  ;;  %4285 = vmatpush1.bf16.msra.mxu1 %v7453_v41  ;;  %v4232_v16 = vsel %vm2475_vm1, %v6301_v23, 0  ;;  %v4238_v41 = vsel %vm2475_vm1, %v6303_v10, 0  ;;  %v6366_v23 = vld [vmem:[%s9846_s9 + $0x568] sm:$0xff]  ;;  %v7616_v10 = vld [vmem:[%s9846_s9 + $0x540] ss:$16 sps:$4 sm:$0xff]  }
 0x670   :  { %4245 = vmatprep.subr.bf16.mxu0 %v7458_v27  ;;  %4286 = vmatprep.subr.bf16.mxu1 %v7461_v34  ;;  %v7540_v27 = vld [vmem:[%s9846_s9 + $0x3a4] ss:$16 sps:$4 sm:$0xff]   ;;  %v7543_v34 = vld [vmem:[%s9846_s9 + $0x3ac] ss:$16 sps:$4 sm:$0xff]  }
 0x671   :  { %6306 = vmatprep.mubr.msk.bf16.mxu0 %vm3841_vm3, %v9083_v22  ;;  %6308 = vmatprep.mubr.msk.bf16.mxu1 %vm3841_vm3, %v9083_v22 }
 0x673   :  { %4246 = vmatpush1.bf16.msra.mxu0 %v7456_v26  ;;  %4287 = vmatpush1.bf16.msra.mxu1 %v7459_v43  ;;  %v7538_v26 = vld [vmem:[%s9846_s9 + $0x3a0] ss:$16 sps:$4 sm:$0xff]   ;;  %v7541_v43 = vld [vmem:[%s9846_s9 + $0x3a8] ss:$16 sps:$4 sm:$0xff]  }
 0x674   :  { %4247 = vmatprep.subr.bf16.mxu0 %v7464_v24  ;;  %4288 = vmatprep.subr.bf16.mxu1 %v7467_v32  ;;  %v7546_v24 = vld [vmem:[%s9846_s9 + $0x3c4] ss:$16 sps:$4 sm:$0xff]   ;;  %v7549_v32 = vld [vmem:[%s9846_s9 + $0x3cc] ss:$16 sps:$4 sm:$0xff]  }
 0x677   :  { %4248 = vmatpush1.bf16.msra.mxu0 %v7462_v0  ;;  %4289 = vmatpush1.bf16.msra.mxu1 %v7465_v28  ;;  %v7544_v0 = vld [vmem:[%s9846_s9 + $0x3c0] ss:$16 sps:$4 sm:$0xff]   ;;  %v7547_v28 = vld [vmem:[%s9846_s9 + $0x3c8] ss:$16 sps:$4 sm:$0xff]  }
 0x678   :  { %4249 = vmatprep.subr.bf16.mxu0 %v7470_v31  ;;  %4290 = vmatprep.subr.bf16.mxu1 %v7473_v33  ;;  %v4387_v31 = vrot.slane %v9083_v22, 1  ;;  %v7552_v33 = vld [vmem:[%s9846_s9 + $0x3e4] ss:$16 sps:$4 sm:$0xff]  }
 0x67b   :  { %4250 = vmatpush1.bf16.msra.mxu0 %v7468_v11  ;;  %4291 = vmatpush1.bf16.msra.mxu1 %v7471_v35  ;;  %v7555_v11 = vld [vmem:[%s9846_s9 + $0x3ec] ss:$16 sps:$4 sm:$0xff]   ;;  %v7550_v35 = vld [vmem:[%s9846_s9 + $0x3e0] ss:$16 sps:$4 sm:$0xff]  }
 0x67c   :  { %4251 = vmatprep.subr.bf16.mxu0 %v7476_v38  ;;  %4292 = vmatprep.subr.bf16.mxu1 %v7479_v25  ;;  %v7553_v38 = vld [vmem:[%s9846_s9 + $0x3e8] ss:$16 sps:$4 sm:$0xff]   ;;  %v7558_v25 = vld [vmem:[%s9846_s9 + $0x404] ss:$16 sps:$4 sm:$0xff]  }
 0x67f   :  { %4252 = vmatpush1.bf16.msra.mxu0 %v7474_v29  ;;  %4293 = vmatpush1.bf16.msra.mxu1 %v7477_v30  ;;  %v7561_v29 = vld [vmem:[%s9846_s9 + $0x40c] ss:$16 sps:$4 sm:$0xff]   ;;  %v7556_v30 = vld [vmem:[%s9846_s9 + $0x400] ss:$16 sps:$4 sm:$0xff]  }
 0x680   :  { %4253 = vmatprep.subr.bf16.mxu0 %v7482_v40  ;;  %4294 = vmatprep.subr.bf16.mxu1 %v7485_v42  ;;  %v7559_v40 = vld [vmem:[%s9846_s9 + $0x408] ss:$16 sps:$4 sm:$0xff]   ;;  %v7564_v42 = vld [vmem:[%s9846_s9 + $0x424] ss:$16 sps:$4 sm:$0xff]  }
 0x683   :  { %4254 = vmatpush1.bf16.msra.mxu0 %v7480_v45  ;;  %4295 = vmatpush1.bf16.msra.mxu1 %v7483_v47  ;;  %v7567_v45 = vld [vmem:[%s9846_s9 + $0x42c] ss:$16 sps:$4 sm:$0xff]   ;;  %v7562_v47 = vld [vmem:[%s9846_s9 + $0x420] ss:$16 sps:$4 sm:$0xff]  }
 0x684   :  { %4255 = vmatprep.subr.bf16.mxu0 %v7488_v49  ;;  %4296 = vmatprep.subr.bf16.mxu1 %v7491_v37  ;;  %v7565_v49 = vld [vmem:[%s9846_s9 + $0x428] ss:$16 sps:$4 sm:$0xff]   ;;  %v7570_v37 = vld [vmem:[%s9846_s9 + $0x444] ss:$16 sps:$4 sm:$0xff]  }
 0x687   :  { %4256 = vmatpush1.bf16.msra.mxu0 %v7486_v19  ;;  %4297 = vmatpush1.bf16.msra.mxu1 %v7489_v39  ;;  %v7573_v19 = vld [vmem:[%s9846_s9 + $0x44c] ss:$16 sps:$4 sm:$0xff]   ;;  %v7568_v39 = vld [vmem:[%s9846_s9 + $0x440] ss:$16 sps:$4 sm:$0xff]  }
 0x688   :  { %4257 = vmatprep.subr.bf16.mxu0 %v7494_v52  ;;  %4298 = vmatprep.subr.bf16.mxu1 %v7497_v54  ;;  %v7571_v52 = vld [vmem:[%s9846_s9 + $0x448] ss:$16 sps:$4 sm:$0xff]   ;;  %v7576_v54 = vld [vmem:[%s9846_s9 + $0x464] ss:$16 sps:$4 sm:$0xff]  }
 0x68b   :  { %4258 = vmatpush1.bf16.msra.mxu0 %v7492_v44  ;;  %4299 = vmatpush1.bf16.msra.mxu1 %v7495_v56  ;;  %v7579_v44 = vld [vmem:[%s9846_s9 + $0x46c] ss:$16 sps:$4 sm:$0xff]   ;;  %v7574_v56 = vld [vmem:[%s9846_s9 + $0x460] ss:$16 sps:$4 sm:$0xff]  }
 0x68c   :  { %4259 = vmatprep.subr.bf16.mxu0 %v7500_v3  ;;  %4300 = vmatprep.subr.bf16.mxu1 %v7503_v48  ;;  %v7577_v3 = vld [vmem:[%s9846_s9 + $0x468] ss:$16 sps:$4 sm:$0xff]   ;;  %v7582_v48 = vld [vmem:[%s9846_s9 + $0x484] ss:$16 sps:$4 sm:$0xff]  }
 0x68f   :  { %4260 = vmatpush1.bf16.msra.mxu0 %v7498_v51  ;;  %4301 = vmatpush1.bf16.msra.mxu1 %v7501_v53  ;;  %v7585_v51 = vld [vmem:[%s9846_s9 + $0x48c] ss:$16 sps:$4 sm:$0xff]   ;;  %v7580_v53 = vld [vmem:[%s9846_s9 + $0x480] ss:$16 sps:$4 sm:$0xff]  }
 0x690   :  { %4261 = vmatprep.subr.bf16.mxu0 %v7506_v57  ;;  %4302 = vmatprep.subr.bf16.mxu1 %v7509_v36  ;;  %v7583_v57 = vld [vmem:[%s9846_s9 + $0x488] ss:$16 sps:$4 sm:$0xff]   ;;  %v7588_v36 = vld [vmem:[%s9846_s9 + $0x4a4] ss:$16 sps:$4 sm:$0xff]  }
 0x693   :  { %4262 = vmatpush1.bf16.msra.mxu0 %v7504_v14  ;;  %4303 = vmatpush1.bf16.msra.mxu1 %v7507_v17  ;;  %v7591_v14 = vld [vmem:[%s9846_s9 + $0x4ac] ss:$16 sps:$4 sm:$0xff]   ;;  %v7586_v17 = vld [vmem:[%s9846_s9 + $0x4a0] ss:$16 sps:$4 sm:$0xff]  }
 0x694   :  { %4263 = vmatprep.subr.bf16.mxu0 %v7512_v62  ;;  %4304 = vmatprep.subr.bf16.mxu1 %v7515_v61  ;;  %v7589_v62 = vld [vmem:[%s9846_s9 + $0x4a8] ss:$16 sps:$4 sm:$0xff]   ;;  %v7594_v61 = vld [vmem:[%s9846_s9 + $0x4c4] ss:$16 sps:$4 sm:$0xff]  }
 0x697   :  { %4264 = vmatpush1.bf16.msra.mxu0 %v7510_v46  ;;  %4305 = vmatpush1.bf16.msra.mxu1 %v7513_v50  ;;  %v7597_v46 = vld [vmem:[%s9846_s9 + $0x4cc] ss:$16 sps:$4 sm:$0xff]   ;;  %v7592_v50 = vld [vmem:[%s9846_s9 + $0x4c0] ss:$16 sps:$4 sm:$0xff]  }
 0x698   :  { %4265 = vmatprep.subr.bf16.mxu0 %v7518_v4  ;;  %4306 = vmatprep.subr.bf16.mxu1 %v7521_v59  ;;  %v7595_v4 = vld [vmem:[%s9846_s9 + $0x4c8] ss:$16 sps:$4 sm:$0xff]   ;;  %v7600_v59 = vld [vmem:[%s9846_s9 + $0x4e4] ss:$16 sps:$4 sm:$0xff]  }
 0x69b   :  { %4266 = vmatpush1.bf16.msra.mxu0 %v7516_v63  ;;  %4307 = vmatpush1.bf16.msra.mxu1 %v7519_v5  ;;  %v7603_v63 = vld [vmem:[%s9846_s9 + $0x4ec] ss:$16 sps:$4 sm:$0xff]   ;;  %v7598_v5 = vld [vmem:[%s9846_s9 + $0x4e0] ss:$16 sps:$4 sm:$0xff]  }
 0x69c   :  { %4267 = vmatprep.subr.bf16.mxu0 %v7524_v6  ;;  %4308 = vmatprep.subr.bf16.mxu1 %v7527_v58  ;;  %v7601_v6 = vld [vmem:[%s9846_s9 + $0x4e8] ss:$16 sps:$4 sm:$0xff]   ;;  %v7606_v58 = vld [vmem:[%s9846_s9 + $0x504] ss:$16 sps:$4 sm:$0xff]  }
 0x69f   :  { %4268 = vmatpush1.bf16.msra.mxu0 %v7522_v2  ;;  %4309 = vmatpush1.bf16.msra.mxu1 %v7525_v7  ;;  %v7609_v2 = vld [vmem:[%s9846_s9 + $0x50c] ss:$16 sps:$4 sm:$0xff]   ;;  %v7604_v7 = vld [vmem:[%s9846_s9 + $0x500] ss:$16 sps:$4 sm:$0xff]  }
 0x6a0   :  { %4269 = vmatprep.subr.bf16.mxu0 %v7530_v8  ;;  %4310 = vmatprep.subr.bf16.mxu1 %v7533_v9  ;;  %v7607_v8 = vld [vmem:[%s9846_s9 + $0x508] ss:$16 sps:$4 sm:$0xff]   ;;  %v7612_v9 = vld [vmem:[%s9846_s9 + $0x524] ss:$16 sps:$4 sm:$0xff]  }
 0x6a3   :  { %4270 = vmatpush1.bf16.msra.mxu0 %v7528_v60  ;;  %4311 = vmatpush1.bf16.msra.mxu1 %v7531_v1  ;;  %v7613_v60 = vld [vmem:[%s9846_s9 + $0x528] ss:$16 sps:$4 sm:$0xff]   ;;  %v7618_v1 = vld [vmem:[%s9846_s9 + $0x544] ss:$16 sps:$4 sm:$0xff]  }
 0x6a4   :  { %6305 = vmatprep.subr.msk.bf16.mxu0 %vm2475_vm1, %v6302_v20  ;;  %6307 = vmatprep.subr.msk.bf16.mxu1 %vm2475_vm1, %v6304_v18  ;;  %v7621_v20 = vld [vmem:[%s9846_s9 + $0x54c] ss:$16 sps:$4 sm:$0xff]   ;;  %v6365_v18 = vld [vmem:[%s9846_s9 + $0x560] sm:$0xff] }
 0x6a7   :  { %4272 = vmatpush1.bf16.msra.mxu0 %v4232_v16  ;;  %4313 = vmatpush1.bf16.msra.mxu1 %v4238_v41  ;;  %v7619_v16 = vld [vmem:[%s9846_s9 + $0x548] ss:$16 sps:$4 sm:$0xff]   ;;  %v6424_v41 = vcombine.high %v6365_v18, %v6365_v18 }
 0x6a8   :  { %4694 = vmatprep.subr.bf16.mxu0 %v7540_v27  ;;  %4735 = vmatprep.subr.bf16.mxu1 %v7543_v34  ;;  %v6426_v27 = vcombine.high %v6366_v23, %v6366_v23  ;;  %v6423_v34 = vcombine.low %v6365_v18, %v6365_v18  ;;  %v7703_v18 = vld [vmem:[%s9846_s9 + $0x6fc] ss:$16 sps:$4 sm:$0xff]  }
 0x6aa   :  { %4276 = vmatmul.mubr.bf16.vlgmr.msra.gmra.mrb[168].mxu0 %v9081_v12  ;;  %4317 = vmatmul.mubr.bf16.vlgmr.msra.gmra.mrb[76].mxu1 %v9081_v12 }
 0x6ab   :  { %4695 = vmatpush1.bf16.msra.mxu0 %v7538_v26  ;;  %4736 = vmatpush1.bf16.msra.mxu1 %v7541_v43  ;;  %v6425_v26 = vcombine.low %v6366_v23, %v6366_v23  ;;  %v4683_v43 = vsel %vm2475_vm1, %v6423_v34, 0  ;;  %v7698_v23 = vld [vmem:[%s9846_s9 + $0x6f0] ss:$16 sps:$4 sm:$0xff]   ;;  %v6488_v34 = vld [vmem:[%s9846_s9 + $0x738] sm:$0xff] }
 0x6ac   :  { %4696 = vmatprep.subr.bf16.mxu0 %v7546_v24  ;;  %4737 = vmatprep.subr.bf16.mxu1 %v7549_v32  ;;  %v7628_v32 = vld [vmem:[%s9846_s9 + $0x574] ss:$16 sps:$4 sm:$0xff]  }
 0x6ad   :  { %6428 = vmatprep.mubr.msk.bf16.mxu0 %vm3841_vm3, %v4387_v31  ;;  %6430 = vmatprep.mubr.msk.bf16.mxu1 %vm3841_vm3, %v4387_v31  ;;  %v4689_v24 = vsel %vm2475_vm1, %v6425_v26, 0  ;;  %v7629_v31 = vld [vmem:[%s9846_s9 + $0x578] ss:$16 sps:$4 sm:$0xff]   ;;  %v7704_v26 = vld [vmem:[%s9846_s9 + $0x710] ss:$16 sps:$4 sm:$0xff]  }
 0x6af   :  { %4697 = vmatpush1.bf16.msra.mxu0 %v7544_v0  ;;  %4738 = vmatpush1.bf16.msra.mxu1 %v7547_v28  ;;  %v7631_v0 = vld [vmem:[%s9846_s9 + $0x57c] ss:$16 sps:$4 sm:$0xff]   ;;  %v7626_v28 = vld [vmem:[%s9846_s9 + $0x570] ss:$16 sps:$4 sm:$0xff]  }
 0x6b0   :  { %4698 = vmatprep.subr.bf16.mxu0 %v7552_v33  ;;  %4739 = vmatprep.subr.bf16.mxu1 %v7555_v11  ;;  %v4386_v33 = vrot.slane %v9081_v12, 1  ;;  %v7634_v11 = vld [vmem:[%s9846_s9 + $0x594] ss:$16 sps:$4 sm:$0xff]  }
 0x6b3   :  { %4699 = vmatpush1.bf16.msra.mxu0 %v7550_v35  ;;  %4740 = vmatpush1.bf16.msra.mxu1 %v7553_v38  ;;  %v7637_v35 = vld [vmem:[%s9846_s9 + $0x59c] ss:$16 sps:$4 sm:$0xff]   ;;  %v7632_v38 = vld [vmem:[%s9846_s9 + $0x590] ss:$16 sps:$4 sm:$0xff]  }
 0x6b4   :  { %4700 = vmatprep.subr.bf16.mxu0 %v7558_v25  ;;  %4741 = vmatprep.subr.bf16.mxu1 %v7561_v29  ;;  %v7635_v25 = vld [vmem:[%s9846_s9 + $0x598] ss:$16 sps:$4 sm:$0xff]   ;;  %v4840_v29 = vrot.slane %v9086_v13, 1  ;;  %v7638_v13 = vld [vmem:[%s9846_s9 + $0x5b0] ss:$16 sps:$4 sm:$0xff]  }
 0x6b7   :  { %4701 = vmatpush1.bf16.msra.mxu0 %v7556_v30  ;;  %4742 = vmatpush1.bf16.msra.mxu1 %v7559_v40  ;;  %v7640_v30 = vld [vmem:[%s9846_s9 + $0x5b4] ss:$16 sps:$4 sm:$0xff]   ;;  %v7643_v40 = vld [vmem:[%s9846_s9 + $0x5bc] ss:$16 sps:$4 sm:$0xff]  }
 0x6b8   :  { %4702 = vmatprep.subr.bf16.mxu0 %v7564_v42  ;;  %4743 = vmatprep.subr.bf16.mxu1 %v7567_v45  ;;  %v7641_v42 = vld [vmem:[%s9846_s9 + $0x5b8] ss:$16 sps:$4 sm:$0xff]   ;;  %v7646_v45 = vld [vmem:[%s9846_s9 + $0x5d4] ss:$16 sps:$4 sm:$0xff]  }
 0x6bb   :  { %4703 = vmatpush1.bf16.msra.mxu0 %v7562_v47  ;;  %4744 = vmatpush1.bf16.msra.mxu1 %v7565_v49  ;;  %v7649_v47 = vld [vmem:[%s9846_s9 + $0x5dc] ss:$16 sps:$4 sm:$0xff]   ;;  %v7644_v49 = vld [vmem:[%s9846_s9 + $0x5d0] ss:$16 sps:$4 sm:$0xff]  }
 0x6bc   :  { %4704 = vmatprep.subr.bf16.mxu0 %v7570_v37  ;;  %4745 = vmatprep.subr.bf16.mxu1 %v7573_v19  ;;  %v7647_v37 = vld [vmem:[%s9846_s9 + $0x5d8] ss:$16 sps:$4 sm:$0xff]   ;;  %v7652_v19 = vld [vmem:[%s9846_s9 + $0x5f4] ss:$16 sps:$4 sm:$0xff]  }
 0x6bf   :  { %4705 = vmatpush1.bf16.msra.mxu0 %v7568_v39  ;;  %4746 = vmatpush1.bf16.msra.mxu1 %v7571_v52  ;;  %v7655_v39 = vld [vmem:[%s9846_s9 + $0x5fc] ss:$16 sps:$4 sm:$0xff]   ;;  %v7650_v52 = vld [vmem:[%s9846_s9 + $0x5f0] ss:$16 sps:$4 sm:$0xff]  }
 0x6c0   :  { %4706 = vmatprep.subr.bf16.mxu0 %v7576_v54  ;;  %4747 = vmatprep.subr.bf16.mxu1 %v7579_v44  ;;  %v7653_v54 = vld [vmem:[%s9846_s9 + $0x5f8] ss:$16 sps:$4 sm:$0xff]   ;;  %v7658_v44 = vld [vmem:[%s9846_s9 + $0x614] ss:$16 sps:$4 sm:$0xff]  }
 0x6c3   :  { %4707 = vmatpush1.bf16.msra.mxu0 %v7574_v56  ;;  %4748 = vmatpush1.bf16.msra.mxu1 %v7577_v3  ;;  %v7661_v56 = vld [vmem:[%s9846_s9 + $0x61c] ss:$16 sps:$4 sm:$0xff]   ;;  %v7656_v3 = vld [vmem:[%s9846_s9 + $0x610] ss:$16 sps:$4 sm:$0xff]  }
 0x6c4   :  { %4708 = vmatprep.subr.bf16.mxu0 %v7582_v48  ;;  %4749 = vmatprep.subr.bf16.mxu1 %v7585_v51  ;;  %v7659_v48 = vld [vmem:[%s9846_s9 + $0x618] ss:$16 sps:$4 sm:$0xff]   ;;  %v7664_v51 = vld [vmem:[%s9846_s9 + $0x634] ss:$16 sps:$4 sm:$0xff]  }
 0x6c7   :  { %4709 = vmatpush1.bf16.msra.mxu0 %v7580_v53  ;;  %4750 = vmatpush1.bf16.msra.mxu1 %v7583_v57  ;;  %v7667_v53 = vld [vmem:[%s9846_s9 + $0x63c] ss:$16 sps:$4 sm:$0xff]   ;;  %v7662_v57 = vld [vmem:[%s9846_s9 + $0x630] ss:$16 sps:$4 sm:$0xff]  }
 0x6c8   :  { %4710 = vmatprep.subr.bf16.mxu0 %v7588_v36  ;;  %4751 = vmatprep.subr.bf16.mxu1 %v7591_v14  ;;  %v7665_v36 = vld [vmem:[%s9846_s9 + $0x638] ss:$16 sps:$4 sm:$0xff]   ;;  %v7670_v14 = vld [vmem:[%s9846_s9 + $0x654] ss:$16 sps:$4 sm:$0xff]  }
 0x6cb   :  { %4711 = vmatpush1.bf16.msra.mxu0 %v7586_v17  ;;  %4752 = vmatpush1.bf16.msra.mxu1 %v7589_v62  ;;  %v7673_v17 = vld [vmem:[%s9846_s9 + $0x65c] ss:$16 sps:$4 sm:$0xff]   ;;  %v7668_v62 = vld [vmem:[%s9846_s9 + $0x650] ss:$16 sps:$4 sm:$0xff]  }
 0x6cc   :  { %4712 = vmatprep.subr.bf16.mxu0 %v7594_v61  ;;  %4753 = vmatprep.subr.bf16.mxu1 %v7597_v46  ;;  %v7671_v61 = vld [vmem:[%s9846_s9 + $0x658] ss:$16 sps:$4 sm:$0xff]   ;;  %v7676_v46 = vld [vmem:[%s9846_s9 + $0x674] ss:$16 sps:$4 sm:$0xff]  }
 0x6cf   :  { %4713 = vmatpush1.bf16.msra.mxu0 %v7592_v50  ;;  %4754 = vmatpush1.bf16.msra.mxu1 %v7595_v4  ;;  %v7679_v50 = vld [vmem:[%s9846_s9 + $0x67c] ss:$16 sps:$4 sm:$0xff]   ;;  %v7674_v4 = vld [vmem:[%s9846_s9 + $0x670] ss:$16 sps:$4 sm:$0xff]  }
 0x6d0   :  { %4714 = vmatprep.subr.bf16.mxu0 %v7600_v59  ;;  %4755 = vmatprep.subr.bf16.mxu1 %v7603_v63  ;;  %v7677_v59 = vld [vmem:[%s9846_s9 + $0x678] ss:$16 sps:$4 sm:$0xff]   ;;  %v7682_v63 = vld [vmem:[%s9846_s9 + $0x694] ss:$16 sps:$4 sm:$0xff]  }
 0x6d3   :  { %4715 = vmatpush1.bf16.msra.mxu0 %v7598_v5  ;;  %4756 = vmatpush1.bf16.msra.mxu1 %v7601_v6  ;;  %v7685_v5 = vld [vmem:[%s9846_s9 + $0x69c] ss:$16 sps:$4 sm:$0xff]   ;;  %v7680_v6 = vld [vmem:[%s9846_s9 + $0x690] ss:$16 sps:$4 sm:$0xff]  }
 0x6d4   :  { %4716 = vmatprep.subr.bf16.mxu0 %v7606_v58  ;;  %4757 = vmatprep.subr.bf16.mxu1 %v7609_v2  ;;  %v7683_v58 = vld [vmem:[%s9846_s9 + $0x698] ss:$16 sps:$4 sm:$0xff]   ;;  %v7688_v2 = vld [vmem:[%s9846_s9 + $0x6b4] ss:$16 sps:$4 sm:$0xff]  }
 0x6d7   :  { %4717 = vmatpush1.bf16.msra.mxu0 %v7604_v7  ;;  %4758 = vmatpush1.bf16.msra.mxu1 %v7607_v8  ;;  %v7691_v7 = vld [vmem:[%s9846_s9 + $0x6bc] ss:$16 sps:$4 sm:$0xff]   ;;  %v7686_v8 = vld [vmem:[%s9846_s9 + $0x6b0] ss:$16 sps:$4 sm:$0xff]  }
 0x6d8   :  { %4718 = vmatprep.subr.bf16.mxu0 %v7612_v9  ;;  %4759 = vmatprep.subr.bf16.mxu1 %v7615_v15  ;;  %v7689_v9 = vld [vmem:[%s9846_s9 + $0x6b8] ss:$16 sps:$4 sm:$0xff]   ;;  %v7694_v15 = vld [vmem:[%s9846_s9 + $0x6d4] ss:$16 sps:$4 sm:$0xff]  }
 0x6db   :  { %4719 = vmatpush1.bf16.msra.mxu0 %v7610_v55  ;;  %4760 = vmatpush1.bf16.msra.mxu1 %v7613_v60  ;;  %v7697_v55 = vld [vmem:[%s9846_s9 + $0x6dc] ss:$16 sps:$4 sm:$0xff]   ;;  %v7692_v60 = vld [vmem:[%s9846_s9 + $0x6d0] ss:$16 sps:$4 sm:$0xff]  }
 0x6dc   :  { %4720 = vmatprep.subr.bf16.mxu0 %v7618_v1  ;;  %4761 = vmatprep.subr.bf16.mxu1 %v7621_v20  ;;  %v7695_v1 = vld [vmem:[%s9846_s9 + $0x6d8] ss:$16 sps:$4 sm:$0xff]   ;;  %v7700_v20 = vld [vmem:[%s9846_s9 + $0x6f4] ss:$16 sps:$4 sm:$0xff]  }
 0x6df   :  { %4721 = vmatpush1.bf16.msra.mxu0 %v7616_v10  ;;  %4762 = vmatpush1.bf16.msra.mxu1 %v7619_v16  ;;  %v7701_v10 = vld [vmem:[%s9846_s9 + $0x6f8] ss:$16 sps:$4 sm:$0xff]   ;;  %v7706_v16 = vld [vmem:[%s9846_s9 + $0x714] ss:$16 sps:$4 sm:$0xff]  }
 0x6e0   :  { %6427 = vmatprep.subr.msk.bf16.mxu0 %vm2475_vm1, %v6424_v41  ;;  %6429 = vmatprep.subr.msk.bf16.mxu1 %vm2475_vm1, %v6426_v27  ;;  %v7709_v41 = vld [vmem:[%s9846_s9 + $0x71c] ss:$16 sps:$4 sm:$0xff]   ;;  %v6487_v27 = vld [vmem:[%s9846_s9 + $0x730] sm:$0xff] }
 0x6e3   :  { %4723 = vmatpush1.bf16.msra.mxu0 %v4683_v43  ;;  %4764 = vmatpush1.bf16.msra.mxu1 %v4689_v24  ;;  %v7707_v43 = vld [vmem:[%s9846_s9 + $0x718] ss:$16 sps:$4 sm:$0xff]   ;;  %v6546_v24 = vcombine.high %v6487_v27, %v6487_v27 }
 0x6e4   :  { %5147 = vmatprep.subr.bf16.mxu0 %v7628_v32  ;;  %5188 = vmatprep.subr.bf16.mxu1 %v7631_v0  ;;  %v6548_v32 = vcombine.high %v6488_v34, %v6488_v34  ;;  %v6545_v0 = vcombine.low %v6487_v27, %v6487_v27  ;;  %v7777_v27 = vld [vmem:[%s9846_s9 + $0x888] ss:$16 sps:$4 sm:$0xff]  }
 0x6e6   :  { %4727 = vmatmul.mubr.bf16.vlgmr.msra.gmra.mrb[172].mxu0 %v4386_v33  ;;  %4768 = vmatmul.mubr.bf16.vlgmr.msra.gmra.mrb[80].mxu1 %v4386_v33 }
 0x6e7   :  { %5148 = vmatpush1.bf16.msra.mxu0 %v7626_v28  ;;  %5189 = vmatpush1.bf16.msra.mxu1 %v7629_v31  ;;  %v6547_v28 = vcombine.low %v6488_v34, %v6488_v34  ;;  %v5136_v31 = vsel %vm2475_vm1, %v6545_v0, 0  ;;  %v7782_v34 = vld [vmem:[%s9846_s9 + $0x8a4] ss:$16 sps:$4 sm:$0xff]   ;;  %v7791_v0 = vld [vmem:[%s9846_s9 + $0x8cc] ss:$16 sps:$4 sm:$0xff]  }
 0x6e8   :  { %5149 = vmatprep.subr.bf16.mxu0 %v7634_v11  ;;  %5190 = vmatprep.subr.bf16.mxu1 %v7637_v35  ;;  %v7716_v11 = vld [vmem:[%s9846_s9 + $0x744] ss:$16 sps:$4 sm:$0xff]   ;;  %v7719_v35 = vld [vmem:[%s9846_s9 + $0x74c] ss:$16 sps:$4 sm:$0xff]  }
 0x6e9   :  { %6550 = vmatprep.mubr.msk.bf16.mxu0 %vm3841_vm3, %v4840_v29  ;;  %6552 = vmatprep.mubr.msk.bf16.mxu1 %vm3841_vm3, %v4840_v29  ;;  %v5142_v33 = vsel %vm2475_vm1, %v6547_v28, 0  ;;  %v4839_v29 = vrot.slane %v9095_v21, 1  ;;  %v7723_v21 = vld [vmem:[%s9846_s9 + $0x768] ss:$16 sps:$4 sm:$0xff]   ;;  %v7786_v28 = vld [vmem:[%s9846_s9 + $0x8c0] ss:$16 sps:$4 sm:$0xff]  }
 0x6eb   :  { %5150 = vmatpush1.bf16.msra.mxu0 %v7632_v38  ;;  %5191 = vmatpush1.bf16.msra.mxu1 %v7635_v25  ;;  %v7714_v38 = vld [vmem:[%s9846_s9 + $0x740] ss:$16 sps:$4 sm:$0xff]   ;;  %v7717_v25 = vld [vmem:[%s9846_s9 + $0x748] ss:$16 sps:$4 sm:$0xff]  }
 0x6ec   :  { %5151 = vmatprep.subr.bf16.mxu0 %v7640_v30  ;;  %5192 = vmatprep.subr.bf16.mxu1 %v7643_v40  ;;  %v7722_v30 = vld [vmem:[%s9846_s9 + $0x764] ss:$16 sps:$4 sm:$0xff]   ;;  %v7725_v40 = vld [vmem:[%s9846_s9 + $0x76c] ss:$16 sps:$4 sm:$0xff]  }
 0x6ef   :  { %5152 = vmatpush1.bf16.msra.mxu0 %v7638_v13  ;;  %5193 = vmatpush1.bf16.msra.mxu1 %v7641_v42  ;;  %v7720_v13 = vld [vmem:[%s9846_s9 + $0x760] ss:$16 sps:$4 sm:$0xff]   ;;  %v5293_v42 = vrot.slane %v9083_v22, 2 }
 0x6f0   :  { %5153 = vmatprep.subr.bf16.mxu0 %v7646_v45  ;;  %5194 = vmatprep.subr.bf16.mxu1 %v7649_v47  ;;  %v7728_v45 = vld [vmem:[%s9846_s9 + $0x784] ss:$16 sps:$4 sm:$0xff]   ;;  %v7731_v47 = vld [vmem:[%s9846_s9 + $0x78c] ss:$16 sps:$4 sm:$0xff]   ;;  %v7726_v22 = vld [vmem:[%s9846_s9 + $0x780] ss:$16 sps:$4 sm:$0xff]  }
 0x6f3   :  { %5154 = vmatpush1.bf16.msra.mxu0 %v7644_v49  ;;  %5195 = vmatpush1.bf16.msra.mxu1 %v7647_v37  ;;  %v7729_v49 = vld [vmem:[%s9846_s9 + $0x788] ss:$16 sps:$4 sm:$0xff]   ;;  %v7734_v37 = vld [vmem:[%s9846_s9 + $0x7a4] ss:$16 sps:$4 sm:$0xff]  }
 0x6f4   :  { %5155 = vmatprep.subr.bf16.mxu0 %v7652_v19  ;;  %5196 = vmatprep.subr.bf16.mxu1 %v7655_v39  ;;  %v7737_v19 = vld [vmem:[%s9846_s9 + $0x7ac] ss:$16 sps:$4 sm:$0xff]   ;;  %v7732_v39 = vld [vmem:[%s9846_s9 + $0x7a0] ss:$16 sps:$4 sm:$0xff]  }
 0x6f7   :  { %5156 = vmatpush1.bf16.msra.mxu0 %v7650_v52  ;;  %5197 = vmatpush1.bf16.msra.mxu1 %v7653_v54  ;;  %v7735_v52 = vld [vmem:[%s9846_s9 + $0x7a8] ss:$16 sps:$4 sm:$0xff]   ;;  %v7740_v54 = vld [vmem:[%s9846_s9 + $0x7c4] ss:$16 sps:$4 sm:$0xff]  }
 0x6f8   :  { %5157 = vmatprep.subr.bf16.mxu0 %v7658_v44  ;;  %5198 = vmatprep.subr.bf16.mxu1 %v7661_v56  ;;  %v7743_v44 = vld [vmem:[%s9846_s9 + $0x7cc] ss:$16 sps:$4 sm:$0xff]   ;;  %v7738_v56 = vld [vmem:[%s9846_s9 + $0x7c0] ss:$16 sps:$4 sm:$0xff]  }
 0x6fb   :  { %5158 = vmatpush1.bf16.msra.mxu0 %v7656_v3  ;;  %5199 = vmatpush1.bf16.msra.mxu1 %v7659_v48  ;;  %v7741_v3 = vld [vmem:[%s9846_s9 + $0x7c8] ss:$16 sps:$4 sm:$0xff]   ;;  %v7746_v48 = vld [vmem:[%s9846_s9 + $0x7e4] ss:$16 sps:$4 sm:$0xff]  }
 0x6fc   :  { %5159 = vmatprep.subr.bf16.mxu0 %v7664_v51  ;;  %5200 = vmatprep.subr.bf16.mxu1 %v7667_v53  ;;  %v7749_v51 = vld [vmem:[%s9846_s9 + $0x7ec] ss:$16 sps:$4 sm:$0xff]   ;;  %v7744_v53 = vld [vmem:[%s9846_s9 + $0x7e0] ss:$16 sps:$4 sm:$0xff]  }
 0x6ff   :  { %5160 = vmatpush1.bf16.msra.mxu0 %v7662_v57  ;;  %5201 = vmatpush1.bf16.msra.mxu1 %v7665_v36  ;;  %v7747_v57 = vld [vmem:[%s9846_s9 + $0x7e8] ss:$16 sps:$4 sm:$0xff]   ;;  %v7752_v36 = vld [vmem:[%s9846_s9 + $0x804] ss:$16 sps:$4 sm:$0xff]  }
 0x700   :  { %5161 = vmatprep.subr.bf16.mxu0 %v7670_v14  ;;  %5202 = vmatprep.subr.bf16.mxu1 %v7673_v17  ;;  %v7755_v14 = vld [vmem:[%s9846_s9 + $0x80c] ss:$16 sps:$4 sm:$0xff]   ;;  %v7750_v17 = vld [vmem:[%s9846_s9 + $0x800] ss:$16 sps:$4 sm:$0xff]  }
 0x703   :  { %5162 = vmatpush1.bf16.msra.mxu0 %v7668_v62  ;;  %5203 = vmatpush1.bf16.msra.mxu1 %v7671_v61  ;;  %v7753_v62 = vld [vmem:[%s9846_s9 + $0x808] ss:$16 sps:$4 sm:$0xff]   ;;  %v7758_v61 = vld [vmem:[%s9846_s9 + $0x824] ss:$16 sps:$4 sm:$0xff]  }
 0x704   :  { %5163 = vmatprep.subr.bf16.mxu0 %v7676_v46  ;;  %5204 = vmatprep.subr.bf16.mxu1 %v7679_v50  ;;  %v7761_v46 = vld [vmem:[%s9846_s9 + $0x82c] ss:$16 sps:$4 sm:$0xff]   ;;  %v7756_v50 = vld [vmem:[%s9846_s9 + $0x820] ss:$16 sps:$4 sm:$0xff]  }
 0x707   :  { %5164 = vmatpush1.bf16.msra.mxu0 %v7674_v4  ;;  %5205 = vmatpush1.bf16.msra.mxu1 %v7677_v59  ;;  %v7759_v4 = vld [vmem:[%s9846_s9 + $0x828] ss:$16 sps:$4 sm:$0xff]   ;;  %v7764_v59 = vld [vmem:[%s9846_s9 + $0x844] ss:$16 sps:$4 sm:$0xff]  }
 0x708   :  { %5165 = vmatprep.subr.bf16.mxu0 %v7682_v63  ;;  %5206 = vmatprep.subr.bf16.mxu1 %v7685_v5  ;;  %v7767_v63 = vld [vmem:[%s9846_s9 + $0x84c] ss:$16 sps:$4 sm:$0xff]   ;;  %v7762_v5 = vld [vmem:[%s9846_s9 + $0x840] ss:$16 sps:$4 sm:$0xff]  }
 0x70b   :  { %5166 = vmatpush1.bf16.msra.mxu0 %v7680_v6  ;;  %5207 = vmatpush1.bf16.msra.mxu1 %v7683_v58  ;;  %v7765_v6 = vld [vmem:[%s9846_s9 + $0x848] ss:$16 sps:$4 sm:$0xff]   ;;  %v7770_v58 = vld [vmem:[%s9846_s9 + $0x864] ss:$16 sps:$4 sm:$0xff]  }
 0x70c   :  { %5167 = vmatprep.subr.bf16.mxu0 %v7688_v2  ;;  %5208 = vmatprep.subr.bf16.mxu1 %v7691_v7  ;;  %v7773_v2 = vld [vmem:[%s9846_s9 + $0x86c] ss:$16 sps:$4 sm:$0xff]  }
 0x70f   :  { %5168 = vmatpush1.bf16.msra.mxu0 %v7686_v8  ;;  %5209 = vmatpush1.bf16.msra.mxu1 %v7689_v9 }
 0x710   :  { %5169 = vmatprep.subr.bf16.mxu0 %v7694_v15  ;;  %5210 = vmatprep.subr.bf16.mxu1 %v7697_v55  ;;  %v7768_v55 = vld [vmem:[%s9846_s9 + $0x860] ss:$16 sps:$4 sm:$0xff]  }
 0x713   :  { %5170 = vmatpush1.bf16.msra.mxu0 %v7692_v60  ;;  %5211 = vmatpush1.bf16.msra.mxu1 %v7695_v1  ;;  %v7771_v60 = vld [vmem:[%s9846_s9 + $0x868] ss:$16 sps:$4 sm:$0xff]  }
 0x714   :  { %5171 = vmatprep.subr.bf16.mxu0 %v7700_v20  ;;  %5212 = vmatprep.subr.bf16.mxu1 %v7703_v18  ;;  %v7776_v18 = vld [vmem:[%s9846_s9 + $0x884] ss:$16 sps:$4 sm:$0xff]  }
 0x717   :  { %5172 = vmatpush1.bf16.msra.mxu0 %v7698_v23  ;;  %5213 = vmatpush1.bf16.msra.mxu1 %v7701_v10  ;;  %v7779_v23 = vld [vmem:[%s9846_s9 + $0x88c] ss:$16 sps:$4 sm:$0xff]  }
 0x718   :  { %5173 = vmatprep.subr.bf16.mxu0 %v7706_v16  ;;  %5214 = vmatprep.subr.bf16.mxu1 %v7709_v41  ;;  %v7774_v41 = vld [vmem:[%s9846_s9 + $0x880] ss:$16 sps:$4 sm:$0xff]  }
 0x71b   :  { %5174 = vmatpush1.bf16.msra.mxu0 %v7704_v26  ;;  %5215 = vmatpush1.bf16.msra.mxu1 %v7707_v43  ;;  %v7785_v26 = vld [vmem:[%s9846_s9 + $0x8ac] ss:$16 sps:$4 sm:$0xff]   ;;  %v7780_v43 = vld [vmem:[%s9846_s9 + $0x8a0] ss:$16 sps:$4 sm:$0xff]  }
 0x71c   :  { %6549 = vmatprep.subr.msk.bf16.mxu0 %vm2475_vm1, %v6546_v24  ;;  %6551 = vmatprep.subr.msk.bf16.mxu1 %vm2475_vm1, %v6548_v32  ;;  %v7783_v24 = vld [vmem:[%s9846_s9 + $0x8a8] ss:$16 sps:$4 sm:$0xff]   ;;  %v7788_v32 = vld [vmem:[%s9846_s9 + $0x8c4] ss:$16 sps:$4 sm:$0xff]  }
 0x71f   :  { %5176 = vmatpush1.bf16.msra.mxu0 %v5136_v31  ;;  %5217 = vmatpush1.bf16.msra.mxu1 %v5142_v33  ;;  %v7789_v31 = vld [vmem:[%s9846_s9 + $0x8c8] ss:$16 sps:$4 sm:$0xff]   ;;  %v7794_v33 = vld [vmem:[%s9846_s9 + $0x8e4] ss:$16 sps:$4 sm:$0xff]  }
 0x720   :  { %5600 = vmatprep.subr.bf16.mxu0 %v7716_v11  ;;  %5641 = vmatprep.subr.bf16.mxu1 %v7719_v35  ;;  %v7797_v11 = vld [vmem:[%s9846_s9 + $0x8ec] ss:$16 sps:$4 sm:$0xff]   ;;  %v6609_v35 = vld [vmem:[%s9846_s9 + $0x900] sm:$0xff] }
 0x722   :  { %5180 = vmatmul.mubr.bf16.vlgmr.msra.gmra.mrb[176].mxu0 %v4839_v29  ;;  %5221 = vmatmul.mubr.bf16.vlgmr.msra.gmra.mrb[84].mxu1 %v4839_v29  ;;  %v7795_v29 = vld [vmem:[%s9846_s9 + $0x8e8] ss:$16 sps:$4 sm:$0xff]  }
 0x723   :  { %5601 = vmatpush1.bf16.msra.mxu0 %v7714_v38  ;;  %5642 = vmatpush1.bf16.msra.mxu1 %v7717_v25  ;;  %v6610_v38 = vld [vmem:[%s9846_s9 + $0x908] sm:$0xff]  ;;  %v7792_v25 = vld [vmem:[%s9846_s9 + $0x8e0] ss:$16 sps:$4 sm:$0xff]  }
 0x724   :  { %5602 = vmatprep.subr.bf16.mxu0 %v7722_v30  ;;  %5643 = vmatprep.subr.bf16.mxu1 %v7725_v40  ;;  %v6668_v30 = vcombine.high %v6609_v35, %v6609_v35  ;;  %v6670_v40 = vcombine.high %v6610_v38, %v6610_v38 }
 0x725   :  { %6672 = vmatprep.mubr.msk.bf16.mxu0 %vm3841_vm3, %v5293_v42  ;;  %6674 = vmatprep.mubr.msk.bf16.mxu1 %vm3841_vm3, %v5293_v42 }
 0x727   :  { %5603 = vmatpush1.bf16.msra.mxu0 %v7720_v13  ;;  %5644 = vmatpush1.bf16.msra.mxu1 %v7723_v21  ;;  %v6667_v13 = vcombine.low %v6609_v35, %v6609_v35  ;;  %v6669_v21 = vcombine.low %v6610_v38, %v6610_v38 }
 0x728   :  { %5604 = vmatprep.subr.bf16.mxu0 %v7728_v45  ;;  %5645 = vmatprep.subr.bf16.mxu1 %v7731_v47  ;;  %v5292_v47 = vrot.slane %v9081_v12, 2 }
 0x729   :  { %v5589_v42 = vsel %vm2475_vm1, %v6667_v13, 0  ;;  %v5595_v45 = vsel %vm2475_vm1, %v6669_v21, 0 }
 0x72b   :  { %5605 = vmatpush1.bf16.msra.mxu0 %v7726_v22  ;;  %5646 = vmatpush1.bf16.msra.mxu1 %v7729_v49 }
 0x72c   :  { %5606 = vmatprep.subr.bf16.mxu0 %v7734_v37  ;;  %5647 = vmatprep.subr.bf16.mxu1 %v7737_v19 }
 0x72f   :  { %5607 = vmatpush1.bf16.msra.mxu0 %v7732_v39  ;;  %5648 = vmatpush1.bf16.msra.mxu1 %v7735_v52 }
 0x730   :  { %5608 = vmatprep.subr.bf16.mxu0 %v7740_v54  ;;  %5649 = vmatprep.subr.bf16.mxu1 %v7743_v44 }
 0x733   :  { %5609 = vmatpush1.bf16.msra.mxu0 %v7738_v56  ;;  %5650 = vmatpush1.bf16.msra.mxu1 %v7741_v3 }
 0x734   :  { %5610 = vmatprep.subr.bf16.mxu0 %v7746_v48  ;;  %5651 = vmatprep.subr.bf16.mxu1 %v7749_v51 }
 0x737   :  { %5611 = vmatpush1.bf16.msra.mxu0 %v7744_v53  ;;  %5652 = vmatpush1.bf16.msra.mxu1 %v7747_v57 }
 0x738   :  { %5612 = vmatprep.subr.bf16.mxu0 %v7752_v36  ;;  %5653 = vmatprep.subr.bf16.mxu1 %v7755_v14 }
 0x73b   :  { %5613 = vmatpush1.bf16.msra.mxu0 %v7750_v17  ;;  %5654 = vmatpush1.bf16.msra.mxu1 %v7753_v62 }
 0x73c   :  { %5614 = vmatprep.subr.bf16.mxu0 %v7758_v61  ;;  %5655 = vmatprep.subr.bf16.mxu1 %v7761_v46 }
 0x73f   :  { %5615 = vmatpush1.bf16.msra.mxu0 %v7756_v50  ;;  %5656 = vmatpush1.bf16.msra.mxu1 %v7759_v4 }
 0x740   :  { %5616 = vmatprep.subr.bf16.mxu0 %v7764_v59  ;;  %5657 = vmatprep.subr.bf16.mxu1 %v7767_v63 }
 0x741   :  { %v9756_v7 = vpop.f32.mrb[164].mxu0  ;;  %v9758_v8 = vpop.f32.mrb[72].mxu1 }
 0x742   :  { %v9760_v9 = vpop.f32.mrb[165].mxu0  ;;  %v9762_v15 = vpop.f32.mrb[73].mxu1 }
 0x743   :  { %5617 = vmatpush1.bf16.msra.mxu0 %v7762_v5  ;;  %5658 = vmatpush1.bf16.msra.mxu1 %v7765_v6  ;;  %v3895_v1 = vpop.f32.mrb[166].mxu0  ;;  %v3936_v20 = vpop.f32.mrb[74].mxu1 }
 0x744   :  { %5618 = vmatprep.subr.bf16.mxu0 %v7770_v58  ;;  %5659 = vmatprep.subr.bf16.mxu1 %v7773_v2  ;;  %v3896_v10 = vpop.f32.mrb[167].mxu0  ;;  %v3937_v16 = vpop.f32.mrb[75].mxu1  ;;  %v5687_v20 = vlaneseq }
 0x745   :  { %v3379_v16 = vld [vmem:[%s9848_s8] sm:$0xf] }
 0x746   :  { %vm5742_vm4 = vcmp.lt.s32.totalorder %v5687_v20, 512 }
 0x747   :  { %5619 = vmatpush1.bf16.msra.mxu0 %v7768_v55  ;;  %5660 = vmatpush1.bf16.msra.mxu1 %v7771_v60 }
 0x748   :  { %5620 = vmatprep.subr.bf16.mxu0 %v7776_v18  ;;  %5661 = vmatprep.subr.bf16.mxu1 %v7779_v23  ;;  %v5688_v18 = vshrl.u32 %v5687_v20, 7 }
 0x74a   :  { %v5689_v23 = vsub.s32 0, %v5688_v18  ;;  %v5697_v10 = vsub.s32 2, %v5688_v18 }
 0x74b   :  { %5621 = vmatpush1.bf16.msra.mxu0 %v7774_v41  ;;  %5662 = vmatpush1.bf16.msra.mxu1 %v7777_v27  ;;  %v5693_v41 = vsub.s32 1, %v5688_v18  ;;  %v7803_v27 = vmov 1966171168  }
 0x74c   :  { %5622 = vmatprep.subr.bf16.mxu0 %v7782_v34  ;;  %5663 = vmatprep.subr.bf16.mxu1 %v7785_v26  ;;  %v5718_v34 = vunpack.c.l.s4 %v7803_v27  ;;  %v5701_v26 = vsub.s32 3, %v5688_v18 }
 0x74f   :  { %5623 = vmatpush1.bf16.msra.mxu0 %v7780_v43  ;;  %5664 = vmatpush1.bf16.msra.mxu1 %v7783_v24  ;;  %v5690_v43 = vrot.slane %v3379_v16, %v5689_v23  ;;  %v5698_v24 = vrot.slane %v3379_v16, %v5697_v10 }
 0x750   :  { %5624 = vmatprep.subr.bf16.mxu0 %v7788_v32  ;;  %5665 = vmatprep.subr.bf16.mxu1 %v7791_v0 }
 0x753   :  { %5625 = vmatpush1.bf16.msra.mxu0 %v7786_v28  ;;  %5666 = vmatpush1.bf16.msra.mxu1 %v7789_v31  ;;  %v5694_v28 = vrot.slane %v3379_v16, %v5693_v41  ;;  %v5719_v31 = vunpack.c.0.s8 %v5718_v34 }
 0x754   :  { %5626 = vmatprep.subr.bf16.mxu0 %v7794_v33  ;;  %5667 = vmatprep.subr.bf16.mxu1 %v7797_v11  ;;  %v5702_v33 = vrot.slane %v3379_v16, %v5701_v26 }
 0x757   :  { %5627 = vmatpush1.bf16.msra.mxu0 %v7792_v25  ;;  %5668 = vmatpush1.bf16.msra.mxu1 %v7795_v29 }
 0x758   :  { %6671 = vmatprep.subr.msk.bf16.mxu0 %vm2475_vm1, %v6668_v30  ;;  %6673 = vmatprep.subr.msk.bf16.mxu1 %vm2475_vm1, %v6670_v40 }
 0x75b   :  { %5629 = vmatpush1.bf16.msra.mxu0 %v5589_v42  ;;  %5670 = vmatpush1.bf16.msra.mxu1 %v5595_v45 }
 0x75e   :  { %5633 = vmatmul.mubr.bf16.vlgmr.msra.gmra.mrb[180].mxu0 %v5292_v47  ;;  %5674 = vmatmul.mubr.bf16.vlgmr.msra.gmra.mrb[88].mxu1 %v5292_v47 }
 0x77d   :  { %v4277_v22 = vpop.f32.mrb[168].mxu0  ;;  %v4318_v49 = vpop.f32.mrb[76].mxu1 }
 0x77e   :  { %v4278_v37 = vadd.f32 %v4277_v22, %v9756_v7  ;;  %v4319_v19 = vadd.f32 %v4318_v49, %v9758_v8  ;;  %v4279_v39 = vpop.f32.mrb[169].mxu0  ;;  %v4320_v52 = vpop.f32.mrb[77].mxu1  ;;  %v5722_v49 = vsub.s32 %v5719_v31, %v5688_v18 }
 0x77f   :  { %v4280_v54 = vadd.f32 %v4279_v39, %v9760_v9  ;;  %v4321_v44 = vadd.f32 %v4320_v52, %v9762_v15  ;;  %v4281_v56 = vpop.f32.mrb[170].mxu0  ;;  %v4322_v3 = vpop.f32.mrb[78].mxu1 }
 0x780   :  { %v4282_v48 = vpop.f32.mrb[171].mxu0  ;;  %v4323_v51 = vpop.f32.mrb[79].mxu1 }
 0x7b9   :  { %v4728_v53 = vpop.f32.mrb[172].mxu0  ;;  %v4769_v12 = vpop.f32.mrb[80].mxu1 }
 0x7ba   :  { %v4776_v57 = vadd.f32 %v4728_v53, %v4278_v37  ;;  %v4778_v36 = vadd.f32 %v4769_v12, %v4319_v19  ;;  %v4730_v14 = vpop.f32.mrb[173].mxu0  ;;  %v4771_v17 = vpop.f32.mrb[81].mxu1 }
 0x7bb   :  { %v4777_v62 = vadd.f32 %v4730_v14, %v4280_v54  ;;  %v4779_v61 = vadd.f32 %v4771_v17, %v4321_v44  ;;  %v4732_v46 = vpop.f32.mrb[174].mxu0  ;;  %v4773_v50 = vpop.f32.mrb[82].mxu1 }
 0x7bc   :  { %v4733_v4 = vpop.f32.mrb[175].mxu0  ;;  %v4774_v59 = vpop.f32.mrb[83].mxu1 }
 0x7f5   :  { %v5181_v63 = vpop.f32.mrb[176].mxu0  ;;  %v5222_v5 = vpop.f32.mrb[84].mxu1 }
 0x7f6   :  { %v5229_v6 = vadd.f32 %v5181_v63, %v4776_v57  ;;  %v5231_v58 = vadd.f32 %v5222_v5, %v4778_v36  ;;  %v5183_v2 = vpop.f32.mrb[177].mxu0  ;;  %v5224_v7 = vpop.f32.mrb[85].mxu1 }
 0x7f7   :  { %v5230_v8 = vadd.f32 %v5183_v2, %v4777_v62  ;;  %v5232_v9 = vadd.f32 %v5224_v7, %v4779_v61  ;;  %v5185_v15 = vpop.f32.mrb[178].mxu0  ;;  %v5226_v55 = vpop.f32.mrb[86].mxu1 }
 0x7f8   :  { %v5186_v60 = vpop.f32.mrb[179].mxu0  ;;  %v5227_v1 = vpop.f32.mrb[87].mxu1 }
 0x831   :  { %v5634_v32 = vpop.f32.mrb[180].mxu0  ;;  %v5675_v0 = vpop.f32.mrb[88].mxu1 }
 0x832   :  { %v5682_v11 = vadd.f32 %v5634_v32, %v5229_v6  ;;  %v5684_v35 = vadd.f32 %v5675_v0, %v5231_v58  ;;  %v5636_v38 = vpop.f32.mrb[181].mxu0  ;;  %v5677_v25 = vpop.f32.mrb[89].mxu1 }
 0x833   :  { %v5683_v29 = vadd.f32 %v5636_v38, %v5230_v8  ;;  %v5685_v30 = vadd.f32 %v5677_v25, %v5232_v9  ;;  %v5638_v40 = vpop.f32.mrb[182].mxu0  ;;  %v5679_v13 = vpop.f32.mrb[90].mxu1 }
 0x834   :  { %v5707_v21 = vadd.f32 %v5690_v43, %v5682_v11  ;;  %v5709_v42 = vadd.f32 %v5698_v24, %v5684_v35  ;;  %v5639_v45 = vpop.f32.mrb[183].mxu0  ;;  %v5680_v47 = vpop.f32.mrb[91].mxu1 }
 0x835   :  { %v5708_v22 = vadd.f32 %v5694_v28, %v5683_v29  ;;  %v5710_v37 = vadd.f32 %v5702_v33, %v5685_v30 }
 0x837   :  { %v5715_v19 = vcombine.low %v5707_v21, %v5708_v22  ;;  %v5716_v39 = vcombine.low %v5709_v42, %v5710_v37 }
 0x839   :  { %v5723_v52 = vrot.slane %v5715_v19, %v5722_v49  ;;  %v5730_v54 = vrot.slane %v5716_v39, %v5722_v49 }
 0x83b   :  { %v5731_v44 = vcombine.low %v5723_v52, %v5730_v54 }
 0x83d   :  { %v5738_v56 = vrot.slane %v5731_v44, %v5722_v49 }
 0x83f   :  { %5744 = vst.msk [vmem:[%s9849_s10] sm:$0xf] %vm5742_vm4, %v5738_v56 }

</bundles_post_ra>
